<compile_context>
chip_gen: v7x
topology: tpu7x:2x2x1
jax: 0.10.0
libtpu: 0.0.40
codegen_flags: <defaults>
</compile_context>

<pallas_src>
import math
import functools

import numpy as np
import jax
import jax.numpy as jnp
from jax.experimental import pallas as pl
from jax.experimental.pallas import tpu as pltpu


# ----------------------------------------------------------------------------
# Fused whole-model Pallas kernel
# ----------------------------------------------------------------------------
def _fused_forward_kernel(
    na_ref, fcond_ref, xbias_ref, condbias_ref, smask_ref, cmask_ref,
    w_sa_ref, w_cond_ref,
    enc1_w_ref, enc1_b_ref, enc2_w_ref, enc2_b_ref,
    sa_q_w_ref, sa_q_b_ref, sa_k_w_ref, sa_k_b_ref, sa_v_w_ref, sa_v_b_ref,
    sa_o_w_ref, sa_o_b_ref,
    ca_q_w_ref, ca_q_b_ref, ca_k_w_ref, ca_k_b_ref, ca_v_w_ref, ca_v_b_ref,
    ca_o_w_ref, ca_o_b_ref,
    ff1_w_ref, ff1_b_ref, ff2_w_ref, ff2_b_ref,
    n1_g_ref, n1_b_ref, n2_g_ref, n2_b_ref, n3_g_ref, n3_b_ref,
    lnf_g_ref, lnf_b_ref, pred_w_ref, pred_b_ref,
    out_ref,
    *, num_layers, nhead, head_dim, eps):
    f32 = jnp.float32

    def dot(a, b):
        return jnp.dot(a, b, preferred_element_type=f32)

    def layer_norm(x, g, b):
        mu = jnp.mean(x, axis=-1, keepdims=True)
        c = x - mu
        var = jnp.mean(c * c, axis=-1, keepdims=True)
        return c * jax.lax.rsqrt(var + eps) * g + b

    def softmax(s):
        s = s - jnp.max(s, axis=-1, keepdims=True)
        p = jnp.exp(s)
        return p * pl.reciprocal(jnp.sum(p, axis=-1, keepdims=True), approx=True)

    def mish(y):
        sp = jnp.maximum(y, 0.0) + jnp.log(1.0 + jnp.exp(-jnp.abs(y)))
        return y * jnp.tanh(sp)

    def gelu(y):
        return 0.5 * y * (1.0 + jax.lax.erf(y * (1.0 / math.sqrt(2.0))))

    scale = 1.0 / math.sqrt(head_dim)

    def attention(src_q, src_kv, mask, base,
                  qw, qb, kw, kb, vw, vb, ow):
        # multi-head attention + out-projection (bias added by caller), heads accumulated
        y = jnp.zeros((src_q.shape[0], ow.shape[-1]), f32)
        for h in range(nhead):
            i = base + h
            qh = dot(src_q, qw[i]) + qb[i]                      # (Nq, hd)
            kh = dot(src_kv, kw[i]) + kb[i]                     # (Nk, hd)
            vh = dot(src_kv, vw[i]) + vb[i]                     # (Nk, hd)
            s = jax.lax.dot_general(                            # q @ k^T, no transpose op
                qh, kh, dimension_numbers=(((1,), (1,)), ((), ())),
                preferred_element_type=f32) * scale + mask
            p = softmax(s)
            oh = dot(p, vh)                                     # (Nq, hd)
            y = y + dot(oh, ow[i])                              # accumulate out-proj
        return y

    # ---- token embeddings (bias + positional emb pre-folded into *_bias rows) ----
    x = dot(na_ref[...], w_sa_ref[...]) + xbias_ref[...]              # (B*T, d)
    cond = dot(fcond_ref[...], w_cond_ref[...]) + condbias_ref[...]   # (B*Tc, d)

    # ---- condition encoder MLP (Mish) ----
    cond = mish(dot(cond, enc1_w_ref[...]) + enc1_b_ref[...])
    cond = dot(cond, enc2_w_ref[...]) + enc2_b_ref[...]

    smask = smask_ref[...]
    cmask = cmask_ref[...]

    # ---- decoder layers (norm_first TransformerDecoderLayer) ----
    for l in range(num_layers):
        base = l * nhead
        # causal self-attention
        hn = layer_norm(x, n1_g_ref[l], n1_b_ref[l])
        x = x + attention(hn, hn, smask, base,
                          sa_q_w_ref, sa_q_b_ref, sa_k_w_ref, sa_k_b_ref,
                          sa_v_w_ref, sa_v_b_ref, sa_o_w_ref) + sa_o_b_ref[l]
        # cross-attention over cond memory
        hn = layer_norm(x, n2_g_ref[l], n2_b_ref[l])
        x = x + attention(hn, cond, cmask, base,
                          ca_q_w_ref, ca_q_b_ref, ca_k_w_ref, ca_k_b_ref,
                          ca_v_w_ref, ca_v_b_ref, ca_o_w_ref) + ca_o_b_ref[l]
        # feed-forward (exact erf GELU)
        hn = layer_norm(x, n3_g_ref[l], n3_b_ref[l])
        f = gelu(dot(hn, ff1_w_ref[l]) + ff1_b_ref[l])
        x = x + dot(f, ff2_w_ref[l]) + ff2_b_ref[l]

    # ---- final LayerNorm + prediction head ----
    x = layer_norm(x, lnf_g_ref[...], lnf_b_ref[...])
    out_ref[...] = (dot(x, pred_w_ref[...]) + pred_b_ref[...]).astype(out_ref.dtype)


# ----------------------------------------------------------------------------
# Helpers (plain JAX / numpy, trace-time only)
# ----------------------------------------------------------------------------
def sinusoidal_pos_emb(positions, dim):
    half = dim // 2
    emb = math.log(10000.0) / (half - 1)
    emb = jnp.exp(jnp.arange(half, dtype=jnp.float32) * -emb)
    emb = positions.astype(jnp.float32)[:, None] * emb[None, :]
    return jnp.concatenate([jnp.sin(emb), jnp.cos(emb)], axis=-1)


def _attn_masks(B, T, Tc):
    """Block-diagonal (per-batch) causal self mask and per-batch cross mask.
    Built with numpy at trace time -> baked as constants (no runtime cost)."""
    qb = np.repeat(np.arange(B), T)           # batch index of each query row
    kb_self = qb
    kb_cross = np.repeat(np.arange(B), Tc)
    tq = np.tile(np.arange(T), B)
    tk = tq
    self_ok = (qb[:, None] == kb_self[None, :]) & (tk[None, :] <= tq[:, None])
    cross_ok = qb[:, None] == kb_cross[None, :]
    neg = np.float32(-np.inf)
    smask = np.where(self_ok, np.float32(0.0), neg).astype(np.float32)
    cmask = np.where(cross_ok, np.float32(0.0), neg).astype(np.float32)
    return jnp.asarray(smask), jnp.asarray(cmask)


# ----------------------------------------------------------------------------
# Parameter construction (mimics _init_weights: N(0, 0.02) weights, zero biases,
# LayerNorm weight=1 / bias=0).  Weights are pre-transposed to (in, out) layout,
# split per attention head, stacked across layers, and K-padded where needed.
# ----------------------------------------------------------------------------
def init_params(key, cfg):
    d = cfg["d_model"]; H = cfg["nhead"]; L = cfg["num_layers"]
    hd = d // H
    T = cfg["T"]; Tc = cfg["T_cond"] + 3
    in_dim = cfg["pred_obs_dim"] + cfg["act_dim"]
    out_dim = in_dim
    skill_dim = cfg["skill_dim"]; obs_dim = cfg["obs_dim"]
    in_dim_p = int(np.ceil(in_dim / 8) * 8)          # pad K to multiple of 8

    keys = iter(jax.random.split(key, 1024))

    def w(fin, fout):
        return 0.02 * jax.random.normal(next(keys), (fin, fout), jnp.float32)

    p = {}
    # state-action embedding; linear bias (zeros) + pos emb folded into x_bias rows
    p["w_sa_emb"] = jnp.pad(w(in_dim, d), ((0, in_dim_p - in_dim), (0, 0)))
    p["x_bias"] = sinusoidal_pos_emb(jnp.arange(T), d)                  # (T, d)

    # sigma / vel_cmd / skill / obs embeddings stacked into one matmul;
    # their (zero) biases + cond positional emb folded into cond_bias rows
    p["w_cond_emb"] = jnp.concatenate(
        [w(1, d), w(3, d), w(skill_dim, d), w(obs_dim, d)], axis=0)     # (16, d)
    p["cond_bias"] = sinusoidal_pos_emb(jnp.arange(Tc), d)              # (Tc, d)

    # condition encoder MLP
    p["enc1_w"] = w(d, 4 * d); p["enc1_b"] = jnp.zeros((1, 4 * d), jnp.float32)
    p["enc2_w"] = w(4 * d, d); p["enc2_b"] = jnp.zeros((1, d), jnp.float32)

    def split_in(W):   # (d, d) -> (H, d, hd)   per-head input projection
        return jnp.stack([W[:, h * hd:(h + 1) * hd] for h in range(H)], 0)

    def split_out(W):  # (d, d) -> (H, hd, d)   per-head slice of out-projection
        return jnp.stack([W[h * hd:(h + 1) * hd, :] for h in range(H)], 0)

    acc = {k: [] for k in ("sa_q_w", "sa_k_w", "sa_v_w", "sa_o_w",
                           "ca_q_w", "ca_k_w", "ca_v_w", "ca_o_w",
                           "ff1_w", "ff2_w")}
    for _ in range(L):
        acc["sa_q_w"].append(split_in(w(d, d)))
        acc["sa_k_w"].append(split_in(w(d, d)))
        acc["sa_v_w"].append(split_in(w(d, d)))
        acc["sa_o_w"].append(split_out(w(d, d)))
        acc["ca_q_w"].append(split_in(w(d, d)))
        acc["ca_k_w"].append(split_in(w(d, d)))
        acc["ca_v_w"].append(split_in(w(d, d)))
        acc["ca_o_w"].append(split_out(w(d, d)))
        acc["ff1_w"].append(w(d, 4 * d))
        acc["ff2_w"].append(w(4 * d, d))

    for name in ("sa_q_w", "sa_k_w", "sa_v_w", "sa_o_w",
                 "ca_q_w", "ca_k_w", "ca_v_w", "ca_o_w"):
        p[name] = jnp.concatenate(acc[name], axis=0)       # (L*H, ., .)
    p["ff1_w"] = jnp.stack(acc["ff1_w"], 0)                # (L, d, 4d)
    p["ff2_w"] = jnp.stack(acc["ff2_w"], 0)                # (L, 4d, d)

    z = lambda *s: jnp.zeros(s, jnp.float32)
    p["sa_q_b"] = z(L * H, 1, hd); p["sa_k_b"] = z(L * H, 1, hd); p["sa_v_b"] = z(L * H, 1, hd)
    p["sa_o_b"] = z(L, 1, d)
    p["ca_q_b"] = z(L * H, 1, hd); p["ca_k_b"] = z(L * H, 1, hd); p["ca_v_b"] = z(L * H, 1, hd)
    p["ca_o_b"] = z(L, 1, d)
    p["ff1_b"] = z(L, 1, 4 * d); p["ff2_b"] = z(L, 1, d)
    p["n1_g"] = jnp.ones((L, 1, d), jnp.float32); p["n1_b"] = z(L, 1, d)
    p["n2_g"] = jnp.ones((L, 1, d), jnp.float32); p["n2_b"] = z(L, 1, d)
    p["n3_g"] = jnp.ones((L, 1, d), jnp.float32); p["n3_b"] = z(L, 1, d)
    p["lnf_g"] = jnp.ones((1, d), jnp.float32); p["lnf_b"] = z(1, d)
    p["pred_w"] = w(d, out_dim); p["pred_b"] = z(1, out_dim)
    return p


# ----------------------------------------------------------------------------
# Forward pass (matches DiffusionTransformer.forward, inference / dropout = id)
# ----------------------------------------------------------------------------
def diffusion_transformer_forward(params, noised_action, sigma, obs, vel_cmd,
                                  skill, cfg):
    B, T, in_dim = noised_action.shape
    d = cfg["d_model"]; H = cfg["nhead"]; L = cfg["num_layers"]
    Tc = cfg["T_cond"] + 3
    out_dim = cfg["pred_obs_dim"] + cfg["act_dim"]
    skill_dim = skill.shape[-1]; obs_dim = obs.shape[-1]
    in_dim_p = params["w_sa_emb"].shape[0]

    # flattened, K-padded state-action tokens
    na2d = noised_action.reshape(B * T, in_dim)
    if in_dim_p > in_dim:
        na2d = jnp.pad(na2d, ((0, 0), (0, in_dim_p - in_dim)))

    # condition token feature matrix, block layout matching w_cond_emb stacking
    feat = 1 + 3 + skill_dim + obs_dim
    sig = jnp.log(sigma.reshape(B, 1, 1)) / 4.0
    tok_sigma = jnp.pad(sig, ((0, 0), (0, 0), (0, feat - 1)))
    tok_vel = jnp.pad(vel_cmd.reshape(B, 1, 3), ((0, 0), (0, 0), (1, feat - 4)))
    tok_skill = jnp.pad(skill.reshape(B, 1, skill_dim),
                        ((0, 0), (0, 0), (4, feat - 4 - skill_dim)))
    tok_obs = jnp.pad(obs, ((0, 0), (0, 0), (4 + skill_dim, 0)))
    fcond2d = jnp.concatenate([tok_sigma, tok_vel, tok_skill, tok_obs],
                              axis=1).reshape(B * Tc, feat)

    # bias(+positional-emb) rows tiled over batch
    x_bias = jnp.tile(params["x_bias"], (B, 1))          # (B*T, d)
    cond_bias = jnp.tile(params["cond_bias"], (B, 1))    # (B*Tc, d)

    # block-diagonal (per-batch) causal / full attention masks (compile-time consts)
    self_mask, cross_mask = _attn_masks(B, T, Tc)

    args = (na2d, fcond2d, x_bias, cond_bias, self_mask, cross_mask,
            params["w_sa_emb"], params["w_cond_emb"],
            params["enc1_w"], params["enc1_b"], params["enc2_w"], params["enc2_b"],
            params["sa_q_w"], params["sa_q_b"], params["sa_k_w"], params["sa_k_b"],
            params["sa_v_w"], params["sa_v_b"], params["sa_o_w"], params["sa_o_b"],
            params["ca_q_w"], params["ca_q_b"], params["ca_k_w"], params["ca_k_b"],
            params["ca_v_w"], params["ca_v_b"], params["ca_o_w"], params["ca_o_b"],
            params["ff1_w"], params["ff1_b"], params["ff2_w"], params["ff2_b"],
            params["n1_g"], params["n1_b"], params["n2_g"], params["n2_b"],
            params["n3_g"], params["n3_b"],
            params["lnf_g"], params["lnf_b"], params["pred_w"], params["pred_b"])

    kernel = functools.partial(_fused_forward_kernel, num_layers=L, nhead=H,
                               head_dim=d // H, eps=1e-5)
    out2d = pl.pallas_call(
        kernel,
        out_shape=jax.ShapeDtypeStruct((B * T, out_dim), jnp.float32),
        compiler_params=pltpu.CompilerParams(vmem_limit_bytes=32 * 1024 * 1024),
    )(*args)
    return out2d.reshape(B, T, out_dim)


# ----------------------------------------------------------------------------
if __name__ == "__main__":
    cfg = dict(obs_dim=8, pred_obs_dim=8, skill_dim=4, act_dim=4,
               d_model=32, nhead=4, num_layers=2, T=8, T_cond=5)

    params = init_params(jax.random.PRNGKey(0), cfg)

    k1, k2, k3, k4, k5 = jax.random.split(jax.random.PRNGKey(0), 5)
    B = 2
    noised_action = jax.random.normal(
        k1, (B, cfg["T"], cfg["pred_obs_dim"] + cfg["act_dim"]), jnp.float32)
    sigma = jax.random.uniform(k2, (B,), jnp.float32, 0.1, 1.0)
    obs = jax.random.normal(k3, (B, cfg["T_cond"], cfg["obs_dim"]), jnp.float32)
    vel_cmd = jax.random.normal(k4, (B, 3), jnp.float32)
    skill = jax.random.normal(k5, (B, cfg["skill_dim"]), jnp.float32)

    fwd = jax.jit(lambda p, na, s, o, v, sk:
                  diffusion_transformer_forward(p, na, s, o, v, sk, cfg))
    out = jax.block_until_ready(fwd(params, noised_action, sigma, obs, vel_cmd, skill))

    assert out.shape == (B, cfg["T"], cfg["pred_obs_dim"] + cfg["act_dim"]), out.shape
    assert bool(jnp.all(jnp.isfinite(out)))
    # TODO(synk): dropout layers are identity (inference semantics); mask_cond() and the
    # training-only utilities (get_optim_groups / detach_all) are not on the forward path.
    print("KERNEL_OK")
</pallas_src>

<mosaic_0001>
module attributes {stable_mosaic.version = 11 : i64} {
  func.func @_fused_forward_kernel(%arg0: memref<16x16xf32, #tpu.memory_space<vmem>>, %arg1: memref<16x16xf32, #tpu.memory_space<vmem>>, %arg2: memref<16x32xf32, #tpu.memory_space<vmem>>, %arg3: memref<16x32xf32, #tpu.memory_space<vmem>>, %arg4: memref<16x16xf32, #tpu.memory_space<vmem>>, %arg5: memref<16x16xf32, #tpu.memory_space<vmem>>, %arg6: memref<16x32xf32, #tpu.memory_space<vmem>>, %arg7: memref<16x32xf32, #tpu.memory_space<vmem>>, %arg8: memref<32x128xf32, #tpu.memory_space<vmem>>, %arg9: memref<1x128xf32, #tpu.memory_space<vmem>>, %arg10: memref<128x32xf32, #tpu.memory_space<vmem>>, %arg11: memref<1x32xf32, #tpu.memory_space<vmem>>, %arg12: memref<8x32x8xf32, #tpu.memory_space<vmem>>, %arg13: memref<8x1x8xf32, #tpu.memory_space<vmem>>, %arg14: memref<8x32x8xf32, #tpu.memory_space<vmem>>, %arg15: memref<8x1x8xf32, #tpu.memory_space<vmem>>, %arg16: memref<8x32x8xf32, #tpu.memory_space<vmem>>, %arg17: memref<8x1x8xf32, #tpu.memory_space<vmem>>, %arg18: memref<8x8x32xf32, #tpu.memory_space<vmem>>, %arg19: memref<2x1x32xf32, #tpu.memory_space<vmem>>, %arg20: memref<8x32x8xf32, #tpu.memory_space<vmem>>, %arg21: memref<8x1x8xf32, #tpu.memory_space<vmem>>, %arg22: memref<8x32x8xf32, #tpu.memory_space<vmem>>, %arg23: memref<8x1x8xf32, #tpu.memory_space<vmem>>, %arg24: memref<8x32x8xf32, #tpu.memory_space<vmem>>, %arg25: memref<8x1x8xf32, #tpu.memory_space<vmem>>, %arg26: memref<8x8x32xf32, #tpu.memory_space<vmem>>, %arg27: memref<2x1x32xf32, #tpu.memory_space<vmem>>, %arg28: memref<2x32x128xf32, #tpu.memory_space<vmem>>, %arg29: memref<2x1x128xf32, #tpu.memory_space<vmem>>, %arg30: memref<2x128x32xf32, #tpu.memory_space<vmem>>, %arg31: memref<2x1x32xf32, #tpu.memory_space<vmem>>, %arg32: memref<2x1x32xf32, #tpu.memory_space<vmem>>, %arg33: memref<2x1x32xf32, #tpu.memory_space<vmem>>, %arg34: memref<2x1x32xf32, #tpu.memory_space<vmem>>, %arg35: memref<2x1x32xf32, #tpu.memory_space<vmem>>, %arg36: memref<2x1x32xf32, #tpu.memory_space<vmem>>, %arg37: memref<2x1x32xf32, #tpu.memory_space<vmem>>, %arg38: memref<1x32xf32, #tpu.memory_space<vmem>>, %arg39: memref<1x32xf32, #tpu.memory_space<vmem>>, %arg40: memref<32x12xf32, #tpu.memory_space<vmem>>, %arg41: memref<1x12xf32, #tpu.memory_space<vmem>>, %arg42: memref<16x12xf32, #tpu.memory_space<vmem>>) attributes {dimension_semantics = [], scalar_prefetch = 0 : i64, scratch_operands = 0 : i64, tpu.core_type = #tpu.core_type<tc>} {
    %c0 = arith.constant 0 : index
    %c0_0 = arith.constant 0 : index
    %0 = vector.load %arg0[%c0, %c0_0] : memref<16x16xf32, #tpu.memory_space<vmem>>, vector<16x16xf32>
    %c0_1 = arith.constant 0 : index
    %c0_2 = arith.constant 0 : index
    %1 = vector.load %arg6[%c0_1, %c0_2] : memref<16x32xf32, #tpu.memory_space<vmem>>, vector<16x32xf32>
    %cst = arith.constant dense<0.000000e+00> : vector<16x32xf32>
    %2 = tpu.matmul %0, %1, %cst {dimension_numbers = #tpu.dot_dimension_numbers<[1], [0], [0], [1], [0, 0, 1, 1], [], []>} : vector<16x16xf32>, vector<16x32xf32>, vector<16x32xf32> -> vector<16x32xf32>
    %c0_3 = arith.constant 0 : index
    %c0_4 = arith.constant 0 : index
    %3 = vector.load %arg2[%c0_3, %c0_4] : memref<16x32xf32, #tpu.memory_space<vmem>>, vector<16x32xf32>
    %4 = arith.addf %2, %3 : vector<16x32xf32>
    %c0_5 = arith.constant 0 : index
    %c0_6 = arith.constant 0 : index
    %5 = vector.load %arg1[%c0_5, %c0_6] : memref<16x16xf32, #tpu.memory_space<vmem>>, vector<16x16xf32>
    %c0_7 = arith.constant 0 : index
    %c0_8 = arith.constant 0 : index
    %6 = vector.load %arg7[%c0_7, %c0_8] : memref<16x32xf32, #tpu.memory_space<vmem>>, vector<16x32xf32>
    %cst_9 = arith.constant dense<0.000000e+00> : vector<16x32xf32>
    %7 = tpu.matmul %5, %6, %cst_9 {dimension_numbers = #tpu.dot_dimension_numbers<[1], [0], [0], [1], [0, 0, 1, 1], [], []>} : vector<16x16xf32>, vector<16x32xf32>, vector<16x32xf32> -> vector<16x32xf32>
    %c0_10 = arith.constant 0 : index
    %c0_11 = arith.constant 0 : index
    %8 = vector.load %arg3[%c0_10, %c0_11] : memref<16x32xf32, #tpu.memory_space<vmem>>, vector<16x32xf32>
    %9 = arith.addf %7, %8 : vector<16x32xf32>
    %c0_12 = arith.constant 0 : index
    %c0_13 = arith.constant 0 : index
    %10 = vector.load %arg8[%c0_12, %c0_13] : memref<32x128xf32, #tpu.memory_space<vmem>>, vector<32x128xf32>
    %cst_14 = arith.constant dense<0.000000e+00> : vector<16x128xf32>
    %11 = tpu.matmul %9, %10, %cst_14 {dimension_numbers = #tpu.dot_dimension_numbers<[1], [0], [0], [1], [0, 0, 1, 1], [], []>} : vector<16x32xf32>, vector<32x128xf32>, vector<16x128xf32> -> vector<16x128xf32>
    %c0_15 = arith.constant 0 : index
    %c0_16 = arith.constant 0 : index
    %12 = vector.load %arg9[%c0_15, %c0_16] : memref<1x128xf32, #tpu.memory_space<vmem>>, vector<1x128xf32>
    %13 = vector.broadcast %12 : vector<1x128xf32> to vector<16x128xf32>
    %14 = arith.addf %11, %13 : vector<16x128xf32>
    %cst_17 = arith.constant 0.000000e+00 : f32
    %15 = vector.broadcast %cst_17 : f32 to vector<16x128xf32>
    %16 = arith.maximumf %14, %15 : vector<16x128xf32>
    %17 = math.absf %14 : vector<16x128xf32>
    %cst_18 = arith.constant 0.000000e+00 : f32
    %18 = vector.broadcast %cst_18 : f32 to vector<16x128xf32>
    %19 = arith.subf %18, %17 : vector<16x128xf32>
    %20 = math.exp %19 : vector<16x128xf32>
    %cst_19 = arith.constant 1.000000e+00 : f32
    %21 = vector.broadcast %cst_19 : f32 to vector<16x128xf32>
    %22 = arith.addf %21, %20 : vector<16x128xf32>
    %23 = math.log %22 : vector<16x128xf32>
    %24 = arith.addf %16, %23 : vector<16x128xf32>
    %25 = math.tanh %24 : vector<16x128xf32>
    %26 = arith.mulf %14, %25 : vector<16x128xf32>
    %c0_20 = arith.constant 0 : index
    %c0_21 = arith.constant 0 : index
    %27 = vector.load %arg10[%c0_20, %c0_21] : memref<128x32xf32, #tpu.memory_space<vmem>>, vector<128x32xf32>
    %cst_22 = arith.constant dense<0.000000e+00> : vector<16x32xf32>
    %28 = tpu.matmul %26, %27, %cst_22 {dimension_numbers = #tpu.dot_dimension_numbers<[1], [0], [0], [1], [0, 0, 1, 1], [], []>} : vector<16x128xf32>, vector<128x32xf32>, vector<16x32xf32> -> vector<16x32xf32>
    %c0_23 = arith.constant 0 : index
    %c0_24 = arith.constant 0 : index
    %29 = vector.load %arg11[%c0_23, %c0_24] : memref<1x32xf32, #tpu.memory_space<vmem>>, vector<1x32xf32>
    %30 = vector.broadcast %29 : vector<1x32xf32> to vector<16x32xf32>
    %31 = arith.addf %28, %30 : vector<16x32xf32>
    %c0_25 = arith.constant 0 : index
    %c0_26 = arith.constant 0 : index
    %32 = vector.load %arg4[%c0_25, %c0_26] : memref<16x16xf32, #tpu.memory_space<vmem>>, vector<16x16xf32>
    %c0_27 = arith.constant 0 : index
    %c0_28 = arith.constant 0 : index
    %33 = vector.load %arg5[%c0_27, %c0_28] : memref<16x16xf32, #tpu.memory_space<vmem>>, vector<16x16xf32>
    %c0_29 = arith.constant 0 : index
    %c0_30 = arith.constant 0 : index
    %c0_31 = arith.constant 0 : index
    %34 = vector.load %arg32[%c0_29, %c0_30, %c0_31] : memref<2x1x32xf32, #tpu.memory_space<vmem>>, vector<1x1x32xf32>
    %35 = vector.shape_cast %34 : vector<1x1x32xf32> to vector<1x32xf32>
    %c0_32 = arith.constant 0 : index
    %c0_33 = arith.constant 0 : index
    %c0_34 = arith.constant 0 : index
    %36 = vector.load %arg33[%c0_32, %c0_33, %c0_34] : memref<2x1x32xf32, #tpu.memory_space<vmem>>, vector<1x1x32xf32>
    %37 = vector.shape_cast %36 : vector<1x1x32xf32> to vector<1x32xf32>
    %cst_35 = arith.constant dense<0.000000e+00> : vector<16xf32>
    %38 = vector.multi_reduction <add>, %4, %cst_35 [1] : vector<16x32xf32> to vector<16xf32>
    %39 = vector.shape_cast %38 : vector<16xf32> to vector<16x1xf32>
    %cst_36 = arith.constant 3.200000e+01 : f32
    %40 = vector.broadcast %cst_36 : f32 to vector<16x1xf32>
    %41 = arith.divf %39, %40 : vector<16x1xf32>
    %42 = vector.broadcast %41 : vector<16x1xf32> to vector<16x32xf32>
    %43 = arith.subf %4, %42 : vector<16x32xf32>
    %44 = arith.mulf %43, %43 : vector<16x32xf32>
    %cst_37 = arith.constant dense<0.000000e+00> : vector<16xf32>
    %45 = vector.multi_reduction <add>, %44, %cst_37 [1] : vector<16x32xf32> to vector<16xf32>
    %46 = vector.shape_cast %45 : vector<16xf32> to vector<16x1xf32>
    %cst_38 = arith.constant 3.200000e+01 : f32
    %47 = vector.broadcast %cst_38 : f32 to vector<16x1xf32>
    %48 = arith.divf %46, %47 : vector<16x1xf32>
    %cst_39 = arith.constant 9.99999974E-6 : f32
    %49 = vector.broadcast %cst_39 : f32 to vector<16x1xf32>
    %50 = arith.addf %48, %49 : vector<16x1xf32>
    %51 = math.rsqrt %50 : vector<16x1xf32>
    %52 = vector.broadcast %51 : vector<16x1xf32> to vector<16x32xf32>
    %53 = arith.mulf %43, %52 : vector<16x32xf32>
    %54 = vector.broadcast %35 : vector<1x32xf32> to vector<16x32xf32>
    %55 = arith.mulf %53, %54 : vector<16x32xf32>
    %56 = vector.broadcast %37 : vector<1x32xf32> to vector<16x32xf32>
    %57 = arith.addf %55, %56 : vector<16x32xf32>
    %cst_40 = arith.constant 0.000000e+00 : f32
    %58 = vector.broadcast %cst_40 : f32 to vector<16x32xf32>
    %c0_41 = arith.constant 0 : index
    %c0_42 = arith.constant 0 : index
    %c0_43 = arith.constant 0 : index
    %59 = vector.load %arg12[%c0_41, %c0_42, %c0_43] : memref<8x32x8xf32, #tpu.memory_space<vmem>>, vector<1x32x8xf32>
    %60 = vector.shape_cast %59 : vector<1x32x8xf32> to vector<32x8xf32>
    %cst_44 = arith.constant dense<0.000000e+00> : vector<16x8xf32>
    %61 = tpu.matmul %57, %60, %cst_44 {dimension_numbers = #tpu.dot_dimension_numbers<[1], [0], [0], [1], [0, 0, 1, 1], [], []>} : vector<16x32xf32>, vector<32x8xf32>, vector<16x8xf32> -> vector<16x8xf32>
    %c0_45 = arith.constant 0 : index
    %c0_46 = arith.constant 0 : index
    %c0_47 = arith.constant 0 : index
    %62 = vector.load %arg13[%c0_45, %c0_46, %c0_47] : memref<8x1x8xf32, #tpu.memory_space<vmem>>, vector<1x1x8xf32>
    %63 = vector.shape_cast %62 : vector<1x1x8xf32> to vector<1x8xf32>
    %64 = vector.broadcast %63 : vector<1x8xf32> to vector<16x8xf32>
    %65 = arith.addf %61, %64 : vector<16x8xf32>
    %c0_48 = arith.constant 0 : index
    %c0_49 = arith.constant 0 : index
    %c0_50 = arith.constant 0 : index
    %66 = vector.load %arg14[%c0_48, %c0_49, %c0_50] : memref<8x32x8xf32, #tpu.memory_space<vmem>>, vector<1x32x8xf32>
    %67 = vector.shape_cast %66 : vector<1x32x8xf32> to vector<32x8xf32>
    %cst_51 = arith.constant dense<0.000000e+00> : vector<16x8xf32>
    %68 = tpu.matmul %57, %67, %cst_51 {dimension_numbers = #tpu.dot_dimension_numbers<[1], [0], [0], [1], [0, 0, 1, 1], [], []>} : vector<16x32xf32>, vector<32x8xf32>, vector<16x8xf32> -> vector<16x8xf32>
    %c0_52 = arith.constant 0 : index
    %c0_53 = arith.constant 0 : index
    %c0_54 = arith.constant 0 : index
    %69 = vector.load %arg15[%c0_52, %c0_53, %c0_54] : memref<8x1x8xf32, #tpu.memory_space<vmem>>, vector<1x1x8xf32>
    %70 = vector.shape_cast %69 : vector<1x1x8xf32> to vector<1x8xf32>
    %71 = vector.broadcast %70 : vector<1x8xf32> to vector<16x8xf32>
    %72 = arith.addf %68, %71 : vector<16x8xf32>
    %c0_55 = arith.constant 0 : index
    %c0_56 = arith.constant 0 : index
    %c0_57 = arith.constant 0 : index
    %73 = vector.load %arg16[%c0_55, %c0_56, %c0_57] : memref<8x32x8xf32, #tpu.memory_space<vmem>>, vector<1x32x8xf32>
    %74 = vector.shape_cast %73 : vector<1x32x8xf32> to vector<32x8xf32>
    %cst_58 = arith.constant dense<0.000000e+00> : vector<16x8xf32>
    %75 = tpu.matmul %57, %74, %cst_58 {dimension_numbers = #tpu.dot_dimension_numbers<[1], [0], [0], [1], [0, 0, 1, 1], [], []>} : vector<16x32xf32>, vector<32x8xf32>, vector<16x8xf32> -> vector<16x8xf32>
    %c0_59 = arith.constant 0 : index
    %c0_60 = arith.constant 0 : index
    %c0_61 = arith.constant 0 : index
    %76 = vector.load %arg17[%c0_59, %c0_60, %c0_61] : memref<8x1x8xf32, #tpu.memory_space<vmem>>, vector<1x1x8xf32>
    %77 = vector.shape_cast %76 : vector<1x1x8xf32> to vector<1x8xf32>
    %78 = vector.broadcast %77 : vector<1x8xf32> to vector<16x8xf32>
    %79 = arith.addf %75, %78 : vector<16x8xf32>
    %cst_62 = arith.constant dense<0.000000e+00> : vector<16x16xf32>
    %80 = tpu.matmul %65, %72, %cst_62 {dimension_numbers = #tpu.dot_dimension_numbers<[1], [1], [0], [0], [0, 0, 1, 0], [], []>} : vector<16x8xf32>, vector<16x8xf32>, vector<16x16xf32> -> vector<16x16xf32>
    %cst_63 = arith.constant 0.353553385 : f32
    %81 = vector.broadcast %cst_63 : f32 to vector<16x16xf32>
    %82 = arith.mulf %80, %81 : vector<16x16xf32>
    %83 = arith.addf %82, %32 : vector<16x16xf32>
    %cst_64 = arith.constant dense<0xFF800000> : vector<16xf32>
    %84 = vector.multi_reduction <maximumf>, %83, %cst_64 [1] : vector<16x16xf32> to vector<16xf32>
    %85 = vector.shape_cast %84 : vector<16xf32> to vector<16x1xf32>
    %86 = vector.broadcast %85 : vector<16x1xf32> to vector<16x16xf32>
    %87 = arith.subf %83, %86 : vector<16x16xf32>
    %88 = math.exp %87 : vector<16x16xf32>
    %cst_65 = arith.constant dense<0.000000e+00> : vector<16xf32>
    %89 = vector.multi_reduction <add>, %88, %cst_65 [1] : vector<16x16xf32> to vector<16xf32>
    %90 = vector.shape_cast %89 : vector<16xf32> to vector<16x1xf32>
    %91 = tpu.reciprocal %90 {approx = true} : vector<16x1xf32> -> vector<16x1xf32>
    %92 = vector.broadcast %91 : vector<16x1xf32> to vector<16x16xf32>
    %93 = arith.mulf %88, %92 : vector<16x16xf32>
    %cst_66 = arith.constant dense<0.000000e+00> : vector<16x8xf32>
    %94 = tpu.matmul %93, %79, %cst_66 {dimension_numbers = #tpu.dot_dimension_numbers<[1], [0], [0], [1], [0, 0, 1, 1], [], []>} : vector<16x16xf32>, vector<16x8xf32>, vector<16x8xf32> -> vector<16x8xf32>
    %c0_67 = arith.constant 0 : index
    %c0_68 = arith.constant 0 : index
    %c0_69 = arith.constant 0 : index
    %95 = vector.load %arg18[%c0_67, %c0_68, %c0_69] : memref<8x8x32xf32, #tpu.memory_space<vmem>>, vector<1x8x32xf32>
    %96 = vector.shape_cast %95 : vector<1x8x32xf32> to vector<8x32xf32>
    %cst_70 = arith.constant dense<0.000000e+00> : vector<16x32xf32>
    %97 = tpu.matmul %94, %96, %cst_70 {dimension_numbers = #tpu.dot_dimension_numbers<[1], [0], [0], [1], [0, 0, 1, 1], [], []>} : vector<16x8xf32>, vector<8x32xf32>, vector<16x32xf32> -> vector<16x32xf32>
    %98 = arith.addf %58, %97 : vector<16x32xf32>
    %c1 = arith.constant 1 : index
    %c0_71 = arith.constant 0 : index
    %c0_72 = arith.constant 0 : index
    %99 = vector.load %arg12[%c1, %c0_71, %c0_72] : memref<8x32x8xf32, #tpu.memory_space<vmem>>, vector<1x32x8xf32>
    %100 = vector.shape_cast %99 : vector<1x32x8xf32> to vector<32x8xf32>
    %cst_73 = arith.constant dense<0.000000e+00> : vector<16x8xf32>
    %101 = tpu.matmul %57, %100, %cst_73 {dimension_numbers = #tpu.dot_dimension_numbers<[1], [0], [0], [1], [0, 0, 1, 1], [], []>} : vector<16x32xf32>, vector<32x8xf32>, vector<16x8xf32> -> vector<16x8xf32>
    %c1_74 = arith.constant 1 : index
    %c0_75 = arith.constant 0 : index
    %c0_76 = arith.constant 0 : index
    %102 = vector.load %arg13[%c1_74, %c0_75, %c0_76] : memref<8x1x8xf32, #tpu.memory_space<vmem>>, vector<1x1x8xf32>
    %103 = vector.shape_cast %102 : vector<1x1x8xf32> to vector<1x8xf32>
    %104 = vector.broadcast %103 : vector<1x8xf32> to vector<16x8xf32>
    %105 = arith.addf %101, %104 : vector<16x8xf32>
    %c1_77 = arith.constant 1 : index
    %c0_78 = arith.constant 0 : index
    %c0_79 = arith.constant 0 : index
    %106 = vector.load %arg14[%c1_77, %c0_78, %c0_79] : memref<8x32x8xf32, #tpu.memory_space<vmem>>, vector<1x32x8xf32>
    %107 = vector.shape_cast %106 : vector<1x32x8xf32> to vector<32x8xf32>
    %cst_80 = arith.constant dense<0.000000e+00> : vector<16x8xf32>
    %108 = tpu.matmul %57, %107, %cst_80 {dimension_numbers = #tpu.dot_dimension_numbers<[1], [0], [0], [1], [0, 0, 1, 1], [], []>} : vector<16x32xf32>, vector<32x8xf32>, vector<16x8xf32> -> vector<16x8xf32>
    %c1_81 = arith.constant 1 : index
    %c0_82 = arith.constant 0 : index
    %c0_83 = arith.constant 0 : index
    %109 = vector.load %arg15[%c1_81, %c0_82, %c0_83] : memref<8x1x8xf32, #tpu.memory_space<vmem>>, vector<1x1x8xf32>
    %110 = vector.shape_cast %109 : vector<1x1x8xf32> to vector<1x8xf32>
    %111 = vector.broadcast %110 : vector<1x8xf32> to vector<16x8xf32>
    %112 = arith.addf %108, %111 : vector<16x8xf32>
    %c1_84 = arith.constant 1 : index
    %c0_85 = arith.constant 0 : index
    %c0_86 = arith.constant 0 : index
    %113 = vector.load %arg16[%c1_84, %c0_85, %c0_86] : memref<8x32x8xf32, #tpu.memory_space<vmem>>, vector<1x32x8xf32>
    %114 = vector.shape_cast %113 : vector<1x32x8xf32> to vector<32x8xf32>
    %cst_87 = arith.constant dense<0.000000e+00> : vector<16x8xf32>
    %115 = tpu.matmul %57, %114, %cst_87 {dimension_numbers = #tpu.dot_dimension_numbers<[1], [0], [0], [1], [0, 0, 1, 1], [], []>} : vector<16x32xf32>, vector<32x8xf32>, vector<16x8xf32> -> vector<16x8xf32>
    %c1_88 = arith.constant 1 : index
    %c0_89 = arith.constant 0 : index
    %c0_90 = arith.constant 0 : index
    %116 = vector.load %arg17[%c1_88, %c0_89, %c0_90] : memref<8x1x8xf32, #tpu.memory_space<vmem>>, vector<1x1x8xf32>
    %117 = vector.shape_cast %116 : vector<1x1x8xf32> to vector<1x8xf32>
    %118 = vector.broadcast %117 : vector<1x8xf32> to vector<16x8xf32>
    %119 = arith.addf %115, %118 : vector<16x8xf32>
    %cst_91 = arith.constant dense<0.000000e+00> : vector<16x16xf32>
    %120 = tpu.matmul %105, %112, %cst_91 {dimension_numbers = #tpu.dot_dimension_numbers<[1], [1], [0], [0], [0, 0, 1, 0], [], []>} : vector<16x8xf32>, vector<16x8xf32>, vector<16x16xf32> -> vector<16x16xf32>
    %cst_92 = arith.constant 0.353553385 : f32
    %121 = vector.broadcast %cst_92 : f32 to vector<16x16xf32>
    %122 = arith.mulf %120, %121 : vector<16x16xf32>
    %123 = arith.addf %122, %32 : vector<16x16xf32>
    %cst_93 = arith.constant dense<0xFF800000> : vector<16xf32>
    %124 = vector.multi_reduction <maximumf>, %123, %cst_93 [1] : vector<16x16xf32> to vector<16xf32>
    %125 = vector.shape_cast %124 : vector<16xf32> to vector<16x1xf32>
    %126 = vector.broadcast %125 : vector<16x1xf32> to vector<16x16xf32>
    %127 = arith.subf %123, %126 : vector<16x16xf32>
    %128 = math.exp %127 : vector<16x16xf32>
    %cst_94 = arith.constant dense<0.000000e+00> : vector<16xf32>
    %129 = vector.multi_reduction <add>, %128, %cst_94 [1] : vector<16x16xf32> to vector<16xf32>
    %130 = vector.shape_cast %129 : vector<16xf32> to vector<16x1xf32>
    %131 = tpu.reciprocal %130 {approx = true} : vector<16x1xf32> -> vector<16x1xf32>
    %132 = vector.broadcast %131 : vector<16x1xf32> to vector<16x16xf32>
    %133 = arith.mulf %128, %132 : vector<16x16xf32>
    %cst_95 = arith.constant dense<0.000000e+00> : vector<16x8xf32>
    %134 = tpu.matmul %133, %119, %cst_95 {dimension_numbers = #tpu.dot_dimension_numbers<[1], [0], [0], [1], [0, 0, 1, 1], [], []>} : vector<16x16xf32>, vector<16x8xf32>, vector<16x8xf32> -> vector<16x8xf32>
    %c1_96 = arith.constant 1 : index
    %c0_97 = arith.constant 0 : index
    %c0_98 = arith.constant 0 : index
    %135 = vector.load %arg18[%c1_96, %c0_97, %c0_98] : memref<8x8x32xf32, #tpu.memory_space<vmem>>, vector<1x8x32xf32>
    %136 = vector.shape_cast %135 : vector<1x8x32xf32> to vector<8x32xf32>
    %cst_99 = arith.constant dense<0.000000e+00> : vector<16x32xf32>
    %137 = tpu.matmul %134, %136, %cst_99 {dimension_numbers = #tpu.dot_dimension_numbers<[1], [0], [0], [1], [0, 0, 1, 1], [], []>} : vector<16x8xf32>, vector<8x32xf32>, vector<16x32xf32> -> vector<16x32xf32>
    %138 = arith.addf %98, %137 : vector<16x32xf32>
    %c2 = arith.constant 2 : index
    %c0_100 = arith.constant 0 : index
    %c0_101 = arith.constant 0 : index
    %139 = vector.load %arg12[%c2, %c0_100, %c0_101] : memref<8x32x8xf32, #tpu.memory_space<vmem>>, vector<1x32x8xf32>
    %140 = vector.shape_cast %139 : vector<1x32x8xf32> to vector<32x8xf32>
    %cst_102 = arith.constant dense<0.000000e+00> : vector<16x8xf32>
    %141 = tpu.matmul %57, %140, %cst_102 {dimension_numbers = #tpu.dot_dimension_numbers<[1], [0], [0], [1], [0, 0, 1, 1], [], []>} : vector<16x32xf32>, vector<32x8xf32>, vector<16x8xf32> -> vector<16x8xf32>
    %c2_103 = arith.constant 2 : index
    %c0_104 = arith.constant 0 : index
    %c0_105 = arith.constant 0 : index
    %142 = vector.load %arg13[%c2_103, %c0_104, %c0_105] : memref<8x1x8xf32, #tpu.memory_space<vmem>>, vector<1x1x8xf32>
    %143 = vector.shape_cast %142 : vector<1x1x8xf32> to vector<1x8xf32>
    %144 = vector.broadcast %143 : vector<1x8xf32> to vector<16x8xf32>
    %145 = arith.addf %141, %144 : vector<16x8xf32>
    %c2_106 = arith.constant 2 : index
    %c0_107 = arith.constant 0 : index
    %c0_108 = arith.constant 0 : index
    %146 = vector.load %arg14[%c2_106, %c0_107, %c0_108] : memref<8x32x8xf32, #tpu.memory_space<vmem>>, vector<1x32x8xf32>
    %147 = vector.shape_cast %146 : vector<1x32x8xf32> to vector<32x8xf32>
    %cst_109 = arith.constant dense<0.000000e+00> : vector<16x8xf32>
    %148 = tpu.matmul %57, %147, %cst_109 {dimension_numbers = #tpu.dot_dimension_numbers<[1], [0], [0], [1], [0, 0, 1, 1], [], []>} : vector<16x32xf32>, vector<32x8xf32>, vector<16x8xf32> -> vector<16x8xf32>
    %c2_110 = arith.constant 2 : index
    %c0_111 = arith.constant 0 : index
    %c0_112 = arith.constant 0 : index
    %149 = vector.load %arg15[%c2_110, %c0_111, %c0_112] : memref<8x1x8xf32, #tpu.memory_space<vmem>>, vector<1x1x8xf32>
    %150 = vector.shape_cast %149 : vector<1x1x8xf32> to vector<1x8xf32>
    %151 = vector.broadcast %150 : vector<1x8xf32> to vector<16x8xf32>
    %152 = arith.addf %148, %151 : vector<16x8xf32>
    %c2_113 = arith.constant 2 : index
    %c0_114 = arith.constant 0 : index
    %c0_115 = arith.constant 0 : index
    %153 = vector.load %arg16[%c2_113, %c0_114, %c0_115] : memref<8x32x8xf32, #tpu.memory_space<vmem>>, vector<1x32x8xf32>
    %154 = vector.shape_cast %153 : vector<1x32x8xf32> to vector<32x8xf32>
    %cst_116 = arith.constant dense<0.000000e+00> : vector<16x8xf32>
    %155 = tpu.matmul %57, %154, %cst_116 {dimension_numbers = #tpu.dot_dimension_numbers<[1], [0], [0], [1], [0, 0, 1, 1], [], []>} : vector<16x32xf32>, vector<32x8xf32>, vector<16x8xf32> -> vector<16x8xf32>
    %c2_117 = arith.constant 2 : index
    %c0_118 = arith.constant 0 : index
    %c0_119 = arith.constant 0 : index
    %156 = vector.load %arg17[%c2_117, %c0_118, %c0_119] : memref<8x1x8xf32, #tpu.memory_space<vmem>>, vector<1x1x8xf32>
    %157 = vector.shape_cast %156 : vector<1x1x8xf32> to vector<1x8xf32>
    %158 = vector.broadcast %157 : vector<1x8xf32> to vector<16x8xf32>
    %159 = arith.addf %155, %158 : vector<16x8xf32>
    %cst_120 = arith.constant dense<0.000000e+00> : vector<16x16xf32>
    %160 = tpu.matmul %145, %152, %cst_120 {dimension_numbers = #tpu.dot_dimension_numbers<[1], [1], [0], [0], [0, 0, 1, 0], [], []>} : vector<16x8xf32>, vector<16x8xf32>, vector<16x16xf32> -> vector<16x16xf32>
    %cst_121 = arith.constant 0.353553385 : f32
    %161 = vector.broadcast %cst_121 : f32 to vector<16x16xf32>
    %162 = arith.mulf %160, %161 : vector<16x16xf32>
    %163 = arith.addf %162, %32 : vector<16x16xf32>
    %cst_122 = arith.constant dense<0xFF800000> : vector<16xf32>
    %164 = vector.multi_reduction <maximumf>, %163, %cst_122 [1] : vector<16x16xf32> to vector<16xf32>
    %165 = vector.shape_cast %164 : vector<16xf32> to vector<16x1xf32>
    %166 = vector.broadcast %165 : vector<16x1xf32> to vector<16x16xf32>
    %167 = arith.subf %163, %166 : vector<16x16xf32>
    %168 = math.exp %167 : vector<16x16xf32>
    %cst_123 = arith.constant dense<0.000000e+00> : vector<16xf32>
    %169 = vector.multi_reduction <add>, %168, %cst_123 [1] : vector<16x16xf32> to vector<16xf32>
    %170 = vector.shape_cast %169 : vector<16xf32> to vector<16x1xf32>
    %171 = tpu.reciprocal %170 {approx = true} : vector<16x1xf32> -> vector<16x1xf32>
    %172 = vector.broadcast %171 : vector<16x1xf32> to vector<16x16xf32>
    %173 = arith.mulf %168, %172 : vector<16x16xf32>
    %cst_124 = arith.constant dense<0.000000e+00> : vector<16x8xf32>
    %174 = tpu.matmul %173, %159, %cst_124 {dimension_numbers = #tpu.dot_dimension_numbers<[1], [0], [0], [1], [0, 0, 1, 1], [], []>} : vector<16x16xf32>, vector<16x8xf32>, vector<16x8xf32> -> vector<16x8xf32>
    %c2_125 = arith.constant 2 : index
    %c0_126 = arith.constant 0 : index
    %c0_127 = arith.constant 0 : index
    %175 = vector.load %arg18[%c2_125, %c0_126, %c0_127] : memref<8x8x32xf32, #tpu.memory_space<vmem>>, vector<1x8x32xf32>
    %176 = vector.shape_cast %175 : vector<1x8x32xf32> to vector<8x32xf32>
    %cst_128 = arith.constant dense<0.000000e+00> : vector<16x32xf32>
    %177 = tpu.matmul %174, %176, %cst_128 {dimension_numbers = #tpu.dot_dimension_numbers<[1], [0], [0], [1], [0, 0, 1, 1], [], []>} : vector<16x8xf32>, vector<8x32xf32>, vector<16x32xf32> -> vector<16x32xf32>
    %178 = arith.addf %138, %177 : vector<16x32xf32>
    %c3 = arith.constant 3 : index
    %c0_129 = arith.constant 0 : index
    %c0_130 = arith.constant 0 : index
    %179 = vector.load %arg12[%c3, %c0_129, %c0_130] : memref<8x32x8xf32, #tpu.memory_space<vmem>>, vector<1x32x8xf32>
    %180 = vector.shape_cast %179 : vector<1x32x8xf32> to vector<32x8xf32>
    %cst_131 = arith.constant dense<0.000000e+00> : vector<16x8xf32>
    %181 = tpu.matmul %57, %180, %cst_131 {dimension_numbers = #tpu.dot_dimension_numbers<[1], [0], [0], [1], [0, 0, 1, 1], [], []>} : vector<16x32xf32>, vector<32x8xf32>, vector<16x8xf32> -> vector<16x8xf32>
    %c3_132 = arith.constant 3 : index
    %c0_133 = arith.constant 0 : index
    %c0_134 = arith.constant 0 : index
    %182 = vector.load %arg13[%c3_132, %c0_133, %c0_134] : memref<8x1x8xf32, #tpu.memory_space<vmem>>, vector<1x1x8xf32>
    %183 = vector.shape_cast %182 : vector<1x1x8xf32> to vector<1x8xf32>
    %184 = vector.broadcast %183 : vector<1x8xf32> to vector<16x8xf32>
    %185 = arith.addf %181, %184 : vector<16x8xf32>
    %c3_135 = arith.constant 3 : index
    %c0_136 = arith.constant 0 : index
    %c0_137 = arith.constant 0 : index
    %186 = vector.load %arg14[%c3_135, %c0_136, %c0_137] : memref<8x32x8xf32, #tpu.memory_space<vmem>>, vector<1x32x8xf32>
    %187 = vector.shape_cast %186 : vector<1x32x8xf32> to vector<32x8xf32>
    %cst_138 = arith.constant dense<0.000000e+00> : vector<16x8xf32>
    %188 = tpu.matmul %57, %187, %cst_138 {dimension_numbers = #tpu.dot_dimension_numbers<[1], [0], [0], [1], [0, 0, 1, 1], [], []>} : vector<16x32xf32>, vector<32x8xf32>, vector<16x8xf32> -> vector<16x8xf32>
    %c3_139 = arith.constant 3 : index
    %c0_140 = arith.constant 0 : index
    %c0_141 = arith.constant 0 : index
    %189 = vector.load %arg15[%c3_139, %c0_140, %c0_141] : memref<8x1x8xf32, #tpu.memory_space<vmem>>, vector<1x1x8xf32>
    %190 = vector.shape_cast %189 : vector<1x1x8xf32> to vector<1x8xf32>
    %191 = vector.broadcast %190 : vector<1x8xf32> to vector<16x8xf32>
    %192 = arith.addf %188, %191 : vector<16x8xf32>
    %c3_142 = arith.constant 3 : index
    %c0_143 = arith.constant 0 : index
    %c0_144 = arith.constant 0 : index
    %193 = vector.load %arg16[%c3_142, %c0_143, %c0_144] : memref<8x32x8xf32, #tpu.memory_space<vmem>>, vector<1x32x8xf32>
    %194 = vector.shape_cast %193 : vector<1x32x8xf32> to vector<32x8xf32>
    %cst_145 = arith.constant dense<0.000000e+00> : vector<16x8xf32>
    %195 = tpu.matmul %57, %194, %cst_145 {dimension_numbers = #tpu.dot_dimension_numbers<[1], [0], [0], [1], [0, 0, 1, 1], [], []>} : vector<16x32xf32>, vector<32x8xf32>, vector<16x8xf32> -> vector<16x8xf32>
    %c3_146 = arith.constant 3 : index
    %c0_147 = arith.constant 0 : index
    %c0_148 = arith.constant 0 : index
    %196 = vector.load %arg17[%c3_146, %c0_147, %c0_148] : memref<8x1x8xf32, #tpu.memory_space<vmem>>, vector<1x1x8xf32>
    %197 = vector.shape_cast %196 : vector<1x1x8xf32> to vector<1x8xf32>
    %198 = vector.broadcast %197 : vector<1x8xf32> to vector<16x8xf32>
    %199 = arith.addf %195, %198 : vector<16x8xf32>
    %cst_149 = arith.constant dense<0.000000e+00> : vector<16x16xf32>
    %200 = tpu.matmul %185, %192, %cst_149 {dimension_numbers = #tpu.dot_dimension_numbers<[1], [1], [0], [0], [0, 0, 1, 0], [], []>} : vector<16x8xf32>, vector<16x8xf32>, vector<16x16xf32> -> vector<16x16xf32>
    %cst_150 = arith.constant 0.353553385 : f32
    %201 = vector.broadcast %cst_150 : f32 to vector<16x16xf32>
    %202 = arith.mulf %200, %201 : vector<16x16xf32>
    %203 = arith.addf %202, %32 : vector<16x16xf32>
    %cst_151 = arith.constant dense<0xFF800000> : vector<16xf32>
    %204 = vector.multi_reduction <maximumf>, %203, %cst_151 [1] : vector<16x16xf32> to vector<16xf32>
    %205 = vector.shape_cast %204 : vector<16xf32> to vector<16x1xf32>
    %206 = vector.broadcast %205 : vector<16x1xf32> to vector<16x16xf32>
    %207 = arith.subf %203, %206 : vector<16x16xf32>
    %208 = math.exp %207 : vector<16x16xf32>
    %cst_152 = arith.constant dense<0.000000e+00> : vector<16xf32>
    %209 = vector.multi_reduction <add>, %208, %cst_152 [1] : vector<16x16xf32> to vector<16xf32>
    %210 = vector.shape_cast %209 : vector<16xf32> to vector<16x1xf32>
    %211 = tpu.reciprocal %210 {approx = true} : vector<16x1xf32> -> vector<16x1xf32>
    %212 = vector.broadcast %211 : vector<16x1xf32> to vector<16x16xf32>
    %213 = arith.mulf %208, %212 : vector<16x16xf32>
    %cst_153 = arith.constant dense<0.000000e+00> : vector<16x8xf32>
    %214 = tpu.matmul %213, %199, %cst_153 {dimension_numbers = #tpu.dot_dimension_numbers<[1], [0], [0], [1], [0, 0, 1, 1], [], []>} : vector<16x16xf32>, vector<16x8xf32>, vector<16x8xf32> -> vector<16x8xf32>
    %c3_154 = arith.constant 3 : index
    %c0_155 = arith.constant 0 : index
    %c0_156 = arith.constant 0 : index
    %215 = vector.load %arg18[%c3_154, %c0_155, %c0_156] : memref<8x8x32xf32, #tpu.memory_space<vmem>>, vector<1x8x32xf32>
    %216 = vector.shape_cast %215 : vector<1x8x32xf32> to vector<8x32xf32>
    %cst_157 = arith.constant dense<0.000000e+00> : vector<16x32xf32>
    %217 = tpu.matmul %214, %216, %cst_157 {dimension_numbers = #tpu.dot_dimension_numbers<[1], [0], [0], [1], [0, 0, 1, 1], [], []>} : vector<16x8xf32>, vector<8x32xf32>, vector<16x32xf32> -> vector<16x32xf32>
    %218 = arith.addf %178, %217 : vector<16x32xf32>
    %219 = arith.addf %4, %218 : vector<16x32xf32>
    %c0_158 = arith.constant 0 : index
    %c0_159 = arith.constant 0 : index
    %c0_160 = arith.constant 0 : index
    %220 = vector.load %arg19[%c0_158, %c0_159, %c0_160] : memref<2x1x32xf32, #tpu.memory_space<vmem>>, vector<1x1x32xf32>
    %221 = vector.shape_cast %220 : vector<1x1x32xf32> to vector<1x32xf32>
    %222 = vector.broadcast %221 : vector<1x32xf32> to vector<16x32xf32>
    %223 = arith.addf %219, %222 : vector<16x32xf32>
    %c0_161 = arith.constant 0 : index
    %c0_162 = arith.constant 0 : index
    %c0_163 = arith.constant 0 : index
    %224 = vector.load %arg34[%c0_161, %c0_162, %c0_163] : memref<2x1x32xf32, #tpu.memory_space<vmem>>, vector<1x1x32xf32>
    %225 = vector.shape_cast %224 : vector<1x1x32xf32> to vector<1x32xf32>
    %c0_164 = arith.constant 0 : index
    %c0_165 = arith.constant 0 : index
    %c0_166 = arith.constant 0 : index
    %226 = vector.load %arg35[%c0_164, %c0_165, %c0_166] : memref<2x1x32xf32, #tpu.memory_space<vmem>>, vector<1x1x32xf32>
    %227 = vector.shape_cast %226 : vector<1x1x32xf32> to vector<1x32xf32>
    %cst_167 = arith.constant dense<0.000000e+00> : vector<16xf32>
    %228 = vector.multi_reduction <add>, %223, %cst_167 [1] : vector<16x32xf32> to vector<16xf32>
    %229 = vector.shape_cast %228 : vector<16xf32> to vector<16x1xf32>
    %cst_168 = arith.constant 3.200000e+01 : f32
    %230 = vector.broadcast %cst_168 : f32 to vector<16x1xf32>
    %231 = arith.divf %229, %230 : vector<16x1xf32>
    %232 = vector.broadcast %231 : vector<16x1xf32> to vector<16x32xf32>
    %233 = arith.subf %223, %232 : vector<16x32xf32>
    %234 = arith.mulf %233, %233 : vector<16x32xf32>
    %cst_169 = arith.constant dense<0.000000e+00> : vector<16xf32>
    %235 = vector.multi_reduction <add>, %234, %cst_169 [1] : vector<16x32xf32> to vector<16xf32>
    %236 = vector.shape_cast %235 : vector<16xf32> to vector<16x1xf32>
    %cst_170 = arith.constant 3.200000e+01 : f32
    %237 = vector.broadcast %cst_170 : f32 to vector<16x1xf32>
    %238 = arith.divf %236, %237 : vector<16x1xf32>
    %cst_171 = arith.constant 9.99999974E-6 : f32
    %239 = vector.broadcast %cst_171 : f32 to vector<16x1xf32>
    %240 = arith.addf %238, %239 : vector<16x1xf32>
    %241 = math.rsqrt %240 : vector<16x1xf32>
    %242 = vector.broadcast %241 : vector<16x1xf32> to vector<16x32xf32>
    %243 = arith.mulf %233, %242 : vector<16x32xf32>
    %244 = vector.broadcast %225 : vector<1x32xf32> to vector<16x32xf32>
    %245 = arith.mulf %243, %244 : vector<16x32xf32>
    %246 = vector.broadcast %227 : vector<1x32xf32> to vector<16x32xf32>
    %247 = arith.addf %245, %246 : vector<16x32xf32>
    %cst_172 = arith.constant 0.000000e+00 : f32
    %248 = vector.broadcast %cst_172 : f32 to vector<16x32xf32>
    %c0_173 = arith.constant 0 : index
    %c0_174 = arith.constant 0 : index
    %c0_175 = arith.constant 0 : index
    %249 = vector.load %arg20[%c0_173, %c0_174, %c0_175] : memref<8x32x8xf32, #tpu.memory_space<vmem>>, vector<1x32x8xf32>
    %250 = vector.shape_cast %249 : vector<1x32x8xf32> to vector<32x8xf32>
    %cst_176 = arith.constant dense<0.000000e+00> : vector<16x8xf32>
    %251 = tpu.matmul %247, %250, %cst_176 {dimension_numbers = #tpu.dot_dimension_numbers<[1], [0], [0], [1], [0, 0, 1, 1], [], []>} : vector<16x32xf32>, vector<32x8xf32>, vector<16x8xf32> -> vector<16x8xf32>
    %c0_177 = arith.constant 0 : index
    %c0_178 = arith.constant 0 : index
    %c0_179 = arith.constant 0 : index
    %252 = vector.load %arg21[%c0_177, %c0_178, %c0_179] : memref<8x1x8xf32, #tpu.memory_space<vmem>>, vector<1x1x8xf32>
    %253 = vector.shape_cast %252 : vector<1x1x8xf32> to vector<1x8xf32>
    %254 = vector.broadcast %253 : vector<1x8xf32> to vector<16x8xf32>
    %255 = arith.addf %251, %254 : vector<16x8xf32>
    %c0_180 = arith.constant 0 : index
    %c0_181 = arith.constant 0 : index
    %c0_182 = arith.constant 0 : index
    %256 = vector.load %arg22[%c0_180, %c0_181, %c0_182] : memref<8x32x8xf32, #tpu.memory_space<vmem>>, vector<1x32x8xf32>
    %257 = vector.shape_cast %256 : vector<1x32x8xf32> to vector<32x8xf32>
    %cst_183 = arith.constant dense<0.000000e+00> : vector<16x8xf32>
    %258 = tpu.matmul %31, %257, %cst_183 {dimension_numbers = #tpu.dot_dimension_numbers<[1], [0], [0], [1], [0, 0, 1, 1], [], []>} : vector<16x32xf32>, vector<32x8xf32>, vector<16x8xf32> -> vector<16x8xf32>
    %c0_184 = arith.constant 0 : index
    %c0_185 = arith.constant 0 : index
    %c0_186 = arith.constant 0 : index
    %259 = vector.load %arg23[%c0_184, %c0_185, %c0_186] : memref<8x1x8xf32, #tpu.memory_space<vmem>>, vector<1x1x8xf32>
    %260 = vector.shape_cast %259 : vector<1x1x8xf32> to vector<1x8xf32>
    %261 = vector.broadcast %260 : vector<1x8xf32> to vector<16x8xf32>
    %262 = arith.addf %258, %261 : vector<16x8xf32>
    %c0_187 = arith.constant 0 : index
    %c0_188 = arith.constant 0 : index
    %c0_189 = arith.constant 0 : index
    %263 = vector.load %arg24[%c0_187, %c0_188, %c0_189] : memref<8x32x8xf32, #tpu.memory_space<vmem>>, vector<1x32x8xf32>
    %264 = vector.shape_cast %263 : vector<1x32x8xf32> to vector<32x8xf32>
    %cst_190 = arith.constant dense<0.000000e+00> : vector<16x8xf32>
    %265 = tpu.matmul %31, %264, %cst_190 {dimension_numbers = #tpu.dot_dimension_numbers<[1], [0], [0], [1], [0, 0, 1, 1], [], []>} : vector<16x32xf32>, vector<32x8xf32>, vector<16x8xf32> -> vector<16x8xf32>
    %c0_191 = arith.constant 0 : index
    %c0_192 = arith.constant 0 : index
    %c0_193 = arith.constant 0 : index
    %266 = vector.load %arg25[%c0_191, %c0_192, %c0_193] : memref<8x1x8xf32, #tpu.memory_space<vmem>>, vector<1x1x8xf32>
    %267 = vector.shape_cast %266 : vector<1x1x8xf32> to vector<1x8xf32>
    %268 = vector.broadcast %267 : vector<1x8xf32> to vector<16x8xf32>
    %269 = arith.addf %265, %268 : vector<16x8xf32>
    %cst_194 = arith.constant dense<0.000000e+00> : vector<16x16xf32>
    %270 = tpu.matmul %255, %262, %cst_194 {dimension_numbers = #tpu.dot_dimension_numbers<[1], [1], [0], [0], [0, 0, 1, 0], [], []>} : vector<16x8xf32>, vector<16x8xf32>, vector<16x16xf32> -> vector<16x16xf32>
    %cst_195 = arith.constant 0.353553385 : f32
    %271 = vector.broadcast %cst_195 : f32 to vector<16x16xf32>
    %272 = arith.mulf %270, %271 : vector<16x16xf32>
    %273 = arith.addf %272, %33 : vector<16x16xf32>
    %cst_196 = arith.constant dense<0xFF800000> : vector<16xf32>
    %274 = vector.multi_reduction <maximumf>, %273, %cst_196 [1] : vector<16x16xf32> to vector<16xf32>
    %275 = vector.shape_cast %274 : vector<16xf32> to vector<16x1xf32>
    %276 = vector.broadcast %275 : vector<16x1xf32> to vector<16x16xf32>
    %277 = arith.subf %273, %276 : vector<16x16xf32>
    %278 = math.exp %277 : vector<16x16xf32>
    %cst_197 = arith.constant dense<0.000000e+00> : vector<16xf32>
    %279 = vector.multi_reduction <add>, %278, %cst_197 [1] : vector<16x16xf32> to vector<16xf32>
    %280 = vector.shape_cast %279 : vector<16xf32> to vector<16x1xf32>
    %281 = tpu.reciprocal %280 {approx = true} : vector<16x1xf32> -> vector<16x1xf32>
    %282 = vector.broadcast %281 : vector<16x1xf32> to vector<16x16xf32>
    %283 = arith.mulf %278, %282 : vector<16x16xf32>
    %cst_198 = arith.constant dense<0.000000e+00> : vector<16x8xf32>
    %284 = tpu.matmul %283, %269, %cst_198 {dimension_numbers = #tpu.dot_dimension_numbers<[1], [0], [0], [1], [0, 0, 1, 1], [], []>} : vector<16x16xf32>, vector<16x8xf32>, vector<16x8xf32> -> vector<16x8xf32>
    %c0_199 = arith.constant 0 : index
    %c0_200 = arith.constant 0 : index
    %c0_201 = arith.constant 0 : index
    %285 = vector.load %arg26[%c0_199, %c0_200, %c0_201] : memref<8x8x32xf32, #tpu.memory_space<vmem>>, vector<1x8x32xf32>
    %286 = vector.shape_cast %285 : vector<1x8x32xf32> to vector<8x32xf32>
    %cst_202 = arith.constant dense<0.000000e+00> : vector<16x32xf32>
    %287 = tpu.matmul %284, %286, %cst_202 {dimension_numbers = #tpu.dot_dimension_numbers<[1], [0], [0], [1], [0, 0, 1, 1], [], []>} : vector<16x8xf32>, vector<8x32xf32>, vector<16x32xf32> -> vector<16x32xf32>
    %288 = arith.addf %248, %287 : vector<16x32xf32>
    %c1_203 = arith.constant 1 : index
    %c0_204 = arith.constant 0 : index
    %c0_205 = arith.constant 0 : index
    %289 = vector.load %arg20[%c1_203, %c0_204, %c0_205] : memref<8x32x8xf32, #tpu.memory_space<vmem>>, vector<1x32x8xf32>
    %290 = vector.shape_cast %289 : vector<1x32x8xf32> to vector<32x8xf32>
    %cst_206 = arith.constant dense<0.000000e+00> : vector<16x8xf32>
    %291 = tpu.matmul %247, %290, %cst_206 {dimension_numbers = #tpu.dot_dimension_numbers<[1], [0], [0], [1], [0, 0, 1, 1], [], []>} : vector<16x32xf32>, vector<32x8xf32>, vector<16x8xf32> -> vector<16x8xf32>
    %c1_207 = arith.constant 1 : index
    %c0_208 = arith.constant 0 : index
    %c0_209 = arith.constant 0 : index
    %292 = vector.load %arg21[%c1_207, %c0_208, %c0_209] : memref<8x1x8xf32, #tpu.memory_space<vmem>>, vector<1x1x8xf32>
    %293 = vector.shape_cast %292 : vector<1x1x8xf32> to vector<1x8xf32>
    %294 = vector.broadcast %293 : vector<1x8xf32> to vector<16x8xf32>
    %295 = arith.addf %291, %294 : vector<16x8xf32>
    %c1_210 = arith.constant 1 : index
    %c0_211 = arith.constant 0 : index
    %c0_212 = arith.constant 0 : index
    %296 = vector.load %arg22[%c1_210, %c0_211, %c0_212] : memref<8x32x8xf32, #tpu.memory_space<vmem>>, vector<1x32x8xf32>
    %297 = vector.shape_cast %296 : vector<1x32x8xf32> to vector<32x8xf32>
    %cst_213 = arith.constant dense<0.000000e+00> : vector<16x8xf32>
    %298 = tpu.matmul %31, %297, %cst_213 {dimension_numbers = #tpu.dot_dimension_numbers<[1], [0], [0], [1], [0, 0, 1, 1], [], []>} : vector<16x32xf32>, vector<32x8xf32>, vector<16x8xf32> -> vector<16x8xf32>
    %c1_214 = arith.constant 1 : index
    %c0_215 = arith.constant 0 : index
    %c0_216 = arith.constant 0 : index
    %299 = vector.load %arg23[%c1_214, %c0_215, %c0_216] : memref<8x1x8xf32, #tpu.memory_space<vmem>>, vector<1x1x8xf32>
    %300 = vector.shape_cast %299 : vector<1x1x8xf32> to vector<1x8xf32>
    %301 = vector.broadcast %300 : vector<1x8xf32> to vector<16x8xf32>
    %302 = arith.addf %298, %301 : vector<16x8xf32>
    %c1_217 = arith.constant 1 : index
    %c0_218 = arith.constant 0 : index
    %c0_219 = arith.constant 0 : index
    %303 = vector.load %arg24[%c1_217, %c0_218, %c0_219] : memref<8x32x8xf32, #tpu.memory_space<vmem>>, vector<1x32x8xf32>
    %304 = vector.shape_cast %303 : vector<1x32x8xf32> to vector<32x8xf32>
    %cst_220 = arith.constant dense<0.000000e+00> : vector<16x8xf32>
    %305 = tpu.matmul %31, %304, %cst_220 {dimension_numbers = #tpu.dot_dimension_numbers<[1], [0], [0], [1], [0, 0, 1, 1], [], []>} : vector<16x32xf32>, vector<32x8xf32>, vector<16x8xf32> -> vector<16x8xf32>
    %c1_221 = arith.constant 1 : index
    %c0_222 = arith.constant 0 : index
    %c0_223 = arith.constant 0 : index
    %306 = vector.load %arg25[%c1_221, %c0_222, %c0_223] : memref<8x1x8xf32, #tpu.memory_space<vmem>>, vector<1x1x8xf32>
    %307 = vector.shape_cast %306 : vector<1x1x8xf32> to vector<1x8xf32>
    %308 = vector.broadcast %307 : vector<1x8xf32> to vector<16x8xf32>
    %309 = arith.addf %305, %308 : vector<16x8xf32>
    %cst_224 = arith.constant dense<0.000000e+00> : vector<16x16xf32>
    %310 = tpu.matmul %295, %302, %cst_224 {dimension_numbers = #tpu.dot_dimension_numbers<[1], [1], [0], [0], [0, 0, 1, 0], [], []>} : vector<16x8xf32>, vector<16x8xf32>, vector<16x16xf32> -> vector<16x16xf32>
    %cst_225 = arith.constant 0.353553385 : f32
    %311 = vector.broadcast %cst_225 : f32 to vector<16x16xf32>
    %312 = arith.mulf %310, %311 : vector<16x16xf32>
    %313 = arith.addf %312, %33 : vector<16x16xf32>
    %cst_226 = arith.constant dense<0xFF800000> : vector<16xf32>
    %314 = vector.multi_reduction <maximumf>, %313, %cst_226 [1] : vector<16x16xf32> to vector<16xf32>
    %315 = vector.shape_cast %314 : vector<16xf32> to vector<16x1xf32>
    %316 = vector.broadcast %315 : vector<16x1xf32> to vector<16x16xf32>
    %317 = arith.subf %313, %316 : vector<16x16xf32>
    %318 = math.exp %317 : vector<16x16xf32>
    %cst_227 = arith.constant dense<0.000000e+00> : vector<16xf32>
    %319 = vector.multi_reduction <add>, %318, %cst_227 [1] : vector<16x16xf32> to vector<16xf32>
    %320 = vector.shape_cast %319 : vector<16xf32> to vector<16x1xf32>
    %321 = tpu.reciprocal %320 {approx = true} : vector<16x1xf32> -> vector<16x1xf32>
    %322 = vector.broadcast %321 : vector<16x1xf32> to vector<16x16xf32>
    %323 = arith.mulf %318, %322 : vector<16x16xf32>
    %cst_228 = arith.constant dense<0.000000e+00> : vector<16x8xf32>
    %324 = tpu.matmul %323, %309, %cst_228 {dimension_numbers = #tpu.dot_dimension_numbers<[1], [0], [0], [1], [0, 0, 1, 1], [], []>} : vector<16x16xf32>, vector<16x8xf32>, vector<16x8xf32> -> vector<16x8xf32>
    %c1_229 = arith.constant 1 : index
    %c0_230 = arith.constant 0 : index
    %c0_231 = arith.constant 0 : index
    %325 = vector.load %arg26[%c1_229, %c0_230, %c0_231] : memref<8x8x32xf32, #tpu.memory_space<vmem>>, vector<1x8x32xf32>
    %326 = vector.shape_cast %325 : vector<1x8x32xf32> to vector<8x32xf32>
    %cst_232 = arith.constant dense<0.000000e+00> : vector<16x32xf32>
    %327 = tpu.matmul %324, %326, %cst_232 {dimension_numbers = #tpu.dot_dimension_numbers<[1], [0], [0], [1], [0, 0, 1, 1], [], []>} : vector<16x8xf32>, vector<8x32xf32>, vector<16x32xf32> -> vector<16x32xf32>
    %328 = arith.addf %288, %327 : vector<16x32xf32>
    %c2_233 = arith.constant 2 : index
    %c0_234 = arith.constant 0 : index
    %c0_235 = arith.constant 0 : index
    %329 = vector.load %arg20[%c2_233, %c0_234, %c0_235] : memref<8x32x8xf32, #tpu.memory_space<vmem>>, vector<1x32x8xf32>
    %330 = vector.shape_cast %329 : vector<1x32x8xf32> to vector<32x8xf32>
    %cst_236 = arith.constant dense<0.000000e+00> : vector<16x8xf32>
    %331 = tpu.matmul %247, %330, %cst_236 {dimension_numbers = #tpu.dot_dimension_numbers<[1], [0], [0], [1], [0, 0, 1, 1], [], []>} : vector<16x32xf32>, vector<32x8xf32>, vector<16x8xf32> -> vector<16x8xf32>
    %c2_237 = arith.constant 2 : index
    %c0_238 = arith.constant 0 : index
    %c0_239 = arith.constant 0 : index
    %332 = vector.load %arg21[%c2_237, %c0_238, %c0_239] : memref<8x1x8xf32, #tpu.memory_space<vmem>>, vector<1x1x8xf32>
    %333 = vector.shape_cast %332 : vector<1x1x8xf32> to vector<1x8xf32>
    %334 = vector.broadcast %333 : vector<1x8xf32> to vector<16x8xf32>
    %335 = arith.addf %331, %334 : vector<16x8xf32>
    %c2_240 = arith.constant 2 : index
    %c0_241 = arith.constant 0 : index
    %c0_242 = arith.constant 0 : index
    %336 = vector.load %arg22[%c2_240, %c0_241, %c0_242] : memref<8x32x8xf32, #tpu.memory_space<vmem>>, vector<1x32x8xf32>
    %337 = vector.shape_cast %336 : vector<1x32x8xf32> to vector<32x8xf32>
    %cst_243 = arith.constant dense<0.000000e+00> : vector<16x8xf32>
    %338 = tpu.matmul %31, %337, %cst_243 {dimension_numbers = #tpu.dot_dimension_numbers<[1], [0], [0], [1], [0, 0, 1, 1], [], []>} : vector<16x32xf32>, vector<32x8xf32>, vector<16x8xf32> -> vector<16x8xf32>
    %c2_244 = arith.constant 2 : index
    %c0_245 = arith.constant 0 : index
    %c0_246 = arith.constant 0 : index
    %339 = vector.load %arg23[%c2_244, %c0_245, %c0_246] : memref<8x1x8xf32, #tpu.memory_space<vmem>>, vector<1x1x8xf32>
    %340 = vector.shape_cast %339 : vector<1x1x8xf32> to vector<1x8xf32>
    %341 = vector.broadcast %340 : vector<1x8xf32> to vector<16x8xf32>
    %342 = arith.addf %338, %341 : vector<16x8xf32>
    %c2_247 = arith.constant 2 : index
    %c0_248 = arith.constant 0 : index
    %c0_249 = arith.constant 0 : index
    %343 = vector.load %arg24[%c2_247, %c0_248, %c0_249] : memref<8x32x8xf32, #tpu.memory_space<vmem>>, vector<1x32x8xf32>
    %344 = vector.shape_cast %343 : vector<1x32x8xf32> to vector<32x8xf32>
    %cst_250 = arith.constant dense<0.000000e+00> : vector<16x8xf32>
    %345 = tpu.matmul %31, %344, %cst_250 {dimension_numbers = #tpu.dot_dimension_numbers<[1], [0], [0], [1], [0, 0, 1, 1], [], []>} : vector<16x32xf32>, vector<32x8xf32>, vector<16x8xf32> -> vector<16x8xf32>
    %c2_251 = arith.constant 2 : index
    %c0_252 = arith.constant 0 : index
    %c0_253 = arith.constant 0 : index
    %346 = vector.load %arg25[%c2_251, %c0_252, %c0_253] : memref<8x1x8xf32, #tpu.memory_space<vmem>>, vector<1x1x8xf32>
    %347 = vector.shape_cast %346 : vector<1x1x8xf32> to vector<1x8xf32>
    %348 = vector.broadcast %347 : vector<1x8xf32> to vector<16x8xf32>
    %349 = arith.addf %345, %348 : vector<16x8xf32>
    %cst_254 = arith.constant dense<0.000000e+00> : vector<16x16xf32>
    %350 = tpu.matmul %335, %342, %cst_254 {dimension_numbers = #tpu.dot_dimension_numbers<[1], [1], [0], [0], [0, 0, 1, 0], [], []>} : vector<16x8xf32>, vector<16x8xf32>, vector<16x16xf32> -> vector<16x16xf32>
    %cst_255 = arith.constant 0.353553385 : f32
    %351 = vector.broadcast %cst_255 : f32 to vector<16x16xf32>
    %352 = arith.mulf %350, %351 : vector<16x16xf32>
    %353 = arith.addf %352, %33 : vector<16x16xf32>
    %cst_256 = arith.constant dense<0xFF800000> : vector<16xf32>
    %354 = vector.multi_reduction <maximumf>, %353, %cst_256 [1] : vector<16x16xf32> to vector<16xf32>
    %355 = vector.shape_cast %354 : vector<16xf32> to vector<16x1xf32>
    %356 = vector.broadcast %355 : vector<16x1xf32> to vector<16x16xf32>
    %357 = arith.subf %353, %356 : vector<16x16xf32>
    %358 = math.exp %357 : vector<16x16xf32>
    %cst_257 = arith.constant dense<0.000000e+00> : vector<16xf32>
    %359 = vector.multi_reduction <add>, %358, %cst_257 [1] : vector<16x16xf32> to vector<16xf32>
    %360 = vector.shape_cast %359 : vector<16xf32> to vector<16x1xf32>
    %361 = tpu.reciprocal %360 {approx = true} : vector<16x1xf32> -> vector<16x1xf32>
    %362 = vector.broadcast %361 : vector<16x1xf32> to vector<16x16xf32>
    %363 = arith.mulf %358, %362 : vector<16x16xf32>
    %cst_258 = arith.constant dense<0.000000e+00> : vector<16x8xf32>
    %364 = tpu.matmul %363, %349, %cst_258 {dimension_numbers = #tpu.dot_dimension_numbers<[1], [0], [0], [1], [0, 0, 1, 1], [], []>} : vector<16x16xf32>, vector<16x8xf32>, vector<16x8xf32> -> vector<16x8xf32>
    %c2_259 = arith.constant 2 : index
    %c0_260 = arith.constant 0 : index
    %c0_261 = arith.constant 0 : index
    %365 = vector.load %arg26[%c2_259, %c0_260, %c0_261] : memref<8x8x32xf32, #tpu.memory_space<vmem>>, vector<1x8x32xf32>
    %366 = vector.shape_cast %365 : vector<1x8x32xf32> to vector<8x32xf32>
    %cst_262 = arith.constant dense<0.000000e+00> : vector<16x32xf32>
    %367 = tpu.matmul %364, %366, %cst_262 {dimension_numbers = #tpu.dot_dimension_numbers<[1], [0], [0], [1], [0, 0, 1, 1], [], []>} : vector<16x8xf32>, vector<8x32xf32>, vector<16x32xf32> -> vector<16x32xf32>
    %368 = arith.addf %328, %367 : vector<16x32xf32>
    %c3_263 = arith.constant 3 : index
    %c0_264 = arith.constant 0 : index
    %c0_265 = arith.constant 0 : index
    %369 = vector.load %arg20[%c3_263, %c0_264, %c0_265] : memref<8x32x8xf32, #tpu.memory_space<vmem>>, vector<1x32x8xf32>
    %370 = vector.shape_cast %369 : vector<1x32x8xf32> to vector<32x8xf32>
    %cst_266 = arith.constant dense<0.000000e+00> : vector<16x8xf32>
    %371 = tpu.matmul %247, %370, %cst_266 {dimension_numbers = #tpu.dot_dimension_numbers<[1], [0], [0], [1], [0, 0, 1, 1], [], []>} : vector<16x32xf32>, vector<32x8xf32>, vector<16x8xf32> -> vector<16x8xf32>
    %c3_267 = arith.constant 3 : index
    %c0_268 = arith.constant 0 : index
    %c0_269 = arith.constant 0 : index
    %372 = vector.load %arg21[%c3_267, %c0_268, %c0_269] : memref<8x1x8xf32, #tpu.memory_space<vmem>>, vector<1x1x8xf32>
    %373 = vector.shape_cast %372 : vector<1x1x8xf32> to vector<1x8xf32>
    %374 = vector.broadcast %373 : vector<1x8xf32> to vector<16x8xf32>
    %375 = arith.addf %371, %374 : vector<16x8xf32>
    %c3_270 = arith.constant 3 : index
    %c0_271 = arith.constant 0 : index
    %c0_272 = arith.constant 0 : index
    %376 = vector.load %arg22[%c3_270, %c0_271, %c0_272] : memref<8x32x8xf32, #tpu.memory_space<vmem>>, vector<1x32x8xf32>
    %377 = vector.shape_cast %376 : vector<1x32x8xf32> to vector<32x8xf32>
    %cst_273 = arith.constant dense<0.000000e+00> : vector<16x8xf32>
    %378 = tpu.matmul %31, %377, %cst_273 {dimension_numbers = #tpu.dot_dimension_numbers<[1], [0], [0], [1], [0, 0, 1, 1], [], []>} : vector<16x32xf32>, vector<32x8xf32>, vector<16x8xf32> -> vector<16x8xf32>
    %c3_274 = arith.constant 3 : index
    %c0_275 = arith.constant 0 : index
    %c0_276 = arith.constant 0 : index
    %379 = vector.load %arg23[%c3_274, %c0_275, %c0_276] : memref<8x1x8xf32, #tpu.memory_space<vmem>>, vector<1x1x8xf32>
    %380 = vector.shape_cast %379 : vector<1x1x8xf32> to vector<1x8xf32>
    %381 = vector.broadcast %380 : vector<1x8xf32> to vector<16x8xf32>
    %382 = arith.addf %378, %381 : vector<16x8xf32>
    %c3_277 = arith.constant 3 : index
    %c0_278 = arith.constant 0 : index
    %c0_279 = arith.constant 0 : index
    %383 = vector.load %arg24[%c3_277, %c0_278, %c0_279] : memref<8x32x8xf32, #tpu.memory_space<vmem>>, vector<1x32x8xf32>
    %384 = vector.shape_cast %383 : vector<1x32x8xf32> to vector<32x8xf32>
    %cst_280 = arith.constant dense<0.000000e+00> : vector<16x8xf32>
    %385 = tpu.matmul %31, %384, %cst_280 {dimension_numbers = #tpu.dot_dimension_numbers<[1], [0], [0], [1], [0, 0, 1, 1], [], []>} : vector<16x32xf32>, vector<32x8xf32>, vector<16x8xf32> -> vector<16x8xf32>
    %c3_281 = arith.constant 3 : index
    %c0_282 = arith.constant 0 : index
    %c0_283 = arith.constant 0 : index
    %386 = vector.load %arg25[%c3_281, %c0_282, %c0_283] : memref<8x1x8xf32, #tpu.memory_space<vmem>>, vector<1x1x8xf32>
    %387 = vector.shape_cast %386 : vector<1x1x8xf32> to vector<1x8xf32>
    %388 = vector.broadcast %387 : vector<1x8xf32> to vector<16x8xf32>
    %389 = arith.addf %385, %388 : vector<16x8xf32>
    %cst_284 = arith.constant dense<0.000000e+00> : vector<16x16xf32>
    %390 = tpu.matmul %375, %382, %cst_284 {dimension_numbers = #tpu.dot_dimension_numbers<[1], [1], [0], [0], [0, 0, 1, 0], [], []>} : vector<16x8xf32>, vector<16x8xf32>, vector<16x16xf32> -> vector<16x16xf32>
    %cst_285 = arith.constant 0.353553385 : f32
    %391 = vector.broadcast %cst_285 : f32 to vector<16x16xf32>
    %392 = arith.mulf %390, %391 : vector<16x16xf32>
    %393 = arith.addf %392, %33 : vector<16x16xf32>
    %cst_286 = arith.constant dense<0xFF800000> : vector<16xf32>
    %394 = vector.multi_reduction <maximumf>, %393, %cst_286 [1] : vector<16x16xf32> to vector<16xf32>
    %395 = vector.shape_cast %394 : vector<16xf32> to vector<16x1xf32>
    %396 = vector.broadcast %395 : vector<16x1xf32> to vector<16x16xf32>
    %397 = arith.subf %393, %396 : vector<16x16xf32>
    %398 = math.exp %397 : vector<16x16xf32>
    %cst_287 = arith.constant dense<0.000000e+00> : vector<16xf32>
    %399 = vector.multi_reduction <add>, %398, %cst_287 [1] : vector<16x16xf32> to vector<16xf32>
    %400 = vector.shape_cast %399 : vector<16xf32> to vector<16x1xf32>
    %401 = tpu.reciprocal %400 {approx = true} : vector<16x1xf32> -> vector<16x1xf32>
    %402 = vector.broadcast %401 : vector<16x1xf32> to vector<16x16xf32>
    %403 = arith.mulf %398, %402 : vector<16x16xf32>
    %cst_288 = arith.constant dense<0.000000e+00> : vector<16x8xf32>
    %404 = tpu.matmul %403, %389, %cst_288 {dimension_numbers = #tpu.dot_dimension_numbers<[1], [0], [0], [1], [0, 0, 1, 1], [], []>} : vector<16x16xf32>, vector<16x8xf32>, vector<16x8xf32> -> vector<16x8xf32>
    %c3_289 = arith.constant 3 : index
    %c0_290 = arith.constant 0 : index
    %c0_291 = arith.constant 0 : index
    %405 = vector.load %arg26[%c3_289, %c0_290, %c0_291] : memref<8x8x32xf32, #tpu.memory_space<vmem>>, vector<1x8x32xf32>
    %406 = vector.shape_cast %405 : vector<1x8x32xf32> to vector<8x32xf32>
    %cst_292 = arith.constant dense<0.000000e+00> : vector<16x32xf32>
    %407 = tpu.matmul %404, %406, %cst_292 {dimension_numbers = #tpu.dot_dimension_numbers<[1], [0], [0], [1], [0, 0, 1, 1], [], []>} : vector<16x8xf32>, vector<8x32xf32>, vector<16x32xf32> -> vector<16x32xf32>
    %408 = arith.addf %368, %407 : vector<16x32xf32>
    %409 = arith.addf %223, %408 : vector<16x32xf32>
    %c0_293 = arith.constant 0 : index
    %c0_294 = arith.constant 0 : index
    %c0_295 = arith.constant 0 : index
    %410 = vector.load %arg27[%c0_293, %c0_294, %c0_295] : memref<2x1x32xf32, #tpu.memory_space<vmem>>, vector<1x1x32xf32>
    %411 = vector.shape_cast %410 : vector<1x1x32xf32> to vector<1x32xf32>
    %412 = vector.broadcast %411 : vector<1x32xf32> to vector<16x32xf32>
    %413 = arith.addf %409, %412 : vector<16x32xf32>
    %c0_296 = arith.constant 0 : index
    %c0_297 = arith.constant 0 : index
    %c0_298 = arith.constant 0 : index
    %414 = vector.load %arg36[%c0_296, %c0_297, %c0_298] : memref<2x1x32xf32, #tpu.memory_space<vmem>>, vector<1x1x32xf32>
    %415 = vector.shape_cast %414 : vector<1x1x32xf32> to vector<1x32xf32>
    %c0_299 = arith.constant 0 : index
    %c0_300 = arith.constant 0 : index
    %c0_301 = arith.constant 0 : index
    %416 = vector.load %arg37[%c0_299, %c0_300, %c0_301] : memref<2x1x32xf32, #tpu.memory_space<vmem>>, vector<1x1x32xf32>
    %417 = vector.shape_cast %416 : vector<1x1x32xf32> to vector<1x32xf32>
    %cst_302 = arith.constant dense<0.000000e+00> : vector<16xf32>
    %418 = vector.multi_reduction <add>, %413, %cst_302 [1] : vector<16x32xf32> to vector<16xf32>
    %419 = vector.shape_cast %418 : vector<16xf32> to vector<16x1xf32>
    %cst_303 = arith.constant 3.200000e+01 : f32
    %420 = vector.broadcast %cst_303 : f32 to vector<16x1xf32>
    %421 = arith.divf %419, %420 : vector<16x1xf32>
    %422 = vector.broadcast %421 : vector<16x1xf32> to vector<16x32xf32>
    %423 = arith.subf %413, %422 : vector<16x32xf32>
    %424 = arith.mulf %423, %423 : vector<16x32xf32>
    %cst_304 = arith.constant dense<0.000000e+00> : vector<16xf32>
    %425 = vector.multi_reduction <add>, %424, %cst_304 [1] : vector<16x32xf32> to vector<16xf32>
    %426 = vector.shape_cast %425 : vector<16xf32> to vector<16x1xf32>
    %cst_305 = arith.constant 3.200000e+01 : f32
    %427 = vector.broadcast %cst_305 : f32 to vector<16x1xf32>
    %428 = arith.divf %426, %427 : vector<16x1xf32>
    %cst_306 = arith.constant 9.99999974E-6 : f32
    %429 = vector.broadcast %cst_306 : f32 to vector<16x1xf32>
    %430 = arith.addf %428, %429 : vector<16x1xf32>
    %431 = math.rsqrt %430 : vector<16x1xf32>
    %432 = vector.broadcast %431 : vector<16x1xf32> to vector<16x32xf32>
    %433 = arith.mulf %423, %432 : vector<16x32xf32>
    %434 = vector.broadcast %415 : vector<1x32xf32> to vector<16x32xf32>
    %435 = arith.mulf %433, %434 : vector<16x32xf32>
    %436 = vector.broadcast %417 : vector<1x32xf32> to vector<16x32xf32>
    %437 = arith.addf %435, %436 : vector<16x32xf32>
    %c0_307 = arith.constant 0 : index
    %c0_308 = arith.constant 0 : index
    %c0_309 = arith.constant 0 : index
    %438 = vector.load %arg28[%c0_307, %c0_308, %c0_309] : memref<2x32x128xf32, #tpu.memory_space<vmem>>, vector<1x32x128xf32>
    %439 = vector.shape_cast %438 : vector<1x32x128xf32> to vector<32x128xf32>
    %cst_310 = arith.constant dense<0.000000e+00> : vector<16x128xf32>
    %440 = tpu.matmul %437, %439, %cst_310 {dimension_numbers = #tpu.dot_dimension_numbers<[1], [0], [0], [1], [0, 0, 1, 1], [], []>} : vector<16x32xf32>, vector<32x128xf32>, vector<16x128xf32> -> vector<16x128xf32>
    %c0_311 = arith.constant 0 : index
    %c0_312 = arith.constant 0 : index
    %c0_313 = arith.constant 0 : index
    %441 = vector.load %arg29[%c0_311, %c0_312, %c0_313] : memref<2x1x128xf32, #tpu.memory_space<vmem>>, vector<1x1x128xf32>
    %442 = vector.shape_cast %441 : vector<1x1x128xf32> to vector<1x128xf32>
    %443 = vector.broadcast %442 : vector<1x128xf32> to vector<16x128xf32>
    %444 = arith.addf %440, %443 : vector<16x128xf32>
    %cst_314 = arith.constant 5.000000e-01 : f32
    %445 = vector.broadcast %cst_314 : f32 to vector<16x128xf32>
    %446 = arith.mulf %445, %444 : vector<16x128xf32>
    %cst_315 = arith.constant 0.707106769 : f32
    %447 = vector.broadcast %cst_315 : f32 to vector<16x128xf32>
    %448 = arith.mulf %444, %447 : vector<16x128xf32>
    %449 = math.erf %448 : vector<16x128xf32>
    %cst_316 = arith.constant 1.000000e+00 : f32
    %450 = vector.broadcast %cst_316 : f32 to vector<16x128xf32>
    %451 = arith.addf %450, %449 : vector<16x128xf32>
    %452 = arith.mulf %446, %451 : vector<16x128xf32>
    %c0_317 = arith.constant 0 : index
    %c0_318 = arith.constant 0 : index
    %c0_319 = arith.constant 0 : index
    %453 = vector.load %arg30[%c0_317, %c0_318, %c0_319] : memref<2x128x32xf32, #tpu.memory_space<vmem>>, vector<1x128x32xf32>
    %454 = vector.shape_cast %453 : vector<1x128x32xf32> to vector<128x32xf32>
    %cst_320 = arith.constant dense<0.000000e+00> : vector<16x32xf32>
    %455 = tpu.matmul %452, %454, %cst_320 {dimension_numbers = #tpu.dot_dimension_numbers<[1], [0], [0], [1], [0, 0, 1, 1], [], []>} : vector<16x128xf32>, vector<128x32xf32>, vector<16x32xf32> -> vector<16x32xf32>
    %456 = arith.addf %413, %455 : vector<16x32xf32>
    %c0_321 = arith.constant 0 : index
    %c0_322 = arith.constant 0 : index
    %c0_323 = arith.constant 0 : index
    %457 = vector.load %arg31[%c0_321, %c0_322, %c0_323] : memref<2x1x32xf32, #tpu.memory_space<vmem>>, vector<1x1x32xf32>
    %458 = vector.shape_cast %457 : vector<1x1x32xf32> to vector<1x32xf32>
    %459 = vector.broadcast %458 : vector<1x32xf32> to vector<16x32xf32>
    %460 = arith.addf %456, %459 : vector<16x32xf32>
    %c1_324 = arith.constant 1 : index
    %c0_325 = arith.constant 0 : index
    %c0_326 = arith.constant 0 : index
    %461 = vector.load %arg32[%c1_324, %c0_325, %c0_326] : memref<2x1x32xf32, #tpu.memory_space<vmem>>, vector<1x1x32xf32>
    %462 = vector.shape_cast %461 : vector<1x1x32xf32> to vector<1x32xf32>
    %c1_327 = arith.constant 1 : index
    %c0_328 = arith.constant 0 : index
    %c0_329 = arith.constant 0 : index
    %463 = vector.load %arg33[%c1_327, %c0_328, %c0_329] : memref<2x1x32xf32, #tpu.memory_space<vmem>>, vector<1x1x32xf32>
    %464 = vector.shape_cast %463 : vector<1x1x32xf32> to vector<1x32xf32>
    %cst_330 = arith.constant dense<0.000000e+00> : vector<16xf32>
    %465 = vector.multi_reduction <add>, %460, %cst_330 [1] : vector<16x32xf32> to vector<16xf32>
    %466 = vector.shape_cast %465 : vector<16xf32> to vector<16x1xf32>
    %cst_331 = arith.constant 3.200000e+01 : f32
    %467 = vector.broadcast %cst_331 : f32 to vector<16x1xf32>
    %468 = arith.divf %466, %467 : vector<16x1xf32>
    %469 = vector.broadcast %468 : vector<16x1xf32> to vector<16x32xf32>
    %470 = arith.subf %460, %469 : vector<16x32xf32>
    %471 = arith.mulf %470, %470 : vector<16x32xf32>
    %cst_332 = arith.constant dense<0.000000e+00> : vector<16xf32>
    %472 = vector.multi_reduction <add>, %471, %cst_332 [1] : vector<16x32xf32> to vector<16xf32>
    %473 = vector.shape_cast %472 : vector<16xf32> to vector<16x1xf32>
    %cst_333 = arith.constant 3.200000e+01 : f32
    %474 = vector.broadcast %cst_333 : f32 to vector<16x1xf32>
    %475 = arith.divf %473, %474 : vector<16x1xf32>
    %cst_334 = arith.constant 9.99999974E-6 : f32
    %476 = vector.broadcast %cst_334 : f32 to vector<16x1xf32>
    %477 = arith.addf %475, %476 : vector<16x1xf32>
    %478 = math.rsqrt %477 : vector<16x1xf32>
    %479 = vector.broadcast %478 : vector<16x1xf32> to vector<16x32xf32>
    %480 = arith.mulf %470, %479 : vector<16x32xf32>
    %481 = vector.broadcast %462 : vector<1x32xf32> to vector<16x32xf32>
    %482 = arith.mulf %480, %481 : vector<16x32xf32>
    %483 = vector.broadcast %464 : vector<1x32xf32> to vector<16x32xf32>
    %484 = arith.addf %482, %483 : vector<16x32xf32>
    %cst_335 = arith.constant 0.000000e+00 : f32
    %485 = vector.broadcast %cst_335 : f32 to vector<16x32xf32>
    %c4 = arith.constant 4 : index
    %c0_336 = arith.constant 0 : index
    %c0_337 = arith.constant 0 : index
    %486 = vector.load %arg12[%c4, %c0_336, %c0_337] : memref<8x32x8xf32, #tpu.memory_space<vmem>>, vector<1x32x8xf32>
    %487 = vector.shape_cast %486 : vector<1x32x8xf32> to vector<32x8xf32>
    %cst_338 = arith.constant dense<0.000000e+00> : vector<16x8xf32>
    %488 = tpu.matmul %484, %487, %cst_338 {dimension_numbers = #tpu.dot_dimension_numbers<[1], [0], [0], [1], [0, 0, 1, 1], [], []>} : vector<16x32xf32>, vector<32x8xf32>, vector<16x8xf32> -> vector<16x8xf32>
    %c4_339 = arith.constant 4 : index
    %c0_340 = arith.constant 0 : index
    %c0_341 = arith.constant 0 : index
    %489 = vector.load %arg13[%c4_339, %c0_340, %c0_341] : memref<8x1x8xf32, #tpu.memory_space<vmem>>, vector<1x1x8xf32>
    %490 = vector.shape_cast %489 : vector<1x1x8xf32> to vector<1x8xf32>
    %491 = vector.broadcast %490 : vector<1x8xf32> to vector<16x8xf32>
    %492 = arith.addf %488, %491 : vector<16x8xf32>
    %c4_342 = arith.constant 4 : index
    %c0_343 = arith.constant 0 : index
    %c0_344 = arith.constant 0 : index
    %493 = vector.load %arg14[%c4_342, %c0_343, %c0_344] : memref<8x32x8xf32, #tpu.memory_space<vmem>>, vector<1x32x8xf32>
    %494 = vector.shape_cast %493 : vector<1x32x8xf32> to vector<32x8xf32>
    %cst_345 = arith.constant dense<0.000000e+00> : vector<16x8xf32>
    %495 = tpu.matmul %484, %494, %cst_345 {dimension_numbers = #tpu.dot_dimension_numbers<[1], [0], [0], [1], [0, 0, 1, 1], [], []>} : vector<16x32xf32>, vector<32x8xf32>, vector<16x8xf32> -> vector<16x8xf32>
    %c4_346 = arith.constant 4 : index
    %c0_347 = arith.constant 0 : index
    %c0_348 = arith.constant 0 : index
    %496 = vector.load %arg15[%c4_346, %c0_347, %c0_348] : memref<8x1x8xf32, #tpu.memory_space<vmem>>, vector<1x1x8xf32>
    %497 = vector.shape_cast %496 : vector<1x1x8xf32> to vector<1x8xf32>
    %498 = vector.broadcast %497 : vector<1x8xf32> to vector<16x8xf32>
    %499 = arith.addf %495, %498 : vector<16x8xf32>
    %c4_349 = arith.constant 4 : index
    %c0_350 = arith.constant 0 : index
    %c0_351 = arith.constant 0 : index
    %500 = vector.load %arg16[%c4_349, %c0_350, %c0_351] : memref<8x32x8xf32, #tpu.memory_space<vmem>>, vector<1x32x8xf32>
    %501 = vector.shape_cast %500 : vector<1x32x8xf32> to vector<32x8xf32>
    %cst_352 = arith.constant dense<0.000000e+00> : vector<16x8xf32>
    %502 = tpu.matmul %484, %501, %cst_352 {dimension_numbers = #tpu.dot_dimension_numbers<[1], [0], [0], [1], [0, 0, 1, 1], [], []>} : vector<16x32xf32>, vector<32x8xf32>, vector<16x8xf32> -> vector<16x8xf32>
    %c4_353 = arith.constant 4 : index
    %c0_354 = arith.constant 0 : index
    %c0_355 = arith.constant 0 : index
    %503 = vector.load %arg17[%c4_353, %c0_354, %c0_355] : memref<8x1x8xf32, #tpu.memory_space<vmem>>, vector<1x1x8xf32>
    %504 = vector.shape_cast %503 : vector<1x1x8xf32> to vector<1x8xf32>
    %505 = vector.broadcast %504 : vector<1x8xf32> to vector<16x8xf32>
    %506 = arith.addf %502, %505 : vector<16x8xf32>
    %cst_356 = arith.constant dense<0.000000e+00> : vector<16x16xf32>
    %507 = tpu.matmul %492, %499, %cst_356 {dimension_numbers = #tpu.dot_dimension_numbers<[1], [1], [0], [0], [0, 0, 1, 0], [], []>} : vector<16x8xf32>, vector<16x8xf32>, vector<16x16xf32> -> vector<16x16xf32>
    %cst_357 = arith.constant 0.353553385 : f32
    %508 = vector.broadcast %cst_357 : f32 to vector<16x16xf32>
    %509 = arith.mulf %507, %508 : vector<16x16xf32>
    %510 = arith.addf %509, %32 : vector<16x16xf32>
    %cst_358 = arith.constant dense<0xFF800000> : vector<16xf32>
    %511 = vector.multi_reduction <maximumf>, %510, %cst_358 [1] : vector<16x16xf32> to vector<16xf32>
    %512 = vector.shape_cast %511 : vector<16xf32> to vector<16x1xf32>
    %513 = vector.broadcast %512 : vector<16x1xf32> to vector<16x16xf32>
    %514 = arith.subf %510, %513 : vector<16x16xf32>
    %515 = math.exp %514 : vector<16x16xf32>
    %cst_359 = arith.constant dense<0.000000e+00> : vector<16xf32>
    %516 = vector.multi_reduction <add>, %515, %cst_359 [1] : vector<16x16xf32> to vector<16xf32>
    %517 = vector.shape_cast %516 : vector<16xf32> to vector<16x1xf32>
    %518 = tpu.reciprocal %517 {approx = true} : vector<16x1xf32> -> vector<16x1xf32>
    %519 = vector.broadcast %518 : vector<16x1xf32> to vector<16x16xf32>
    %520 = arith.mulf %515, %519 : vector<16x16xf32>
    %cst_360 = arith.constant dense<0.000000e+00> : vector<16x8xf32>
    %521 = tpu.matmul %520, %506, %cst_360 {dimension_numbers = #tpu.dot_dimension_numbers<[1], [0], [0], [1], [0, 0, 1, 1], [], []>} : vector<16x16xf32>, vector<16x8xf32>, vector<16x8xf32> -> vector<16x8xf32>
    %c4_361 = arith.constant 4 : index
    %c0_362 = arith.constant 0 : index
    %c0_363 = arith.constant 0 : index
    %522 = vector.load %arg18[%c4_361, %c0_362, %c0_363] : memref<8x8x32xf32, #tpu.memory_space<vmem>>, vector<1x8x32xf32>
    %523 = vector.shape_cast %522 : vector<1x8x32xf32> to vector<8x32xf32>
    %cst_364 = arith.constant dense<0.000000e+00> : vector<16x32xf32>
    %524 = tpu.matmul %521, %523, %cst_364 {dimension_numbers = #tpu.dot_dimension_numbers<[1], [0], [0], [1], [0, 0, 1, 1], [], []>} : vector<16x8xf32>, vector<8x32xf32>, vector<16x32xf32> -> vector<16x32xf32>
    %525 = arith.addf %485, %524 : vector<16x32xf32>
    %c5 = arith.constant 5 : index
    %c0_365 = arith.constant 0 : index
    %c0_366 = arith.constant 0 : index
    %526 = vector.load %arg12[%c5, %c0_365, %c0_366] : memref<8x32x8xf32, #tpu.memory_space<vmem>>, vector<1x32x8xf32>
    %527 = vector.shape_cast %526 : vector<1x32x8xf32> to vector<32x8xf32>
    %cst_367 = arith.constant dense<0.000000e+00> : vector<16x8xf32>
    %528 = tpu.matmul %484, %527, %cst_367 {dimension_numbers = #tpu.dot_dimension_numbers<[1], [0], [0], [1], [0, 0, 1, 1], [], []>} : vector<16x32xf32>, vector<32x8xf32>, vector<16x8xf32> -> vector<16x8xf32>
    %c5_368 = arith.constant 5 : index
    %c0_369 = arith.constant 0 : index
    %c0_370 = arith.constant 0 : index
    %529 = vector.load %arg13[%c5_368, %c0_369, %c0_370] : memref<8x1x8xf32, #tpu.memory_space<vmem>>, vector<1x1x8xf32>
    %530 = vector.shape_cast %529 : vector<1x1x8xf32> to vector<1x8xf32>
    %531 = vector.broadcast %530 : vector<1x8xf32> to vector<16x8xf32>
    %532 = arith.addf %528, %531 : vector<16x8xf32>
    %c5_371 = arith.constant 5 : index
    %c0_372 = arith.constant 0 : index
    %c0_373 = arith.constant 0 : index
    %533 = vector.load %arg14[%c5_371, %c0_372, %c0_373] : memref<8x32x8xf32, #tpu.memory_space<vmem>>, vector<1x32x8xf32>
    %534 = vector.shape_cast %533 : vector<1x32x8xf32> to vector<32x8xf32>
    %cst_374 = arith.constant dense<0.000000e+00> : vector<16x8xf32>
    %535 = tpu.matmul %484, %534, %cst_374 {dimension_numbers = #tpu.dot_dimension_numbers<[1], [0], [0], [1], [0, 0, 1, 1], [], []>} : vector<16x32xf32>, vector<32x8xf32>, vector<16x8xf32> -> vector<16x8xf32>
    %c5_375 = arith.constant 5 : index
    %c0_376 = arith.constant 0 : index
    %c0_377 = arith.constant 0 : index
    %536 = vector.load %arg15[%c5_375, %c0_376, %c0_377] : memref<8x1x8xf32, #tpu.memory_space<vmem>>, vector<1x1x8xf32>
    %537 = vector.shape_cast %536 : vector<1x1x8xf32> to vector<1x8xf32>
    %538 = vector.broadcast %537 : vector<1x8xf32> to vector<16x8xf32>
    %539 = arith.addf %535, %538 : vector<16x8xf32>
    %c5_378 = arith.constant 5 : index
    %c0_379 = arith.constant 0 : index
    %c0_380 = arith.constant 0 : index
    %540 = vector.load %arg16[%c5_378, %c0_379, %c0_380] : memref<8x32x8xf32, #tpu.memory_space<vmem>>, vector<1x32x8xf32>
    %541 = vector.shape_cast %540 : vector<1x32x8xf32> to vector<32x8xf32>
    %cst_381 = arith.constant dense<0.000000e+00> : vector<16x8xf32>
    %542 = tpu.matmul %484, %541, %cst_381 {dimension_numbers = #tpu.dot_dimension_numbers<[1], [0], [0], [1], [0, 0, 1, 1], [], []>} : vector<16x32xf32>, vector<32x8xf32>, vector<16x8xf32> -> vector<16x8xf32>
    %c5_382 = arith.constant 5 : index
    %c0_383 = arith.constant 0 : index
    %c0_384 = arith.constant 0 : index
    %543 = vector.load %arg17[%c5_382, %c0_383, %c0_384] : memref<8x1x8xf32, #tpu.memory_space<vmem>>, vector<1x1x8xf32>
    %544 = vector.shape_cast %543 : vector<1x1x8xf32> to vector<1x8xf32>
    %545 = vector.broadcast %544 : vector<1x8xf32> to vector<16x8xf32>
    %546 = arith.addf %542, %545 : vector<16x8xf32>
    %cst_385 = arith.constant dense<0.000000e+00> : vector<16x16xf32>
    %547 = tpu.matmul %532, %539, %cst_385 {dimension_numbers = #tpu.dot_dimension_numbers<[1], [1], [0], [0], [0, 0, 1, 0], [], []>} : vector<16x8xf32>, vector<16x8xf32>, vector<16x16xf32> -> vector<16x16xf32>
    %cst_386 = arith.constant 0.353553385 : f32
    %548 = vector.broadcast %cst_386 : f32 to vector<16x16xf32>
    %549 = arith.mulf %547, %548 : vector<16x16xf32>
    %550 = arith.addf %549, %32 : vector<16x16xf32>
    %cst_387 = arith.constant dense<0xFF800000> : vector<16xf32>
    %551 = vector.multi_reduction <maximumf>, %550, %cst_387 [1] : vector<16x16xf32> to vector<16xf32>
    %552 = vector.shape_cast %551 : vector<16xf32> to vector<16x1xf32>
    %553 = vector.broadcast %552 : vector<16x1xf32> to vector<16x16xf32>
    %554 = arith.subf %550, %553 : vector<16x16xf32>
    %555 = math.exp %554 : vector<16x16xf32>
    %cst_388 = arith.constant dense<0.000000e+00> : vector<16xf32>
    %556 = vector.multi_reduction <add>, %555, %cst_388 [1] : vector<16x16xf32> to vector<16xf32>
    %557 = vector.shape_cast %556 : vector<16xf32> to vector<16x1xf32>
    %558 = tpu.reciprocal %557 {approx = true} : vector<16x1xf32> -> vector<16x1xf32>
    %559 = vector.broadcast %558 : vector<16x1xf32> to vector<16x16xf32>
    %560 = arith.mulf %555, %559 : vector<16x16xf32>
    %cst_389 = arith.constant dense<0.000000e+00> : vector<16x8xf32>
    %561 = tpu.matmul %560, %546, %cst_389 {dimension_numbers = #tpu.dot_dimension_numbers<[1], [0], [0], [1], [0, 0, 1, 1], [], []>} : vector<16x16xf32>, vector<16x8xf32>, vector<16x8xf32> -> vector<16x8xf32>
    %c5_390 = arith.constant 5 : index
    %c0_391 = arith.constant 0 : index
    %c0_392 = arith.constant 0 : index
    %562 = vector.load %arg18[%c5_390, %c0_391, %c0_392] : memref<8x8x32xf32, #tpu.memory_space<vmem>>, vector<1x8x32xf32>
    %563 = vector.shape_cast %562 : vector<1x8x32xf32> to vector<8x32xf32>
    %cst_393 = arith.constant dense<0.000000e+00> : vector<16x32xf32>
    %564 = tpu.matmul %561, %563, %cst_393 {dimension_numbers = #tpu.dot_dimension_numbers<[1], [0], [0], [1], [0, 0, 1, 1], [], []>} : vector<16x8xf32>, vector<8x32xf32>, vector<16x32xf32> -> vector<16x32xf32>
    %565 = arith.addf %525, %564 : vector<16x32xf32>
    %c6 = arith.constant 6 : index
    %c0_394 = arith.constant 0 : index
    %c0_395 = arith.constant 0 : index
    %566 = vector.load %arg12[%c6, %c0_394, %c0_395] : memref<8x32x8xf32, #tpu.memory_space<vmem>>, vector<1x32x8xf32>
    %567 = vector.shape_cast %566 : vector<1x32x8xf32> to vector<32x8xf32>
    %cst_396 = arith.constant dense<0.000000e+00> : vector<16x8xf32>
    %568 = tpu.matmul %484, %567, %cst_396 {dimension_numbers = #tpu.dot_dimension_numbers<[1], [0], [0], [1], [0, 0, 1, 1], [], []>} : vector<16x32xf32>, vector<32x8xf32>, vector<16x8xf32> -> vector<16x8xf32>
    %c6_397 = arith.constant 6 : index
    %c0_398 = arith.constant 0 : index
    %c0_399 = arith.constant 0 : index
    %569 = vector.load %arg13[%c6_397, %c0_398, %c0_399] : memref<8x1x8xf32, #tpu.memory_space<vmem>>, vector<1x1x8xf32>
    %570 = vector.shape_cast %569 : vector<1x1x8xf32> to vector<1x8xf32>
    %571 = vector.broadcast %570 : vector<1x8xf32> to vector<16x8xf32>
    %572 = arith.addf %568, %571 : vector<16x8xf32>
    %c6_400 = arith.constant 6 : index
    %c0_401 = arith.constant 0 : index
    %c0_402 = arith.constant 0 : index
    %573 = vector.load %arg14[%c6_400, %c0_401, %c0_402] : memref<8x32x8xf32, #tpu.memory_space<vmem>>, vector<1x32x8xf32>
    %574 = vector.shape_cast %573 : vector<1x32x8xf32> to vector<32x8xf32>
    %cst_403 = arith.constant dense<0.000000e+00> : vector<16x8xf32>
    %575 = tpu.matmul %484, %574, %cst_403 {dimension_numbers = #tpu.dot_dimension_numbers<[1], [0], [0], [1], [0, 0, 1, 1], [], []>} : vector<16x32xf32>, vector<32x8xf32>, vector<16x8xf32> -> vector<16x8xf32>
    %c6_404 = arith.constant 6 : index
    %c0_405 = arith.constant 0 : index
    %c0_406 = arith.constant 0 : index
    %576 = vector.load %arg15[%c6_404, %c0_405, %c0_406] : memref<8x1x8xf32, #tpu.memory_space<vmem>>, vector<1x1x8xf32>
    %577 = vector.shape_cast %576 : vector<1x1x8xf32> to vector<1x8xf32>
    %578 = vector.broadcast %577 : vector<1x8xf32> to vector<16x8xf32>
    %579 = arith.addf %575, %578 : vector<16x8xf32>
    %c6_407 = arith.constant 6 : index
    %c0_408 = arith.constant 0 : index
    %c0_409 = arith.constant 0 : index
    %580 = vector.load %arg16[%c6_407, %c0_408, %c0_409] : memref<8x32x8xf32, #tpu.memory_space<vmem>>, vector<1x32x8xf32>
    %581 = vector.shape_cast %580 : vector<1x32x8xf32> to vector<32x8xf32>
    %cst_410 = arith.constant dense<0.000000e+00> : vector<16x8xf32>
    %582 = tpu.matmul %484, %581, %cst_410 {dimension_numbers = #tpu.dot_dimension_numbers<[1], [0], [0], [1], [0, 0, 1, 1], [], []>} : vector<16x32xf32>, vector<32x8xf32>, vector<16x8xf32> -> vector<16x8xf32>
    %c6_411 = arith.constant 6 : index
    %c0_412 = arith.constant 0 : index
    %c0_413 = arith.constant 0 : index
    %583 = vector.load %arg17[%c6_411, %c0_412, %c0_413] : memref<8x1x8xf32, #tpu.memory_space<vmem>>, vector<1x1x8xf32>
    %584 = vector.shape_cast %583 : vector<1x1x8xf32> to vector<1x8xf32>
    %585 = vector.broadcast %584 : vector<1x8xf32> to vector<16x8xf32>
    %586 = arith.addf %582, %585 : vector<16x8xf32>
    %cst_414 = arith.constant dense<0.000000e+00> : vector<16x16xf32>
    %587 = tpu.matmul %572, %579, %cst_414 {dimension_numbers = #tpu.dot_dimension_numbers<[1], [1], [0], [0], [0, 0, 1, 0], [], []>} : vector<16x8xf32>, vector<16x8xf32>, vector<16x16xf32> -> vector<16x16xf32>
    %cst_415 = arith.constant 0.353553385 : f32
    %588 = vector.broadcast %cst_415 : f32 to vector<16x16xf32>
    %589 = arith.mulf %587, %588 : vector<16x16xf32>
    %590 = arith.addf %589, %32 : vector<16x16xf32>
    %cst_416 = arith.constant dense<0xFF800000> : vector<16xf32>
    %591 = vector.multi_reduction <maximumf>, %590, %cst_416 [1] : vector<16x16xf32> to vector<16xf32>
    %592 = vector.shape_cast %591 : vector<16xf32> to vector<16x1xf32>
    %593 = vector.broadcast %592 : vector<16x1xf32> to vector<16x16xf32>
    %594 = arith.subf %590, %593 : vector<16x16xf32>
    %595 = math.exp %594 : vector<16x16xf32>
    %cst_417 = arith.constant dense<0.000000e+00> : vector<16xf32>
    %596 = vector.multi_reduction <add>, %595, %cst_417 [1] : vector<16x16xf32> to vector<16xf32>
    %597 = vector.shape_cast %596 : vector<16xf32> to vector<16x1xf32>
    %598 = tpu.reciprocal %597 {approx = true} : vector<16x1xf32> -> vector<16x1xf32>
    %599 = vector.broadcast %598 : vector<16x1xf32> to vector<16x16xf32>
    %600 = arith.mulf %595, %599 : vector<16x16xf32>
    %cst_418 = arith.constant dense<0.000000e+00> : vector<16x8xf32>
    %601 = tpu.matmul %600, %586, %cst_418 {dimension_numbers = #tpu.dot_dimension_numbers<[1], [0], [0], [1], [0, 0, 1, 1], [], []>} : vector<16x16xf32>, vector<16x8xf32>, vector<16x8xf32> -> vector<16x8xf32>
    %c6_419 = arith.constant 6 : index
    %c0_420 = arith.constant 0 : index
    %c0_421 = arith.constant 0 : index
    %602 = vector.load %arg18[%c6_419, %c0_420, %c0_421] : memref<8x8x32xf32, #tpu.memory_space<vmem>>, vector<1x8x32xf32>
    %603 = vector.shape_cast %602 : vector<1x8x32xf32> to vector<8x32xf32>
    %cst_422 = arith.constant dense<0.000000e+00> : vector<16x32xf32>
    %604 = tpu.matmul %601, %603, %cst_422 {dimension_numbers = #tpu.dot_dimension_numbers<[1], [0], [0], [1], [0, 0, 1, 1], [], []>} : vector<16x8xf32>, vector<8x32xf32>, vector<16x32xf32> -> vector<16x32xf32>
    %605 = arith.addf %565, %604 : vector<16x32xf32>
    %c7 = arith.constant 7 : index
    %c0_423 = arith.constant 0 : index
    %c0_424 = arith.constant 0 : index
    %606 = vector.load %arg12[%c7, %c0_423, %c0_424] : memref<8x32x8xf32, #tpu.memory_space<vmem>>, vector<1x32x8xf32>
    %607 = vector.shape_cast %606 : vector<1x32x8xf32> to vector<32x8xf32>
    %cst_425 = arith.constant dense<0.000000e+00> : vector<16x8xf32>
    %608 = tpu.matmul %484, %607, %cst_425 {dimension_numbers = #tpu.dot_dimension_numbers<[1], [0], [0], [1], [0, 0, 1, 1], [], []>} : vector<16x32xf32>, vector<32x8xf32>, vector<16x8xf32> -> vector<16x8xf32>
    %c7_426 = arith.constant 7 : index
    %c0_427 = arith.constant 0 : index
    %c0_428 = arith.constant 0 : index
    %609 = vector.load %arg13[%c7_426, %c0_427, %c0_428] : memref<8x1x8xf32, #tpu.memory_space<vmem>>, vector<1x1x8xf32>
    %610 = vector.shape_cast %609 : vector<1x1x8xf32> to vector<1x8xf32>
    %611 = vector.broadcast %610 : vector<1x8xf32> to vector<16x8xf32>
    %612 = arith.addf %608, %611 : vector<16x8xf32>
    %c7_429 = arith.constant 7 : index
    %c0_430 = arith.constant 0 : index
    %c0_431 = arith.constant 0 : index
    %613 = vector.load %arg14[%c7_429, %c0_430, %c0_431] : memref<8x32x8xf32, #tpu.memory_space<vmem>>, vector<1x32x8xf32>
    %614 = vector.shape_cast %613 : vector<1x32x8xf32> to vector<32x8xf32>
    %cst_432 = arith.constant dense<0.000000e+00> : vector<16x8xf32>
    %615 = tpu.matmul %484, %614, %cst_432 {dimension_numbers = #tpu.dot_dimension_numbers<[1], [0], [0], [1], [0, 0, 1, 1], [], []>} : vector<16x32xf32>, vector<32x8xf32>, vector<16x8xf32> -> vector<16x8xf32>
    %c7_433 = arith.constant 7 : index
    %c0_434 = arith.constant 0 : index
    %c0_435 = arith.constant 0 : index
    %616 = vector.load %arg15[%c7_433, %c0_434, %c0_435] : memref<8x1x8xf32, #tpu.memory_space<vmem>>, vector<1x1x8xf32>
    %617 = vector.shape_cast %616 : vector<1x1x8xf32> to vector<1x8xf32>
    %618 = vector.broadcast %617 : vector<1x8xf32> to vector<16x8xf32>
    %619 = arith.addf %615, %618 : vector<16x8xf32>
    %c7_436 = arith.constant 7 : index
    %c0_437 = arith.constant 0 : index
    %c0_438 = arith.constant 0 : index
    %620 = vector.load %arg16[%c7_436, %c0_437, %c0_438] : memref<8x32x8xf32, #tpu.memory_space<vmem>>, vector<1x32x8xf32>
    %621 = vector.shape_cast %620 : vector<1x32x8xf32> to vector<32x8xf32>
    %cst_439 = arith.constant dense<0.000000e+00> : vector<16x8xf32>
    %622 = tpu.matmul %484, %621, %cst_439 {dimension_numbers = #tpu.dot_dimension_numbers<[1], [0], [0], [1], [0, 0, 1, 1], [], []>} : vector<16x32xf32>, vector<32x8xf32>, vector<16x8xf32> -> vector<16x8xf32>
    %c7_440 = arith.constant 7 : index
    %c0_441 = arith.constant 0 : index
    %c0_442 = arith.constant 0 : index
    %623 = vector.load %arg17[%c7_440, %c0_441, %c0_442] : memref<8x1x8xf32, #tpu.memory_space<vmem>>, vector<1x1x8xf32>
    %624 = vector.shape_cast %623 : vector<1x1x8xf32> to vector<1x8xf32>
    %625 = vector.broadcast %624 : vector<1x8xf32> to vector<16x8xf32>
    %626 = arith.addf %622, %625 : vector<16x8xf32>
    %cst_443 = arith.constant dense<0.000000e+00> : vector<16x16xf32>
    %627 = tpu.matmul %612, %619, %cst_443 {dimension_numbers = #tpu.dot_dimension_numbers<[1], [1], [0], [0], [0, 0, 1, 0], [], []>} : vector<16x8xf32>, vector<16x8xf32>, vector<16x16xf32> -> vector<16x16xf32>
    %cst_444 = arith.constant 0.353553385 : f32
    %628 = vector.broadcast %cst_444 : f32 to vector<16x16xf32>
    %629 = arith.mulf %627, %628 : vector<16x16xf32>
    %630 = arith.addf %629, %32 : vector<16x16xf32>
    %cst_445 = arith.constant dense<0xFF800000> : vector<16xf32>
    %631 = vector.multi_reduction <maximumf>, %630, %cst_445 [1] : vector<16x16xf32> to vector<16xf32>
    %632 = vector.shape_cast %631 : vector<16xf32> to vector<16x1xf32>
    %633 = vector.broadcast %632 : vector<16x1xf32> to vector<16x16xf32>
    %634 = arith.subf %630, %633 : vector<16x16xf32>
    %635 = math.exp %634 : vector<16x16xf32>
    %cst_446 = arith.constant dense<0.000000e+00> : vector<16xf32>
    %636 = vector.multi_reduction <add>, %635, %cst_446 [1] : vector<16x16xf32> to vector<16xf32>
    %637 = vector.shape_cast %636 : vector<16xf32> to vector<16x1xf32>
    %638 = tpu.reciprocal %637 {approx = true} : vector<16x1xf32> -> vector<16x1xf32>
    %639 = vector.broadcast %638 : vector<16x1xf32> to vector<16x16xf32>
    %640 = arith.mulf %635, %639 : vector<16x16xf32>
    %cst_447 = arith.constant dense<0.000000e+00> : vector<16x8xf32>
    %641 = tpu.matmul %640, %626, %cst_447 {dimension_numbers = #tpu.dot_dimension_numbers<[1], [0], [0], [1], [0, 0, 1, 1], [], []>} : vector<16x16xf32>, vector<16x8xf32>, vector<16x8xf32> -> vector<16x8xf32>
    %c7_448 = arith.constant 7 : index
    %c0_449 = arith.constant 0 : index
    %c0_450 = arith.constant 0 : index
    %642 = vector.load %arg18[%c7_448, %c0_449, %c0_450] : memref<8x8x32xf32, #tpu.memory_space<vmem>>, vector<1x8x32xf32>
    %643 = vector.shape_cast %642 : vector<1x8x32xf32> to vector<8x32xf32>
    %cst_451 = arith.constant dense<0.000000e+00> : vector<16x32xf32>
    %644 = tpu.matmul %641, %643, %cst_451 {dimension_numbers = #tpu.dot_dimension_numbers<[1], [0], [0], [1], [0, 0, 1, 1], [], []>} : vector<16x8xf32>, vector<8x32xf32>, vector<16x32xf32> -> vector<16x32xf32>
    %645 = arith.addf %605, %644 : vector<16x32xf32>
    %646 = arith.addf %460, %645 : vector<16x32xf32>
    %c1_452 = arith.constant 1 : index
    %c0_453 = arith.constant 0 : index
    %c0_454 = arith.constant 0 : index
    %647 = vector.load %arg19[%c1_452, %c0_453, %c0_454] : memref<2x1x32xf32, #tpu.memory_space<vmem>>, vector<1x1x32xf32>
    %648 = vector.shape_cast %647 : vector<1x1x32xf32> to vector<1x32xf32>
    %649 = vector.broadcast %648 : vector<1x32xf32> to vector<16x32xf32>
    %650 = arith.addf %646, %649 : vector<16x32xf32>
    %c1_455 = arith.constant 1 : index
    %c0_456 = arith.constant 0 : index
    %c0_457 = arith.constant 0 : index
    %651 = vector.load %arg34[%c1_455, %c0_456, %c0_457] : memref<2x1x32xf32, #tpu.memory_space<vmem>>, vector<1x1x32xf32>
    %652 = vector.shape_cast %651 : vector<1x1x32xf32> to vector<1x32xf32>
    %c1_458 = arith.constant 1 : index
    %c0_459 = arith.constant 0 : index
    %c0_460 = arith.constant 0 : index
    %653 = vector.load %arg35[%c1_458, %c0_459, %c0_460] : memref<2x1x32xf32, #tpu.memory_space<vmem>>, vector<1x1x32xf32>
    %654 = vector.shape_cast %653 : vector<1x1x32xf32> to vector<1x32xf32>
    %cst_461 = arith.constant dense<0.000000e+00> : vector<16xf32>
    %655 = vector.multi_reduction <add>, %650, %cst_461 [1] : vector<16x32xf32> to vector<16xf32>
    %656 = vector.shape_cast %655 : vector<16xf32> to vector<16x1xf32>
    %cst_462 = arith.constant 3.200000e+01 : f32
    %657 = vector.broadcast %cst_462 : f32 to vector<16x1xf32>
    %658 = arith.divf %656, %657 : vector<16x1xf32>
    %659 = vector.broadcast %658 : vector<16x1xf32> to vector<16x32xf32>
    %660 = arith.subf %650, %659 : vector<16x32xf32>
    %661 = arith.mulf %660, %660 : vector<16x32xf32>
    %cst_463 = arith.constant dense<0.000000e+00> : vector<16xf32>
    %662 = vector.multi_reduction <add>, %661, %cst_463 [1] : vector<16x32xf32> to vector<16xf32>
    %663 = vector.shape_cast %662 : vector<16xf32> to vector<16x1xf32>
    %cst_464 = arith.constant 3.200000e+01 : f32
    %664 = vector.broadcast %cst_464 : f32 to vector<16x1xf32>
    %665 = arith.divf %663, %664 : vector<16x1xf32>
    %cst_465 = arith.constant 9.99999974E-6 : f32
    %666 = vector.broadcast %cst_465 : f32 to vector<16x1xf32>
    %667 = arith.addf %665, %666 : vector<16x1xf32>
    %668 = math.rsqrt %667 : vector<16x1xf32>
    %669 = vector.broadcast %668 : vector<16x1xf32> to vector<16x32xf32>
    %670 = arith.mulf %660, %669 : vector<16x32xf32>
    %671 = vector.broadcast %652 : vector<1x32xf32> to vector<16x32xf32>
    %672 = arith.mulf %670, %671 : vector<16x32xf32>
    %673 = vector.broadcast %654 : vector<1x32xf32> to vector<16x32xf32>
    %674 = arith.addf %672, %673 : vector<16x32xf32>
    %cst_466 = arith.constant 0.000000e+00 : f32
    %675 = vector.broadcast %cst_466 : f32 to vector<16x32xf32>
    %c4_467 = arith.constant 4 : index
    %c0_468 = arith.constant 0 : index
    %c0_469 = arith.constant 0 : index
    %676 = vector.load %arg20[%c4_467, %c0_468, %c0_469] : memref<8x32x8xf32, #tpu.memory_space<vmem>>, vector<1x32x8xf32>
    %677 = vector.shape_cast %676 : vector<1x32x8xf32> to vector<32x8xf32>
    %cst_470 = arith.constant dense<0.000000e+00> : vector<16x8xf32>
    %678 = tpu.matmul %674, %677, %cst_470 {dimension_numbers = #tpu.dot_dimension_numbers<[1], [0], [0], [1], [0, 0, 1, 1], [], []>} : vector<16x32xf32>, vector<32x8xf32>, vector<16x8xf32> -> vector<16x8xf32>
    %c4_471 = arith.constant 4 : index
    %c0_472 = arith.constant 0 : index
    %c0_473 = arith.constant 0 : index
    %679 = vector.load %arg21[%c4_471, %c0_472, %c0_473] : memref<8x1x8xf32, #tpu.memory_space<vmem>>, vector<1x1x8xf32>
    %680 = vector.shape_cast %679 : vector<1x1x8xf32> to vector<1x8xf32>
    %681 = vector.broadcast %680 : vector<1x8xf32> to vector<16x8xf32>
    %682 = arith.addf %678, %681 : vector<16x8xf32>
    %c4_474 = arith.constant 4 : index
    %c0_475 = arith.constant 0 : index
    %c0_476 = arith.constant 0 : index
    %683 = vector.load %arg22[%c4_474, %c0_475, %c0_476] : memref<8x32x8xf32, #tpu.memory_space<vmem>>, vector<1x32x8xf32>
    %684 = vector.shape_cast %683 : vector<1x32x8xf32> to vector<32x8xf32>
    %cst_477 = arith.constant dense<0.000000e+00> : vector<16x8xf32>
    %685 = tpu.matmul %31, %684, %cst_477 {dimension_numbers = #tpu.dot_dimension_numbers<[1], [0], [0], [1], [0, 0, 1, 1], [], []>} : vector<16x32xf32>, vector<32x8xf32>, vector<16x8xf32> -> vector<16x8xf32>
    %c4_478 = arith.constant 4 : index
    %c0_479 = arith.constant 0 : index
    %c0_480 = arith.constant 0 : index
    %686 = vector.load %arg23[%c4_478, %c0_479, %c0_480] : memref<8x1x8xf32, #tpu.memory_space<vmem>>, vector<1x1x8xf32>
    %687 = vector.shape_cast %686 : vector<1x1x8xf32> to vector<1x8xf32>
    %688 = vector.broadcast %687 : vector<1x8xf32> to vector<16x8xf32>
    %689 = arith.addf %685, %688 : vector<16x8xf32>
    %c4_481 = arith.constant 4 : index
    %c0_482 = arith.constant 0 : index
    %c0_483 = arith.constant 0 : index
    %690 = vector.load %arg24[%c4_481, %c0_482, %c0_483] : memref<8x32x8xf32, #tpu.memory_space<vmem>>, vector<1x32x8xf32>
    %691 = vector.shape_cast %690 : vector<1x32x8xf32> to vector<32x8xf32>
    %cst_484 = arith.constant dense<0.000000e+00> : vector<16x8xf32>
    %692 = tpu.matmul %31, %691, %cst_484 {dimension_numbers = #tpu.dot_dimension_numbers<[1], [0], [0], [1], [0, 0, 1, 1], [], []>} : vector<16x32xf32>, vector<32x8xf32>, vector<16x8xf32> -> vector<16x8xf32>
    %c4_485 = arith.constant 4 : index
    %c0_486 = arith.constant 0 : index
    %c0_487 = arith.constant 0 : index
    %693 = vector.load %arg25[%c4_485, %c0_486, %c0_487] : memref<8x1x8xf32, #tpu.memory_space<vmem>>, vector<1x1x8xf32>
    %694 = vector.shape_cast %693 : vector<1x1x8xf32> to vector<1x8xf32>
    %695 = vector.broadcast %694 : vector<1x8xf32> to vector<16x8xf32>
    %696 = arith.addf %692, %695 : vector<16x8xf32>
    %cst_488 = arith.constant dense<0.000000e+00> : vector<16x16xf32>
    %697 = tpu.matmul %682, %689, %cst_488 {dimension_numbers = #tpu.dot_dimension_numbers<[1], [1], [0], [0], [0, 0, 1, 0], [], []>} : vector<16x8xf32>, vector<16x8xf32>, vector<16x16xf32> -> vector<16x16xf32>
    %cst_489 = arith.constant 0.353553385 : f32
    %698 = vector.broadcast %cst_489 : f32 to vector<16x16xf32>
    %699 = arith.mulf %697, %698 : vector<16x16xf32>
    %700 = arith.addf %699, %33 : vector<16x16xf32>
    %cst_490 = arith.constant dense<0xFF800000> : vector<16xf32>
    %701 = vector.multi_reduction <maximumf>, %700, %cst_490 [1] : vector<16x16xf32> to vector<16xf32>
    %702 = vector.shape_cast %701 : vector<16xf32> to vector<16x1xf32>
    %703 = vector.broadcast %702 : vector<16x1xf32> to vector<16x16xf32>
    %704 = arith.subf %700, %703 : vector<16x16xf32>
    %705 = math.exp %704 : vector<16x16xf32>
    %cst_491 = arith.constant dense<0.000000e+00> : vector<16xf32>
    %706 = vector.multi_reduction <add>, %705, %cst_491 [1] : vector<16x16xf32> to vector<16xf32>
    %707 = vector.shape_cast %706 : vector<16xf32> to vector<16x1xf32>
    %708 = tpu.reciprocal %707 {approx = true} : vector<16x1xf32> -> vector<16x1xf32>
    %709 = vector.broadcast %708 : vector<16x1xf32> to vector<16x16xf32>
    %710 = arith.mulf %705, %709 : vector<16x16xf32>
    %cst_492 = arith.constant dense<0.000000e+00> : vector<16x8xf32>
    %711 = tpu.matmul %710, %696, %cst_492 {dimension_numbers = #tpu.dot_dimension_numbers<[1], [0], [0], [1], [0, 0, 1, 1], [], []>} : vector<16x16xf32>, vector<16x8xf32>, vector<16x8xf32> -> vector<16x8xf32>
    %c4_493 = arith.constant 4 : index
    %c0_494 = arith.constant 0 : index
    %c0_495 = arith.constant 0 : index
    %712 = vector.load %arg26[%c4_493, %c0_494, %c0_495] : memref<8x8x32xf32, #tpu.memory_space<vmem>>, vector<1x8x32xf32>
    %713 = vector.shape_cast %712 : vector<1x8x32xf32> to vector<8x32xf32>
    %cst_496 = arith.constant dense<0.000000e+00> : vector<16x32xf32>
    %714 = tpu.matmul %711, %713, %cst_496 {dimension_numbers = #tpu.dot_dimension_numbers<[1], [0], [0], [1], [0, 0, 1, 1], [], []>} : vector<16x8xf32>, vector<8x32xf32>, vector<16x32xf32> -> vector<16x32xf32>
    %715 = arith.addf %675, %714 : vector<16x32xf32>
    %c5_497 = arith.constant 5 : index
    %c0_498 = arith.constant 0 : index
    %c0_499 = arith.constant 0 : index
    %716 = vector.load %arg20[%c5_497, %c0_498, %c0_499] : memref<8x32x8xf32, #tpu.memory_space<vmem>>, vector<1x32x8xf32>
    %717 = vector.shape_cast %716 : vector<1x32x8xf32> to vector<32x8xf32>
    %cst_500 = arith.constant dense<0.000000e+00> : vector<16x8xf32>
    %718 = tpu.matmul %674, %717, %cst_500 {dimension_numbers = #tpu.dot_dimension_numbers<[1], [0], [0], [1], [0, 0, 1, 1], [], []>} : vector<16x32xf32>, vector<32x8xf32>, vector<16x8xf32> -> vector<16x8xf32>
    %c5_501 = arith.constant 5 : index
    %c0_502 = arith.constant 0 : index
    %c0_503 = arith.constant 0 : index
    %719 = vector.load %arg21[%c5_501, %c0_502, %c0_503] : memref<8x1x8xf32, #tpu.memory_space<vmem>>, vector<1x1x8xf32>
    %720 = vector.shape_cast %719 : vector<1x1x8xf32> to vector<1x8xf32>
    %721 = vector.broadcast %720 : vector<1x8xf32> to vector<16x8xf32>
    %722 = arith.addf %718, %721 : vector<16x8xf32>
    %c5_504 = arith.constant 5 : index
    %c0_505 = arith.constant 0 : index
    %c0_506 = arith.constant 0 : index
    %723 = vector.load %arg22[%c5_504, %c0_505, %c0_506] : memref<8x32x8xf32, #tpu.memory_space<vmem>>, vector<1x32x8xf32>
    %724 = vector.shape_cast %723 : vector<1x32x8xf32> to vector<32x8xf32>
    %cst_507 = arith.constant dense<0.000000e+00> : vector<16x8xf32>
    %725 = tpu.matmul %31, %724, %cst_507 {dimension_numbers = #tpu.dot_dimension_numbers<[1], [0], [0], [1], [0, 0, 1, 1], [], []>} : vector<16x32xf32>, vector<32x8xf32>, vector<16x8xf32> -> vector<16x8xf32>
    %c5_508 = arith.constant 5 : index
    %c0_509 = arith.constant 0 : index
    %c0_510 = arith.constant 0 : index
    %726 = vector.load %arg23[%c5_508, %c0_509, %c0_510] : memref<8x1x8xf32, #tpu.memory_space<vmem>>, vector<1x1x8xf32>
    %727 = vector.shape_cast %726 : vector<1x1x8xf32> to vector<1x8xf32>
    %728 = vector.broadcast %727 : vector<1x8xf32> to vector<16x8xf32>
    %729 = arith.addf %725, %728 : vector<16x8xf32>
    %c5_511 = arith.constant 5 : index
    %c0_512 = arith.constant 0 : index
    %c0_513 = arith.constant 0 : index
    %730 = vector.load %arg24[%c5_511, %c0_512, %c0_513] : memref<8x32x8xf32, #tpu.memory_space<vmem>>, vector<1x32x8xf32>
    %731 = vector.shape_cast %730 : vector<1x32x8xf32> to vector<32x8xf32>
    %cst_514 = arith.constant dense<0.000000e+00> : vector<16x8xf32>
    %732 = tpu.matmul %31, %731, %cst_514 {dimension_numbers = #tpu.dot_dimension_numbers<[1], [0], [0], [1], [0, 0, 1, 1], [], []>} : vector<16x32xf32>, vector<32x8xf32>, vector<16x8xf32> -> vector<16x8xf32>
    %c5_515 = arith.constant 5 : index
    %c0_516 = arith.constant 0 : index
    %c0_517 = arith.constant 0 : index
    %733 = vector.load %arg25[%c5_515, %c0_516, %c0_517] : memref<8x1x8xf32, #tpu.memory_space<vmem>>, vector<1x1x8xf32>
    %734 = vector.shape_cast %733 : vector<1x1x8xf32> to vector<1x8xf32>
    %735 = vector.broadcast %734 : vector<1x8xf32> to vector<16x8xf32>
    %736 = arith.addf %732, %735 : vector<16x8xf32>
    %cst_518 = arith.constant dense<0.000000e+00> : vector<16x16xf32>
    %737 = tpu.matmul %722, %729, %cst_518 {dimension_numbers = #tpu.dot_dimension_numbers<[1], [1], [0], [0], [0, 0, 1, 0], [], []>} : vector<16x8xf32>, vector<16x8xf32>, vector<16x16xf32> -> vector<16x16xf32>
    %cst_519 = arith.constant 0.353553385 : f32
    %738 = vector.broadcast %cst_519 : f32 to vector<16x16xf32>
    %739 = arith.mulf %737, %738 : vector<16x16xf32>
    %740 = arith.addf %739, %33 : vector<16x16xf32>
    %cst_520 = arith.constant dense<0xFF800000> : vector<16xf32>
    %741 = vector.multi_reduction <maximumf>, %740, %cst_520 [1] : vector<16x16xf32> to vector<16xf32>
    %742 = vector.shape_cast %741 : vector<16xf32> to vector<16x1xf32>
    %743 = vector.broadcast %742 : vector<16x1xf32> to vector<16x16xf32>
    %744 = arith.subf %740, %743 : vector<16x16xf32>
    %745 = math.exp %744 : vector<16x16xf32>
    %cst_521 = arith.constant dense<0.000000e+00> : vector<16xf32>
    %746 = vector.multi_reduction <add>, %745, %cst_521 [1] : vector<16x16xf32> to vector<16xf32>
    %747 = vector.shape_cast %746 : vector<16xf32> to vector<16x1xf32>
    %748 = tpu.reciprocal %747 {approx = true} : vector<16x1xf32> -> vector<16x1xf32>
    %749 = vector.broadcast %748 : vector<16x1xf32> to vector<16x16xf32>
    %750 = arith.mulf %745, %749 : vector<16x16xf32>
    %cst_522 = arith.constant dense<0.000000e+00> : vector<16x8xf32>
    %751 = tpu.matmul %750, %736, %cst_522 {dimension_numbers = #tpu.dot_dimension_numbers<[1], [0], [0], [1], [0, 0, 1, 1], [], []>} : vector<16x16xf32>, vector<16x8xf32>, vector<16x8xf32> -> vector<16x8xf32>
    %c5_523 = arith.constant 5 : index
    %c0_524 = arith.constant 0 : index
    %c0_525 = arith.constant 0 : index
    %752 = vector.load %arg26[%c5_523, %c0_524, %c0_525] : memref<8x8x32xf32, #tpu.memory_space<vmem>>, vector<1x8x32xf32>
    %753 = vector.shape_cast %752 : vector<1x8x32xf32> to vector<8x32xf32>
    %cst_526 = arith.constant dense<0.000000e+00> : vector<16x32xf32>
    %754 = tpu.matmul %751, %753, %cst_526 {dimension_numbers = #tpu.dot_dimension_numbers<[1], [0], [0], [1], [0, 0, 1, 1], [], []>} : vector<16x8xf32>, vector<8x32xf32>, vector<16x32xf32> -> vector<16x32xf32>
    %755 = arith.addf %715, %754 : vector<16x32xf32>
    %c6_527 = arith.constant 6 : index
    %c0_528 = arith.constant 0 : index
    %c0_529 = arith.constant 0 : index
    %756 = vector.load %arg20[%c6_527, %c0_528, %c0_529] : memref<8x32x8xf32, #tpu.memory_space<vmem>>, vector<1x32x8xf32>
    %757 = vector.shape_cast %756 : vector<1x32x8xf32> to vector<32x8xf32>
    %cst_530 = arith.constant dense<0.000000e+00> : vector<16x8xf32>
    %758 = tpu.matmul %674, %757, %cst_530 {dimension_numbers = #tpu.dot_dimension_numbers<[1], [0], [0], [1], [0, 0, 1, 1], [], []>} : vector<16x32xf32>, vector<32x8xf32>, vector<16x8xf32> -> vector<16x8xf32>
    %c6_531 = arith.constant 6 : index
    %c0_532 = arith.constant 0 : index
    %c0_533 = arith.constant 0 : index
    %759 = vector.load %arg21[%c6_531, %c0_532, %c0_533] : memref<8x1x8xf32, #tpu.memory_space<vmem>>, vector<1x1x8xf32>
    %760 = vector.shape_cast %759 : vector<1x1x8xf32> to vector<1x8xf32>
    %761 = vector.broadcast %760 : vector<1x8xf32> to vector<16x8xf32>
    %762 = arith.addf %758, %761 : vector<16x8xf32>
    %c6_534 = arith.constant 6 : index
    %c0_535 = arith.constant 0 : index
    %c0_536 = arith.constant 0 : index
    %763 = vector.load %arg22[%c6_534, %c0_535, %c0_536] : memref<8x32x8xf32, #tpu.memory_space<vmem>>, vector<1x32x8xf32>
    %764 = vector.shape_cast %763 : vector<1x32x8xf32> to vector<32x8xf32>
    %cst_537 = arith.constant dense<0.000000e+00> : vector<16x8xf32>
    %765 = tpu.matmul %31, %764, %cst_537 {dimension_numbers = #tpu.dot_dimension_numbers<[1], [0], [0], [1], [0, 0, 1, 1], [], []>} : vector<16x32xf32>, vector<32x8xf32>, vector<16x8xf32> -> vector<16x8xf32>
    %c6_538 = arith.constant 6 : index
    %c0_539 = arith.constant 0 : index
    %c0_540 = arith.constant 0 : index
    %766 = vector.load %arg23[%c6_538, %c0_539, %c0_540] : memref<8x1x8xf32, #tpu.memory_space<vmem>>, vector<1x1x8xf32>
    %767 = vector.shape_cast %766 : vector<1x1x8xf32> to vector<1x8xf32>
    %768 = vector.broadcast %767 : vector<1x8xf32> to vector<16x8xf32>
    %769 = arith.addf %765, %768 : vector<16x8xf32>
    %c6_541 = arith.constant 6 : index
    %c0_542 = arith.constant 0 : index
    %c0_543 = arith.constant 0 : index
    %770 = vector.load %arg24[%c6_541, %c0_542, %c0_543] : memref<8x32x8xf32, #tpu.memory_space<vmem>>, vector<1x32x8xf32>
    %771 = vector.shape_cast %770 : vector<1x32x8xf32> to vector<32x8xf32>
    %cst_544 = arith.constant dense<0.000000e+00> : vector<16x8xf32>
    %772 = tpu.matmul %31, %771, %cst_544 {dimension_numbers = #tpu.dot_dimension_numbers<[1], [0], [0], [1], [0, 0, 1, 1], [], []>} : vector<16x32xf32>, vector<32x8xf32>, vector<16x8xf32> -> vector<16x8xf32>
    %c6_545 = arith.constant 6 : index
    %c0_546 = arith.constant 0 : index
    %c0_547 = arith.constant 0 : index
    %773 = vector.load %arg25[%c6_545, %c0_546, %c0_547] : memref<8x1x8xf32, #tpu.memory_space<vmem>>, vector<1x1x8xf32>
    %774 = vector.shape_cast %773 : vector<1x1x8xf32> to vector<1x8xf32>
    %775 = vector.broadcast %774 : vector<1x8xf32> to vector<16x8xf32>
    %776 = arith.addf %772, %775 : vector<16x8xf32>
    %cst_548 = arith.constant dense<0.000000e+00> : vector<16x16xf32>
    %777 = tpu.matmul %762, %769, %cst_548 {dimension_numbers = #tpu.dot_dimension_numbers<[1], [1], [0], [0], [0, 0, 1, 0], [], []>} : vector<16x8xf32>, vector<16x8xf32>, vector<16x16xf32> -> vector<16x16xf32>
    %cst_549 = arith.constant 0.353553385 : f32
    %778 = vector.broadcast %cst_549 : f32 to vector<16x16xf32>
    %779 = arith.mulf %777, %778 : vector<16x16xf32>
    %780 = arith.addf %779, %33 : vector<16x16xf32>
    %cst_550 = arith.constant dense<0xFF800000> : vector<16xf32>
    %781 = vector.multi_reduction <maximumf>, %780, %cst_550 [1] : vector<16x16xf32> to vector<16xf32>
    %782 = vector.shape_cast %781 : vector<16xf32> to vector<16x1xf32>
    %783 = vector.broadcast %782 : vector<16x1xf32> to vector<16x16xf32>
    %784 = arith.subf %780, %783 : vector<16x16xf32>
    %785 = math.exp %784 : vector<16x16xf32>
    %cst_551 = arith.constant dense<0.000000e+00> : vector<16xf32>
    %786 = vector.multi_reduction <add>, %785, %cst_551 [1] : vector<16x16xf32> to vector<16xf32>
    %787 = vector.shape_cast %786 : vector<16xf32> to vector<16x1xf32>
    %788 = tpu.reciprocal %787 {approx = true} : vector<16x1xf32> -> vector<16x1xf32>
    %789 = vector.broadcast %788 : vector<16x1xf32> to vector<16x16xf32>
    %790 = arith.mulf %785, %789 : vector<16x16xf32>
    %cst_552 = arith.constant dense<0.000000e+00> : vector<16x8xf32>
    %791 = tpu.matmul %790, %776, %cst_552 {dimension_numbers = #tpu.dot_dimension_numbers<[1], [0], [0], [1], [0, 0, 1, 1], [], []>} : vector<16x16xf32>, vector<16x8xf32>, vector<16x8xf32> -> vector<16x8xf32>
    %c6_553 = arith.constant 6 : index
    %c0_554 = arith.constant 0 : index
    %c0_555 = arith.constant 0 : index
    %792 = vector.load %arg26[%c6_553, %c0_554, %c0_555] : memref<8x8x32xf32, #tpu.memory_space<vmem>>, vector<1x8x32xf32>
    %793 = vector.shape_cast %792 : vector<1x8x32xf32> to vector<8x32xf32>
    %cst_556 = arith.constant dense<0.000000e+00> : vector<16x32xf32>
    %794 = tpu.matmul %791, %793, %cst_556 {dimension_numbers = #tpu.dot_dimension_numbers<[1], [0], [0], [1], [0, 0, 1, 1], [], []>} : vector<16x8xf32>, vector<8x32xf32>, vector<16x32xf32> -> vector<16x32xf32>
    %795 = arith.addf %755, %794 : vector<16x32xf32>
    %c7_557 = arith.constant 7 : index
    %c0_558 = arith.constant 0 : index
    %c0_559 = arith.constant 0 : index
    %796 = vector.load %arg20[%c7_557, %c0_558, %c0_559] : memref<8x32x8xf32, #tpu.memory_space<vmem>>, vector<1x32x8xf32>
    %797 = vector.shape_cast %796 : vector<1x32x8xf32> to vector<32x8xf32>
    %cst_560 = arith.constant dense<0.000000e+00> : vector<16x8xf32>
    %798 = tpu.matmul %674, %797, %cst_560 {dimension_numbers = #tpu.dot_dimension_numbers<[1], [0], [0], [1], [0, 0, 1, 1], [], []>} : vector<16x32xf32>, vector<32x8xf32>, vector<16x8xf32> -> vector<16x8xf32>
    %c7_561 = arith.constant 7 : index
    %c0_562 = arith.constant 0 : index
    %c0_563 = arith.constant 0 : index
    %799 = vector.load %arg21[%c7_561, %c0_562, %c0_563] : memref<8x1x8xf32, #tpu.memory_space<vmem>>, vector<1x1x8xf32>
    %800 = vector.shape_cast %799 : vector<1x1x8xf32> to vector<1x8xf32>
    %801 = vector.broadcast %800 : vector<1x8xf32> to vector<16x8xf32>
    %802 = arith.addf %798, %801 : vector<16x8xf32>
    %c7_564 = arith.constant 7 : index
    %c0_565 = arith.constant 0 : index
    %c0_566 = arith.constant 0 : index
    %803 = vector.load %arg22[%c7_564, %c0_565, %c0_566] : memref<8x32x8xf32, #tpu.memory_space<vmem>>, vector<1x32x8xf32>
    %804 = vector.shape_cast %803 : vector<1x32x8xf32> to vector<32x8xf32>
    %cst_567 = arith.constant dense<0.000000e+00> : vector<16x8xf32>
    %805 = tpu.matmul %31, %804, %cst_567 {dimension_numbers = #tpu.dot_dimension_numbers<[1], [0], [0], [1], [0, 0, 1, 1], [], []>} : vector<16x32xf32>, vector<32x8xf32>, vector<16x8xf32> -> vector<16x8xf32>
    %c7_568 = arith.constant 7 : index
    %c0_569 = arith.constant 0 : index
    %c0_570 = arith.constant 0 : index
    %806 = vector.load %arg23[%c7_568, %c0_569, %c0_570] : memref<8x1x8xf32, #tpu.memory_space<vmem>>, vector<1x1x8xf32>
    %807 = vector.shape_cast %806 : vector<1x1x8xf32> to vector<1x8xf32>
    %808 = vector.broadcast %807 : vector<1x8xf32> to vector<16x8xf32>
    %809 = arith.addf %805, %808 : vector<16x8xf32>
    %c7_571 = arith.constant 7 : index
    %c0_572 = arith.constant 0 : index
    %c0_573 = arith.constant 0 : index
    %810 = vector.load %arg24[%c7_571, %c0_572, %c0_573] : memref<8x32x8xf32, #tpu.memory_space<vmem>>, vector<1x32x8xf32>
    %811 = vector.shape_cast %810 : vector<1x32x8xf32> to vector<32x8xf32>
    %cst_574 = arith.constant dense<0.000000e+00> : vector<16x8xf32>
    %812 = tpu.matmul %31, %811, %cst_574 {dimension_numbers = #tpu.dot_dimension_numbers<[1], [0], [0], [1], [0, 0, 1, 1], [], []>} : vector<16x32xf32>, vector<32x8xf32>, vector<16x8xf32> -> vector<16x8xf32>
    %c7_575 = arith.constant 7 : index
    %c0_576 = arith.constant 0 : index
    %c0_577 = arith.constant 0 : index
    %813 = vector.load %arg25[%c7_575, %c0_576, %c0_577] : memref<8x1x8xf32, #tpu.memory_space<vmem>>, vector<1x1x8xf32>
    %814 = vector.shape_cast %813 : vector<1x1x8xf32> to vector<1x8xf32>
    %815 = vector.broadcast %814 : vector<1x8xf32> to vector<16x8xf32>
    %816 = arith.addf %812, %815 : vector<16x8xf32>
    %cst_578 = arith.constant dense<0.000000e+00> : vector<16x16xf32>
    %817 = tpu.matmul %802, %809, %cst_578 {dimension_numbers = #tpu.dot_dimension_numbers<[1], [1], [0], [0], [0, 0, 1, 0], [], []>} : vector<16x8xf32>, vector<16x8xf32>, vector<16x16xf32> -> vector<16x16xf32>
    %cst_579 = arith.constant 0.353553385 : f32
    %818 = vector.broadcast %cst_579 : f32 to vector<16x16xf32>
    %819 = arith.mulf %817, %818 : vector<16x16xf32>
    %820 = arith.addf %819, %33 : vector<16x16xf32>
    %cst_580 = arith.constant dense<0xFF800000> : vector<16xf32>
    %821 = vector.multi_reduction <maximumf>, %820, %cst_580 [1] : vector<16x16xf32> to vector<16xf32>
    %822 = vector.shape_cast %821 : vector<16xf32> to vector<16x1xf32>
    %823 = vector.broadcast %822 : vector<16x1xf32> to vector<16x16xf32>
    %824 = arith.subf %820, %823 : vector<16x16xf32>
    %825 = math.exp %824 : vector<16x16xf32>
    %cst_581 = arith.constant dense<0.000000e+00> : vector<16xf32>
    %826 = vector.multi_reduction <add>, %825, %cst_581 [1] : vector<16x16xf32> to vector<16xf32>
    %827 = vector.shape_cast %826 : vector<16xf32> to vector<16x1xf32>
    %828 = tpu.reciprocal %827 {approx = true} : vector<16x1xf32> -> vector<16x1xf32>
    %829 = vector.broadcast %828 : vector<16x1xf32> to vector<16x16xf32>
    %830 = arith.mulf %825, %829 : vector<16x16xf32>
    %cst_582 = arith.constant dense<0.000000e+00> : vector<16x8xf32>
    %831 = tpu.matmul %830, %816, %cst_582 {dimension_numbers = #tpu.dot_dimension_numbers<[1], [0], [0], [1], [0, 0, 1, 1], [], []>} : vector<16x16xf32>, vector<16x8xf32>, vector<16x8xf32> -> vector<16x8xf32>
    %c7_583 = arith.constant 7 : index
    %c0_584 = arith.constant 0 : index
    %c0_585 = arith.constant 0 : index
    %832 = vector.load %arg26[%c7_583, %c0_584, %c0_585] : memref<8x8x32xf32, #tpu.memory_space<vmem>>, vector<1x8x32xf32>
    %833 = vector.shape_cast %832 : vector<1x8x32xf32> to vector<8x32xf32>
    %cst_586 = arith.constant dense<0.000000e+00> : vector<16x32xf32>
    %834 = tpu.matmul %831, %833, %cst_586 {dimension_numbers = #tpu.dot_dimension_numbers<[1], [0], [0], [1], [0, 0, 1, 1], [], []>} : vector<16x8xf32>, vector<8x32xf32>, vector<16x32xf32> -> vector<16x32xf32>
    %835 = arith.addf %795, %834 : vector<16x32xf32>
    %836 = arith.addf %650, %835 : vector<16x32xf32>
    %c1_587 = arith.constant 1 : index
    %c0_588 = arith.constant 0 : index
    %c0_589 = arith.constant 0 : index
    %837 = vector.load %arg27[%c1_587, %c0_588, %c0_589] : memref<2x1x32xf32, #tpu.memory_space<vmem>>, vector<1x1x32xf32>
    %838 = vector.shape_cast %837 : vector<1x1x32xf32> to vector<1x32xf32>
    %839 = vector.broadcast %838 : vector<1x32xf32> to vector<16x32xf32>
    %840 = arith.addf %836, %839 : vector<16x32xf32>
    %c1_590 = arith.constant 1 : index
    %c0_591 = arith.constant 0 : index
    %c0_592 = arith.constant 0 : index
    %841 = vector.load %arg36[%c1_590, %c0_591, %c0_592] : memref<2x1x32xf32, #tpu.memory_space<vmem>>, vector<1x1x32xf32>
    %842 = vector.shape_cast %841 : vector<1x1x32xf32> to vector<1x32xf32>
    %c1_593 = arith.constant 1 : index
    %c0_594 = arith.constant 0 : index
    %c0_595 = arith.constant 0 : index
    %843 = vector.load %arg37[%c1_593, %c0_594, %c0_595] : memref<2x1x32xf32, #tpu.memory_space<vmem>>, vector<1x1x32xf32>
    %844 = vector.shape_cast %843 : vector<1x1x32xf32> to vector<1x32xf32>
    %cst_596 = arith.constant dense<0.000000e+00> : vector<16xf32>
    %845 = vector.multi_reduction <add>, %840, %cst_596 [1] : vector<16x32xf32> to vector<16xf32>
    %846 = vector.shape_cast %845 : vector<16xf32> to vector<16x1xf32>
    %cst_597 = arith.constant 3.200000e+01 : f32
    %847 = vector.broadcast %cst_597 : f32 to vector<16x1xf32>
    %848 = arith.divf %846, %847 : vector<16x1xf32>
    %849 = vector.broadcast %848 : vector<16x1xf32> to vector<16x32xf32>
    %850 = arith.subf %840, %849 : vector<16x32xf32>
    %851 = arith.mulf %850, %850 : vector<16x32xf32>
    %cst_598 = arith.constant dense<0.000000e+00> : vector<16xf32>
    %852 = vector.multi_reduction <add>, %851, %cst_598 [1] : vector<16x32xf32> to vector<16xf32>
    %853 = vector.shape_cast %852 : vector<16xf32> to vector<16x1xf32>
    %cst_599 = arith.constant 3.200000e+01 : f32
    %854 = vector.broadcast %cst_599 : f32 to vector<16x1xf32>
    %855 = arith.divf %853, %854 : vector<16x1xf32>
    %cst_600 = arith.constant 9.99999974E-6 : f32
    %856 = vector.broadcast %cst_600 : f32 to vector<16x1xf32>
    %857 = arith.addf %855, %856 : vector<16x1xf32>
    %858 = math.rsqrt %857 : vector<16x1xf32>
    %859 = vector.broadcast %858 : vector<16x1xf32> to vector<16x32xf32>
    %860 = arith.mulf %850, %859 : vector<16x32xf32>
    %861 = vector.broadcast %842 : vector<1x32xf32> to vector<16x32xf32>
    %862 = arith.mulf %860, %861 : vector<16x32xf32>
    %863 = vector.broadcast %844 : vector<1x32xf32> to vector<16x32xf32>
    %864 = arith.addf %862, %863 : vector<16x32xf32>
    %c1_601 = arith.constant 1 : index
    %c0_602 = arith.constant 0 : index
    %c0_603 = arith.constant 0 : index
    %865 = vector.load %arg28[%c1_601, %c0_602, %c0_603] : memref<2x32x128xf32, #tpu.memory_space<vmem>>, vector<1x32x128xf32>
    %866 = vector.shape_cast %865 : vector<1x32x128xf32> to vector<32x128xf32>
    %cst_604 = arith.constant dense<0.000000e+00> : vector<16x128xf32>
    %867 = tpu.matmul %864, %866, %cst_604 {dimension_numbers = #tpu.dot_dimension_numbers<[1], [0], [0], [1], [0, 0, 1, 1], [], []>} : vector<16x32xf32>, vector<32x128xf32>, vector<16x128xf32> -> vector<16x128xf32>
    %c1_605 = arith.constant 1 : index
    %c0_606 = arith.constant 0 : index
    %c0_607 = arith.constant 0 : index
    %868 = vector.load %arg29[%c1_605, %c0_606, %c0_607] : memref<2x1x128xf32, #tpu.memory_space<vmem>>, vector<1x1x128xf32>
    %869 = vector.shape_cast %868 : vector<1x1x128xf32> to vector<1x128xf32>
    %870 = vector.broadcast %869 : vector<1x128xf32> to vector<16x128xf32>
    %871 = arith.addf %867, %870 : vector<16x128xf32>
    %cst_608 = arith.constant 5.000000e-01 : f32
    %872 = vector.broadcast %cst_608 : f32 to vector<16x128xf32>
    %873 = arith.mulf %872, %871 : vector<16x128xf32>
    %cst_609 = arith.constant 0.707106769 : f32
    %874 = vector.broadcast %cst_609 : f32 to vector<16x128xf32>
    %875 = arith.mulf %871, %874 : vector<16x128xf32>
    %876 = math.erf %875 : vector<16x128xf32>
    %cst_610 = arith.constant 1.000000e+00 : f32
    %877 = vector.broadcast %cst_610 : f32 to vector<16x128xf32>
    %878 = arith.addf %877, %876 : vector<16x128xf32>
    %879 = arith.mulf %873, %878 : vector<16x128xf32>
    %c1_611 = arith.constant 1 : index
    %c0_612 = arith.constant 0 : index
    %c0_613 = arith.constant 0 : index
    %880 = vector.load %arg30[%c1_611, %c0_612, %c0_613] : memref<2x128x32xf32, #tpu.memory_space<vmem>>, vector<1x128x32xf32>
    %881 = vector.shape_cast %880 : vector<1x128x32xf32> to vector<128x32xf32>
    %cst_614 = arith.constant dense<0.000000e+00> : vector<16x32xf32>
    %882 = tpu.matmul %879, %881, %cst_614 {dimension_numbers = #tpu.dot_dimension_numbers<[1], [0], [0], [1], [0, 0, 1, 1], [], []>} : vector<16x128xf32>, vector<128x32xf32>, vector<16x32xf32> -> vector<16x32xf32>
    %883 = arith.addf %840, %882 : vector<16x32xf32>
    %c1_615 = arith.constant 1 : index
    %c0_616 = arith.constant 0 : index
    %c0_617 = arith.constant 0 : index
    %884 = vector.load %arg31[%c1_615, %c0_616, %c0_617] : memref<2x1x32xf32, #tpu.memory_space<vmem>>, vector<1x1x32xf32>
    %885 = vector.shape_cast %884 : vector<1x1x32xf32> to vector<1x32xf32>
    %886 = vector.broadcast %885 : vector<1x32xf32> to vector<16x32xf32>
    %887 = arith.addf %883, %886 : vector<16x32xf32>
    %c0_618 = arith.constant 0 : index
    %c0_619 = arith.constant 0 : index
    %888 = vector.load %arg38[%c0_618, %c0_619] : memref<1x32xf32, #tpu.memory_space<vmem>>, vector<1x32xf32>
    %c0_620 = arith.constant 0 : index
    %c0_621 = arith.constant 0 : index
    %889 = vector.load %arg39[%c0_620, %c0_621] : memref<1x32xf32, #tpu.memory_space<vmem>>, vector<1x32xf32>
    %cst_622 = arith.constant dense<0.000000e+00> : vector<16xf32>
    %890 = vector.multi_reduction <add>, %887, %cst_622 [1] : vector<16x32xf32> to vector<16xf32>
    %891 = vector.shape_cast %890 : vector<16xf32> to vector<16x1xf32>
    %cst_623 = arith.constant 3.200000e+01 : f32
    %892 = vector.broadcast %cst_623 : f32 to vector<16x1xf32>
    %893 = arith.divf %891, %892 : vector<16x1xf32>
    %894 = vector.broadcast %893 : vector<16x1xf32> to vector<16x32xf32>
    %895 = arith.subf %887, %894 : vector<16x32xf32>
    %896 = arith.mulf %895, %895 : vector<16x32xf32>
    %cst_624 = arith.constant dense<0.000000e+00> : vector<16xf32>
    %897 = vector.multi_reduction <add>, %896, %cst_624 [1] : vector<16x32xf32> to vector<16xf32>
    %898 = vector.shape_cast %897 : vector<16xf32> to vector<16x1xf32>
    %cst_625 = arith.constant 3.200000e+01 : f32
    %899 = vector.broadcast %cst_625 : f32 to vector<16x1xf32>
    %900 = arith.divf %898, %899 : vector<16x1xf32>
    %cst_626 = arith.constant 9.99999974E-6 : f32
    %901 = vector.broadcast %cst_626 : f32 to vector<16x1xf32>
    %902 = arith.addf %900, %901 : vector<16x1xf32>
    %903 = math.rsqrt %902 : vector<16x1xf32>
    %904 = vector.broadcast %903 : vector<16x1xf32> to vector<16x32xf32>
    %905 = arith.mulf %895, %904 : vector<16x32xf32>
    %906 = vector.broadcast %888 : vector<1x32xf32> to vector<16x32xf32>
    %907 = arith.mulf %905, %906 : vector<16x32xf32>
    %908 = vector.broadcast %889 : vector<1x32xf32> to vector<16x32xf32>
    %909 = arith.addf %907, %908 : vector<16x32xf32>
    %c0_627 = arith.constant 0 : index
    %c0_628 = arith.constant 0 : index
    %910 = vector.load %arg40[%c0_627, %c0_628] : memref<32x12xf32, #tpu.memory_space<vmem>>, vector<32x12xf32>
    %cst_629 = arith.constant dense<0.000000e+00> : vector<16x12xf32>
    %911 = tpu.matmul %909, %910, %cst_629 {dimension_numbers = #tpu.dot_dimension_numbers<[1], [0], [0], [1], [0, 0, 1, 1], [], []>} : vector<16x32xf32>, vector<32x12xf32>, vector<16x12xf32> -> vector<16x12xf32>
    %c0_630 = arith.constant 0 : index
    %c0_631 = arith.constant 0 : index
    %912 = vector.load %arg41[%c0_630, %c0_631] : memref<1x12xf32, #tpu.memory_space<vmem>>, vector<1x12xf32>
    %913 = vector.broadcast %912 : vector<1x12xf32> to vector<16x12xf32>
    %914 = arith.addf %911, %913 : vector<16x12xf32>
    %c0_632 = arith.constant 0 : index
    %c0_633 = arith.constant 0 : index
    %915 = vector.load %arg42[%c0_632, %c0_633] : memref<16x12xf32, #tpu.memory_space<vmem>>, vector<16x12xf32>
    tpu.vector_store %arg42[%c0_632, %c0_633], %914 {strides = array<i32>} : memref<16x12xf32, #tpu.memory_space<vmem>>, vector<16x12xf32>,
    return
  }
}

</mosaic_0001>

<bundles_post_ra>
// kernel: _lambda_.1
= control target key start
LH: loop header
LB: loop body
LE: loop exit
PB: predicated region body
PF: predicated region fallthrough
CT: control target
= control target key end

     0   :  { %s13243_s6 = smov 1   ;;  %s13244_s10 = smov 2   ;;  %s14497_s0 = inlined_call_operand.smem [shape: u32[43], index: -1, kind: input, shape index: {}] }
   0x1   :  { %s13296_s5 = sld [smem:[%s14497_s0]]   ;;  %s13245_s14 = smov 3  }
   0x2   :  { %s13301_s9 = sld [smem:[%s14497_s0 + %s13243_s6]]   ;;  %s13246_s18 = smov 4  }
   0x3   :  { %s13306_s13 = sld [smem:[%s14497_s0 + %s13244_s10]]   ;;  %s13247_s22 = smov 5  }
   0x4   :  { %s13311_s17 = sld [smem:[%s14497_s0 + %s13245_s14]]   ;;  %s13248_s26 = smov 6  }
   0x5   :  { %s13316_s21 = sld [smem:[%s14497_s0 + %s13246_s18]]   ;;  %s13249_s30 = smov 7  }
   0x6   :  { %s13321_s25 = sld [smem:[%s14497_s0 + %s13247_s22]]   ;;  %s13250_s4 = smov 8  }
   0x7   :  { %s13326_s29 = sld [smem:[%s14497_s0 + %s13248_s26]]   ;;  %s13251_s10 = smov 9  }
   0x8   :  { %s13331_s3 = sld [smem:[%s14497_s0 + %s13249_s30]]   ;;  %s13252_s15 = smov 10  }
   0x9   :  { %s13336_s8 = sld [smem:[%s14497_s0 + %s13250_s4]]   ;;  %s13253_s20 = smov 11  }
   0xa   :  { %s13341_s14 = sld [smem:[%s14497_s0 + %s13251_s10]]   ;;  %s13254_s26 = smov 12  }
   0xb   :  { %14522 = sst [smem:[#allocation5_spill]] %s13316_s21  ;;  %s13255_s1 = smov 13  }
   0xc   :  { %14523 = sst [smem:[#allocation6_spill]] %s13321_s25  ;;  %s13256_s7 = smov 14  }
   0xd   :  { %s13346_s19 = sld [smem:[%s14497_s0 + %s13252_s15]]   ;;  %s13257_s15 = smov 15  }
   0xe   :  { %s13351_s24 = sld [smem:[%s14497_s0 + %s13253_s20]]   ;;  %s13258_s22 = smov 16  }
   0xf   :  { %s13356_s30 = sld [smem:[%s14497_s0 + %s13254_s26]]   ;;  %s13259_s28 = smov 17  }
  0x10   :  { %s13361_s6 = sld [smem:[%s14497_s0 + %s13255_s1]]  }
  0x11   :  { %s13366_s12 = sld [smem:[%s14497_s0 + %s13256_s7]]   ;;  %s13260_s7 = smov 18  }
  0x12   :  { %s13371_s20 = sld [smem:[%s14497_s0 + %s13257_s15]]   ;;  %s13261_s15 = smov 19  }
  0x13   :  { %s13376_s27 = sld [smem:[%s14497_s0 + %s13258_s22]]   ;;  %s13262_s22 = smov 20  }
  0x14   :  { %14524 = sst [smem:[#allocation7_spill]] %s13351_s24 }
  0x15   :  { %s13381_s4 = sld [smem:[%s14497_s0 + %s13259_s28]]   ;;  %s13263_s28 = smov 21  }
  0x16   :  { %14525 = sst [smem:[#allocation8_spill]] %s13361_s6 }
  0x17   :  { %s13386_s25 = sld [smem:[%s14497_s0 + %s13260_s7]]   ;;  %s13264_s7 = smov 22  }
  0x18   :  { %14526 = sst [smem:[#allocation9_spill]] %s13371_s20 }
  0x19   :  { %s13391_s24 = sld [smem:[%s14497_s0 + %s13261_s15]]   ;;  %s13265_s15 = smov 23  }
  0x1a   :  { %s13396_s21 = sld [smem:[%s14497_s0 + %s13262_s22]]   ;;  %s13266_s22 = smov 24  }
  0x1b   :  { %14527 = sst [smem:[#allocation10_spill]] %s13381_s4 }
  0x1c   :  { %s13401_s4 = sld [smem:[%s14497_s0 + %s13263_s28]]   ;;  %s13267_s28 = smov 25  }
  0x1d   :  { %14528 = sst [smem:[#allocation11_spill]] %s13386_s25 }
  0x1e   :  { %s13406_s25 = sld [smem:[%s14497_s0 + %s13264_s7]]   ;;  %s13268_s7 = smov 26  }
  0x1f   :  { %14529 = sst [smem:[#allocation12_spill]] %s13391_s24 }
  0x20   :  { %14530 = sst [smem:[#allocation13_spill]] %s13396_s21 }
  0x21   :  { %s13411_s24 = sld [smem:[%s14497_s0 + %s13265_s15]]   ;;  %s13269_s15 = smov 27  }
  0x22   :  { %14531 = sst [smem:[#allocation14_spill]] %s13401_s4 }
  0x23   :  { %s13416_s21 = sld [smem:[%s14497_s0 + %s13266_s22]]   ;;  %s13270_s22 = smov 28  }
  0x24   :  { %14532 = sst [smem:[#allocation15_spill]] %s13406_s25 }
  0x25   :  { %s13421_s4 = sld [smem:[%s14497_s0 + %s13267_s28]]   ;;  %s13271_s28 = smov 29  }
  0x26   :  { %s13426_s25 = sld [smem:[%s14497_s0 + %s13268_s7]]   ;;  %s13272_s7 = smov 30  }
  0x27   :  { %14533 = sst [smem:[#allocation16_spill]] %s13411_s24 }
  0x28   :  { %s13431_s24 = sld [smem:[%s14497_s0 + %s13269_s15]]   ;;  %s13273_s15 = smov 31  }
  0x29   :  { %14534 = sst [smem:[#allocation17_spill]] %s13416_s21 }
  0x2a   :  { %s13436_s21 = sld [smem:[%s14497_s0 + %s13270_s22]]   ;;  %s13274_s22 = smov 32  }
  0x2b   :  { %14535 = sst [smem:[#allocation18_spill]] %s13421_s4 }
  0x2c   :  { %14536 = sst [smem:[#allocation19_spill]] %s13426_s25 }
  0x2d   :  { %s13441_s4 = sld [smem:[%s14497_s0 + %s13271_s28]]   ;;  %s13275_s28 = smov 33  }
  0x2e   :  { %14537 = sst [smem:[#allocation20_spill]] %s13431_s24 }
  0x2f   :  { %s13446_s25 = sld [smem:[%s14497_s0 + %s13272_s7]]   ;;  %s13276_s7 = smov 34  }
  0x30   :  { %14538 = sst [smem:[#allocation21_spill]] %s13436_s21 }
  0x31   :  { %s13451_s24 = sld [smem:[%s14497_s0 + %s13273_s15]]   ;;  %s13277_s15 = smov 35  }
  0x32   :  { %s13456_s21 = sld [smem:[%s14497_s0 + %s13274_s22]]   ;;  %s13278_s22 = smov 36  }
  0x33   :  { %14539 = sst [smem:[#allocation22_spill]] %s13441_s4 }
  0x34   :  { %s13461_s4 = sld [smem:[%s14497_s0 + %s13275_s28]]   ;;  %s13279_s28 = smov 37  }
  0x35   :  { %14540 = sst [smem:[#allocation23_spill]] %s13446_s25 }
  0x36   :  { %s13466_s25 = sld [smem:[%s14497_s0 + %s13276_s7]]   ;;  %s13280_s7 = smov 38  }
  0x37   :  { %14541 = sst [smem:[#allocation24_spill]] %s13451_s24 }
  0x38   :  { %s13471_s24 = sld [smem:[%s14497_s0 + %s13277_s15]]   ;;  %s13281_s15 = smov 39  }
  0x39   :  { %s13476_s20 = sld [smem:[%s14497_s0 + %s13278_s22]]   ;;  %s13282_s22 = smov 40  }
  0x3a   :  { %s13481_s6 = sld [smem:[%s14497_s0 + %s13279_s28]]   ;;  %s13283_s28 = smov 41  }
  0x3c   :  { %14542 = sst [smem:[#allocation25_spill]] %s13466_s25 }
  0x3d   :  { %s13486_s25 = sld [smem:[%s14497_s0 + %s13280_s7]]   ;;  %s13284_s7 = smov 42  }
  0x3e   :  { %14543 = sst [smem:[#allocation26_spill]] %s13471_s24 }
  0x3f   :  { %14544 = sst [smem:[#allocation27_spill]] %s13476_s20 }
  0x40   :  { %14545 = sst [smem:[#allocation28_spill]] %s13481_s6 }
  0x41   :  { %s13491_s24 = sld [smem:[%s14497_s0 + %s13281_s15]]  }
  0x42   :  { %s13496_s20 = sld [smem:[%s14497_s0 + %s13282_s22]]  }
  0x43   :  { %14546 = sst [smem:[#allocation29_spill]] %s13486_s25 }
  0x44   :  { %s13501_s6 = sld [smem:[%s14497_s0 + %s13283_s28]]  }
  0x45   :  { %s13506_s25 = sld [smem:[%s14497_s0 + %s13284_s7]]  }
  0x4b   :  { %14547 = sst [smem:[#allocation30_spill]] %s13506_s25 }
  0x4c   :  { %v177_v0 = vld [vmem:[%s13326_s29] sm:$0xff]  ;;  %v178_v1 = vld [vmem:[%s13326_s29 + $0x8] sm:$0xff]  ;;  %vm181_vm0 = vcmask 130048  }
  0x4d   :  { %v175_v2 = vld [vmem:[%s13296_s5] sm:$0xff]  ;;  %v12290_v3 = vpack.c.bf16 %v178_v1, %v177_v0 }
  0x4e   :  { %11299 = vmatprep.mubr.msk.f32.mxu1 %vm181_vm0, %v175_v2 }
  0x4f   :  { %90 = vsyncpa [#allocation3], 0  ;;  %12291 = vmatprep.subr.bf16.mxu1 %v12290_v3  ;;  %v176_v4 = vld [vmem:[%s13296_s5 + $0x8] sm:$0xff]  ;;  %v265_v5 = vld [vmem:[%s13331_s3] sm:$0xff]  ;;  %vm361_vm1 = vcmask 261120   ;;  %s14548_s0 = sld [smem:[#allocation8_spill]] }
  0x50   :  { %12293 = vmatpush3.bf16.msra.mxu1 %v12290_v3  ;;  %v266_v6 = vld [vmem:[%s13331_s3 + $0x8] sm:$0xff]  ;;  %v263_v7 = vld [vmem:[%s13301_s9] sm:$0xff]  ;;  %v352_v21 = vld [vmem:[%s13336_s8 + $0x10] sm:$0xff]  ;;  %s14549_s5 = sld [smem:[#allocation9_spill]]  ;;  %vm876_vm2 = vcmask 64512   ;;  %s14555_s29 = sld [smem:[#allocation15_spill]] }
  0x51   :  { %v12294_v8 = vpack.c.bf16 %v266_v6, %v265_v5  ;;  %v264_v9 = vld [vmem:[%s13301_s9 + $0x8] sm:$0xff]  ;;  %v179_v10 = vld [vmem:[%s13306_s13] sm:$0xff]  ;;  %v353_v22 = vld [vmem:[%s13336_s8 + $0x18] sm:$0xff]  ;;  %s14550_s9 = sld [smem:[#allocation10_spill]]  ;;  %s14556_s3 = sld [smem:[#allocation7_spill]]  ;;  %vm10121_vm4 = vcmask 97280  }
  0x52   :  { %v180_v12 = vld [vmem:[%s13306_s13 + $0x8] sm:$0xff]  ;;  %v350_v18 = vld [vmem:[%s13336_s8] sm:$0xff]  ;;  %v12302_v23 = vpack.c.bf16 %v353_v22, %v352_v21  ;;  %v614_v43 = vld [vmem:[%s13356_s30 + $0x10] sm:$0xff]  ;;  %s14553_s13 = sld [smem:[#allocation5_spill]]  ;;  %s14560_s15 = sld [smem:[#allocation17_spill]] }
  0x53   :  { %11300 = vmatmul.mubr.msk.f32.vlgmr.msra.gmra.mrb[0].mxu1 %vm181_vm0, %v176_v4  ;;  %12295 = vmatprep.subr.bf16.mxu1 %v12294_v8  ;;  %v351_v19 = vld [vmem:[%s13336_s8 + $0x8] sm:$0xff]  ;;  %v267_v25 = vld [vmem:[%s13311_s17] sm:$0xff]  ;;  %v615_v44 = vld [vmem:[%s13356_s30 + $0x18] sm:$0xff]  ;;  %s14557_s8 = sld [smem:[#allocation12_spill]]  ;;  %s14561_s16 = sld [smem:[#allocation25_spill]] }
  0x54   :  { %11306 = vmatprep.mubr.msk.f32.mxu1 %vm181_vm0, %v263_v7  ;;  %12297 = vmatpush3.bf16.msra.mxu1 %v12294_v8  ;;  %v12298_v20 = vpack.c.bf16 %v351_v19, %v350_v18  ;;  %v268_v24 = vld [vmem:[%s13311_s17 + $0x8] sm:$0xff]  ;;  %v612_v40 = vld [vmem:[%s13356_s30] sm:$0xff]  ;;  %v12342_v45 = vpack.c.bf16 %v615_v44, %v614_v43  ;;  %v467_v51 = vld [vmem:[%s13346_s19 + $0x10] sm:$0xff]  ;;  %s14554_s17 = sld [smem:[#allocation11_spill]]  ;;  %s14562_s18 = sld [smem:[#allocation26_spill]] }
  0x55   :  { %v613_v41 = vld [vmem:[%s13356_s30 + $0x8] sm:$0xff]  ;;  %v704_v46 = vld [vmem:[%s13366_s12] sm:$0xff]  ;;  %v468_v53 = vld [vmem:[%s13346_s19 + $0x18] sm:$0xff]  ;;  %s14563_s22 = sld [smem:[#allocation14_spill]]  ;;  %s14564_s23 = sld [smem:[#allocation18_spill]] }
  0x56   :  { %12299 = vmatprep.subr.bf16.mxu1 %v12298_v20  ;;  %v12338_v42 = vpack.c.bf16 %v613_v41, %v612_v40  ;;  %v705_v47 = vld [vmem:[%s13366_s12 + $0x8] sm:$0xff]  ;;  %v465_v49 = vld [vmem:[%s13346_s19] sm:$0xff]  ;;  %v12310_v54 = vpack.c.bf16 %v468_v53, %v467_v51  ;;  %v793_v21 = vld [vmem:[%s13376_s27 + $0x18] sm:$0xff]  ;;  %s14565_s26 = sld [smem:[#allocation6_spill]]  ;;  %s14566_s28 = sld [smem:[#allocation19_spill]] }
  0x57   :  { %11307 = vmatmul.mubr.msk.f32.vlgmr.msra.gmra.mrb[2].mxu1 %vm181_vm0, %v264_v9  ;;  %v12346_v48 = vpack.c.bf16 %v705_v47, %v704_v46  ;;  %v466_v50 = vld [vmem:[%s13346_s19 + $0x8] sm:$0xff]  ;;  %v469_v55 = vld [vmem:[%s13346_s19 + $0x20] sm:$0xff]  ;;  %v706_v9 = vld [vmem:[%s13366_s12 + $0x10] sm:$0xff]  ;;  %s14567_s1 = sld [smem:[#allocation20_spill]]  ;;  %s14568_s2 = sld [smem:[#allocation21_spill]] }
  0x58   :  { %12301 = vmatpush3.bf16.msra.mxu1 %v12298_v20  ;;  %12339 = vmatprep.subr.bf16.mxu0 %v12338_v42  ;;  %v12306_v52 = vpack.c.bf16 %v466_v50, %v465_v49  ;;  %v470_v56 = vld [vmem:[%s13346_s19 + $0x28] sm:$0xff]  ;;  %v10190_v1 = vld [vmem:[%s13456_s21] ss:$0 sm:$0xff]  ;;  %v792_v20 = vld [vmem:[%s13376_s27 + $0x10] sm:$0xff]  ;;  %s14569_s7 = sld [smem:[#allocation23_spill]]  ;;  %s14570_s10 = sld [smem:[#allocation27_spill]] }
  0x59   :  { %12303 = vmatprep.subr.bf16.mxu1 %v12302_v23  ;;  %12341 = vmatpush3.bf16.msra.mxu0 %v12338_v42  ;;  %v12314_v57 = vpack.c.bf16 %v470_v56, %v469_v55  ;;  %v10191_v3 = vld [vmem:[%s13461_s4] ss:$0 sm:$0xff]  ;;  %v791_v18 = vld [vmem:[%s13376_s27 + $0x8] sm:$0xff]  ;;  %v12358_v22 = vpack.c.bf16 %v793_v21, %v792_v20  ;;  %v471_v42 = vld [vmem:[%s13346_s19 + $0x30] sm:$0xff]  ;;  %s14571_s11 = sld [smem:[#allocation28_spill]]  ;;  %s14573_s25 = sld [smem:[#allocation24_spill]] }
  0x5a   :  { %12343 = vmatprep.subr.bf16.mxu0 %v12342_v45  ;;  %v472_v43 = vld [vmem:[%s13346_s19 + $0x38] sm:$0xff]  ;;  %v473_v47 = vld [vmem:[%s13346_s19 + $0x40] sm:$0xff]  ;;  %v475_v50 = vld [vmem:[%s13346_s19 + $0x50] sm:$0xff] }
  0x5b   :  { %v12318_v44 = vpack.c.bf16 %v472_v43, %v471_v42  ;;  %v476_v51 = vld [vmem:[%s13346_s19 + $0x58] sm:$0xff]  ;;  %v477_v53 = vld [vmem:[%s13346_s19 + $0x60] sm:$0xff]  ;;  %v479_v56 = vld [vmem:[%s13346_s19 + $0x70] sm:$0xff] }
  0x5c   :  { %12305 = vmatpush3.bf16.msra.mxu1 %v12302_v23  ;;  %v10186_v23 = vld [vmem:[%s13341_s14] ss:$0 sm:$0xff]  ;;  %vm13596_vm3 = vmpackc.low %vm876_vm2, %vm876_vm2  ;;  %v10217_v21 = vld [vmem:[%s13366_s12 + $0x30] sm:$0xff]  ;;  %s14558_s14 = sld [smem:[#allocation16_spill]] }
  0x5d   :  { %12345 = vmatpush3.bf16.msra.mxu0 %v12342_v45  ;;  %12307 = vmatprep.subr.bf16.mxu1 %v12306_v52 }
  0x5e   :  { %12347 = vmatprep.subr.bf16.mxu0 %v12346_v48 }
 0x126   :  { %v11301_v11 = vpop.f32.mrb[0].mxu1 }
 0x127   :  { %v254_v13 = vpop.f32.mrb[1].mxu1  ;;  %v13524_v15 = vadd.f32 %v11301_v11, %v180_v12 }
 0x128   :  { %v13522_v14 = vadd.f32 %v254_v13, %v179_v10  ;;  %v707_v10 = vld [vmem:[%s13366_s12 + $0x18] sm:$0xff] }
 0x129   :  { %v572_v17 = vsel %vm361_vm1, %v13524_v15, 0.0 }
 0x12a   :  { %v569_v16 = vsel %vm361_vm1, %v13522_v14, 0.0  ;;  %v11308_v26 = vpop.f32.mrb[2].mxu1 }
 0x12b   :  { %570 = vadd.xlane.f32.xlu0 %v569_v16  ;;  %v347_v27 = vadd.f32 %v11308_v26, %v268_v24  ;;  %v341_v28 = vpop.f32.mrb[3].mxu1  ;;  %v12350_v16 = vpack.c.bf16 %v707_v10, %v706_v9  ;;  %v10216_v9 = vld [vmem:[%s13366_s12 + $0x28] sm:$0xff] }
 0x12c   :  { %v342_v29 = vadd.f32 %v341_v28, %v267_v25 }
 0x12e   :  { %11317 = vmatprep.mubr.msk.f32.mxu1 %vm361_vm1, %v342_v29 }
 0x12f   :  { %573 = vadd.xlane.f32.xlu0 %v572_v17  ;;  %11318 = vmatmul.mubr.msk.f32.vlgmr.msra.gmra.mrb[4].mxu1 %vm361_vm1, %v347_v27  ;;  %v790_v17 = vld [vmem:[%s13376_s27] sm:$0xff] }
 0x130   :  { %12309 = vmatpush3.bf16.msra.mxu1 %v12306_v52  ;;  %v12354_v19 = vpack.c.bf16 %v791_v18, %v790_v17  ;;  %v12326_v52 = vpack.c.bf16 %v476_v51, %v475_v50  ;;  %v10198_v17 = vld [vmem:[%s14550_s9] ss:$0 sm:$0xff] }
 0x131   :  { %12311 = vmatprep.subr.bf16.mxu1 %v12310_v54 }
 0x134   :  { %12313 = vmatpush3.bf16.msra.mxu1 %v12310_v54  ;;  %v478_v54 = vld [vmem:[%s13346_s19 + $0x68] sm:$0xff] }
 0x135   :  { %12315 = vmatprep.subr.bf16.mxu1 %v12314_v57  ;;  %v12330_v55 = vpack.c.bf16 %v478_v54, %v477_v53  ;;  %v10207_v53 = vld [vmem:[%s13356_s30 + $0x20] sm:$0xff]  ;;  %v10208_v54 = vld [vmem:[%s13356_s30 + $0x28] sm:$0xff] }
 0x138   :  { %12317 = vmatpush3.bf16.msra.mxu1 %v12314_v57  ;;  %v480_v57 = vld [vmem:[%s13346_s19 + $0x78] sm:$0xff] }
 0x139   :  { %12319 = vmatprep.subr.bf16.mxu1 %v12318_v44 }
 0x13c   :  { %12321 = vmatpush3.bf16.msra.mxu1 %v12318_v44 }
 0x1b8   :  { %v571_v30 = vpop.xlane.xlu0 %570 }
 0x1b9   :  { %v576_v31 = vmul.f32 0.03125, %v571_v30 }
 0x1bb   :  { %v578_v32 = vsub.f32 %v13522_v14, %v576_v31 }
 0x1bc   :  { %v574_v33 = vpop.xlane.xlu0 %573 }
 0x1bd   :  { %v577_v34 = vmul.f32 0.03125, %v574_v33  ;;  %v580_v35 = vmul.f32 %v578_v32, %v578_v32 }
 0x1bf   :  { %v579_v36 = vsub.f32 %v13524_v15, %v577_v34  ;;  %v582_v37 = vsel %vm361_vm1, %v580_v35, 0.0 }
 0x1c0   :  { %583 = vadd.xlane.f32.xlu1 %v582_v37 }
 0x1c1   :  { %v581_v38 = vmul.f32 %v579_v36, %v579_v36 }
 0x1c3   :  { %v585_v39 = vsel %vm361_vm1, %v581_v38, 0.0 }
 0x1c4   :  { %586 = vadd.xlane.f32.xlu1 %v585_v39 }
 0x202   :  { %v11319_v8 = vpop.f32.mrb[4].mxu1 }
 0x203   :  { %v434_v11 = vpop.f32.mrb[5].mxu1  ;;  %v440_v24 = vadd.f32 %v11319_v8, %v10186_v23  ;;  %v10215_v8 = vld [vmem:[%s13366_s12 + $0x20] sm:$0xff] }
 0x204   :  { %v435_v25 = vadd.f32 %v10186_v23, %v434_v11 }
 0x205   :  { %v446_v26 = vand.u32 2147483647, %v440_v24  ;;  %v444_v38 = vmax.f32 %v440_v24, 0.0 }
 0x206   :  { %v445_v27 = vand.u32 2147483647, %v435_v25  ;;  %v443_v40 = vmax.f32 %v435_v25, 0.0 }
 0x207   :  { %v448_v28 = vsub.f32 0.0, %v446_v26 }
 0x208   :  { %v447_v29 = vsub.f32 0.0, %v445_v27 }
 0x209   :  { %v451_v30 = vmul.f32 1.442695, %v448_v28  ;;  %v13613_v28 = vld [vmem:[%s14553_s13 + $0x8] sm:$0xff] }
 0x20a   :  { %v449_v31 = vmul.f32 1.442695, %v447_v29 }
 0x24d   :  { %v584_v58 = vpop.xlane.xlu1 %583 }
 0x24e   :  { %v588_v59 = vmul.f32 0.03125, %v584_v58 }
 0x250   :  { %v590_v60 = vadd.f32 1e-05, %v588_v59  ;;  %v12334_v59 = vpack.c.bf16 %v480_v57, %v479_v56 }
 0x251   :  { %v587_v61 = vpop.xlane.xlu1 %586 }
 0x252   :  { %13039 = vrsqrt.f32 %v590_v60  ;;  %v589_v62 = vmul.f32 0.03125, %v587_v61 }
 0x254   :  { %v591_v63 = vadd.f32 1e-05, %v589_v62 }
 0x256   :  { %13041 = vrsqrt.f32 %v591_v63  ;;  %v10192_v63 = vld [vmem:[%s14548_s0] ss:$0 sm:$0xff] }
 0x257   :  { %13043 = vpow2.f32 %v451_v30 }
 0x258   :  { %13045 = vpow2.f32 %v449_v31  ;;  %v13616_v31 = vld [vmem:[%s14553_s13] sm:$0xff] }
 0x25c   :  { %v13040_v0 = vpop.eup %13039 }
 0x25d   :  { %v594_v2 = vmul.f32 %v13040_v0, %v578_v32 }
 0x25f   :  { %v602_v4 = vmul.f32 %v10190_v1, %v594_v2 }
 0x260   :  { %v13042_v5 = vpop.eup %13041 }
 0x261   :  { %v13556_v6 = vadd.f32 %v10191_v3, %v602_v4  ;;  %v595_v7 = vmul.f32 %v13042_v5, %v579_v36  ;;  %v13044_v32 = vpop.eup %13043 }
 0x262   :  { %v13046_v33 = vpop.eup %13045  ;;  %v454_v34 = vadd.f32 1.0, %v13044_v32 }
 0x263   :  { %v603_v12 = vmul.f32 %v10190_v1, %v595_v7  ;;  %11363 = vmatprep.mubr.msk.f32.mxu0 %vm361_vm1, %v13556_v6  ;;  %v453_v35 = vadd.f32 1.0, %v13046_v33 }
 0x264   :  { %13047 = vlog2.f32 %v454_v34 }
 0x265   :  { %v13562_v13 = vadd.f32 %v10191_v3, %v603_v12  ;;  %13049 = vlog2.f32 %v453_v35  ;;  %v10195_v3 = vld [vmem:[%s14549_s5] ss:$0 sm:$0xff] }
 0x267   :  { %11364 = vmatmul.mubr.msk.f32.vlgmr.msra.gmra.mrb[0].mxu0 %vm361_vm1, %v13562_v13 }
 0x268   :  { %12349 = vmatpush3.bf16.msra.mxu0 %v12346_v48  ;;  %11374 = vmatprep.mubr.msk.f32.mxu0 %vm361_vm1, %v13556_v6  ;;  %v474_v48 = vld [vmem:[%s13346_s19 + $0x48] sm:$0xff]  ;;  %s14559_s19 = sld [smem:[#allocation13_spill]] }
 0x269   :  { %12351 = vmatprep.subr.bf16.mxu0 %v12350_v16  ;;  %v12322_v49 = vpack.c.bf16 %v474_v48, %v473_v47 }
 0x26b   :  { %12323 = vmatprep.subr.bf16.mxu1 %v12322_v49 }
 0x26c   :  { %12353 = vmatpush3.bf16.msra.mxu0 %v12350_v16  ;;  %12325 = vmatpush3.bf16.msra.mxu1 %v12322_v49  ;;  %v12380_v16 = vpack.c.bf16 %v10216_v9, %v10215_v8  ;;  %v10226_v8 = vld [vmem:[%s13376_s27 + $0x38] sm:$0xff] }
 0x26d   :  { %12355 = vmatprep.subr.bf16.mxu0 %v12354_v19  ;;  %12327 = vmatprep.subr.bf16.mxu1 %v12326_v52 }
 0x26e   :  { %v13048_v36 = vpop.eup %13047 }
 0x26f   :  { %11375 = vmatmul.mubr.msk.f32.vlgmr.msra.gmra.mrb[2].mxu0 %vm361_vm1, %v13562_v13  ;;  %v13050_v37 = vpop.eup %13049  ;;  %v458_v39 = vmul.f32 0.6931472, %v13048_v36 }
 0x270   :  { %12357 = vmatpush3.bf16.msra.mxu0 %v12354_v19  ;;  %11385 = vmatprep.mubr.msk.f32.mxu0 %vm361_vm1, %v13556_v6  ;;  %v456_v41 = vmul.f32 0.6931472, %v13050_v37  ;;  %v10220_v37 = vld [vmem:[%s14549_s5 + $0x1] ss:$0 sm:$0xff] }
 0x271   :  { %12359 = vmatprep.subr.bf16.mxu0 %v12358_v22  ;;  %v460_v45 = vadd.f32 %v458_v39, %v444_v38  ;;  %12329 = vmatpush3.bf16.msra.mxu1 %v12326_v52 }
 0x272   :  { %v459_v46 = vadd.f32 %v456_v41, %v443_v40  ;;  %12331 = vmatprep.subr.bf16.mxu1 %v12330_v55 }
 0x273   :  { %13051 = vtanh.f32 %v460_v45 }
 0x274   :  { %12361 = vmatpush3.bf16.msra.mxu0 %v12358_v22  ;;  %13053 = vtanh.f32 %v459_v46  ;;  %v10218_v22 = vld [vmem:[%s13366_s12 + $0x38] sm:$0xff] }
 0x275   :  { %12333 = vmatpush3.bf16.msra.mxu1 %v12330_v55  ;;  %v12384_v26 = vpack.c.bf16 %v10218_v22, %v10217_v21  ;;  %v12372_v55 = vpack.c.bf16 %v10208_v54, %v10207_v53  ;;  %v10228_v21 = vld [vmem:[%s14550_s9 + $0x1] ss:$0 sm:$0xff]  ;;  %v10244_v54 = vld [vmem:[%s13356_s30 + $0x50] sm:$0xff] }
 0x276   :  { %12335 = vmatprep.subr.bf16.mxu1 %v12334_v59 }
 0x277   :  { %11386 = vmatmul.mubr.msk.f32.vlgmr.msra.gmra.mrb[4].mxu0 %vm361_vm1, %v13562_v13 }
 0x279   :  { %12337 = vmatpush3.bf16.msra.mxu1 %v12334_v59 }
 0x27d   :  { %v13052_v58 = vpop.eup %13051 }
 0x27e   :  { %v13054_v60 = vpop.eup %13053  ;;  %v464_v61 = vmul.f32 %v13052_v58, %v440_v24 }
 0x27f   :  { %v463_v62 = vmul.f32 %v13054_v60, %v435_v25 }
 0x281   :  { %11352 = vmatprep.mubr.f32.mxu1 %v463_v62  ;;  %v10210_v62 = vld [vmem:[%s13356_s30 + $0x38] sm:$0xff] }
 0x282   :  { %11353 = vmatmul.mubr.f32.vlgmr.msra.gmra.mrb[6].mxu1 %v464_v61  ;;  %v10209_v61 = vld [vmem:[%s13356_s30 + $0x30] sm:$0xff] }
 0x33a   :  { %v11365_v0 = vpop.f32.mrb[0].mxu0 }
 0x33b   :  { %v695_v1 = vpop.f32.mrb[1].mxu0  ;;  %v701_v24 = vadd.f32 %v11365_v0, %v10192_v63 }
 0x33c   :  { %v696_v2 = vadd.f32 %v10192_v63, %v695_v1 }
 0x33e   :  { %11392 = vmatprep.mubr.msk.f32.mxu0 %vm876_vm2, %v696_v2  ;;  %v12376_v2 = vpack.c.bf16 %v10210_v62, %v10209_v61  ;;  %v10258_v62 = vld [vmem:[%s13376_s27 + $0x40] sm:$0xff] }
 0x342   :  { %v11376_v4 = vpop.f32.mrb[2].mxu0 }
 0x343   :  { %v787_v5 = vadd.f32 %v11376_v4, %v10195_v3  ;;  %v781_v7 = vpop.f32.mrb[3].mxu0  ;;  %v10224_v4 = vld [vmem:[%s13376_s27 + $0x28] sm:$0xff] }
 0x344   :  { %v782_v10 = vadd.f32 %v10195_v3, %v781_v7  ;;  %v10223_v3 = vld [vmem:[%s13376_s27 + $0x20] sm:$0xff]  ;;  %v10225_v7 = vld [vmem:[%s13376_s27 + $0x30] sm:$0xff] }
 0x345   :  { %v12392_v9 = vpack.c.bf16 %v10226_v8, %v10225_v7  ;;  %v10251_v7 = vld [vmem:[%s13366_s12 + $0x48] sm:$0xff] }
 0x346   :  { %v12362_v12 = vpack.c.bf16 %v787_v5, %v782_v10  ;;  %v12388_v5 = vpack.c.bf16 %v10224_v4, %v10223_v3  ;;  %v1071_v4 = vld [vmem:[%s14554_s17] sm:$0xff] }
 0x348   :  { %12364 = vmatprep.subr.msk.bf16.mxu0 %vm13596_vm3, %v12362_v12 }
 0x349   :  { %12367 = vmatpush3.bf16.xpose.msk.msra.mxu0 %vm13596_vm3, %v12362_v12 }
 0x34a   :  { %v11387_v18 = vpop.f32.mrb[4].mxu0  ;;  %12381 = vmatprep.subr.bf16.mxu0 %v12380_v16 }
 0x34b   :  { %v873_v19 = vadd.f32 %v11387_v18, %v10198_v17  ;;  %v867_v20 = vpop.f32.mrb[5].mxu0 }
 0x34c   :  { %v868_v23 = vadd.f32 %v10198_v17, %v867_v20 }
 0x34e   :  { %v12368_v25 = vpack.c.bf16 %v873_v19, %v868_v23 }
 0x350   :  { %11393 = vmatmul.mubr.msk.f32.vlgmr.msra.gmra.mrb[6].mxu0 %vm876_vm2, %v701_v24  ;;  %12369 = vmatprep.subr.bf16.mxu1 %v12368_v25 }
 0x351   :  { %12371 = vmatpush3.bf16.msra.mxu1 %v12368_v25  ;;  %12383 = vmatpush3.bf16.msra.mxu0 %v12380_v16  ;;  %v10212_v16 = vld [vmem:[%s14548_s0 + $0x1] ss:$0 sm:$0xff] }
 0x352   :  { %11421 = vmatprep.mubr.msk.f32.mxu0 %vm361_vm1, %v13556_v6  ;;  %12385 = vmatprep.subr.bf16.mxu0 %v12384_v26 }
 0x353   :  { %12373 = vmatprep.subr.bf16.mxu1 %v12372_v55 }
 0x355   :  { %12387 = vmatpush3.bf16.msra.mxu0 %v12384_v26  ;;  %v13631_v56 = vpop.f32.mrb[6].mxu1 }
 0x356   :  { %v13633_v57 = vpop.f32.mrb[7].mxu1 }
 0x358   :  { %11422 = vmatmul.mubr.msk.f32.vlgmr.msra.gmra.mrb[8].mxu0 %vm361_vm1, %v13562_v13 }
 0x423   :  { %v11394_v27 = vpop.f32.mrb[6].mxu0 }
 0x424   :  { %v965_v29 = vmul.f32 0.35355338, %v11394_v27  ;;  %v955_v30 = vpop.f32.mrb[7].mxu0 }
 0x425   :  { %v964_v32 = vmul.f32 0.35355338, %v955_v30 }
 0x426   :  { %v967_v33 = vadd.f32 %v965_v29, %v13613_v28 }
 0x427   :  { %v966_v34 = vadd.f32 %v964_v32, %v13616_v31 }
 0x428   :  { %v971_v35 = vsel %vm181_vm0, %v967_v33, -inf }
 0x429   :  { %972 = vmax.xlane.f32.xlu1 %v971_v35  ;;  %v968_v36 = vsel %vm181_vm0, %v966_v34, -inf }
 0x42a   :  { %969 = vmax.xlane.f32.xlu0 %v968_v36 }
 0x42b   :  { %v11423_v38 = vpop.f32.mrb[8].mxu0 }
 0x42c   :  { %v1245_v39 = vadd.f32 %v11423_v38, %v10220_v37  ;;  %v1239_v40 = vpop.f32.mrb[9].mxu0 }
 0x42d   :  { %v1240_v41 = vadd.f32 %v10220_v37, %v1239_v40 }
 0x42f   :  { %v12396_v42 = vpack.c.bf16 %v1245_v39, %v1240_v41 }
 0x431   :  { %12398 = vmatprep.subr.msk.bf16.mxu0 %vm13596_vm3, %v12396_v42 }
 0x432   :  { %12401 = vmatpush3.bf16.xpose.msk.msra.mxu0 %vm13596_vm3, %v12396_v42 }
 0x4b6   :  { %v973_v43 = vpop.xlane.xlu1 %972 }
 0x4b7   :  { %v975_v44 = vsub.f32 %v967_v33, %v973_v43  ;;  %v970_v45 = vpop.xlane.xlu0 %969 }
 0x4b8   :  { %v974_v46 = vsub.f32 %v966_v34, %v970_v45 }
 0x4b9   :  { %v978_v47 = vmul.f32 1.442695, %v975_v44 }
 0x4ba   :  { %v976_v48 = vmul.f32 1.442695, %v974_v46 }
 0x4bb   :  { %13055 = vpow2.f32 %v978_v47  ;;  %v10242_v47 = vld [vmem:[%s13356_s30 + $0x40] sm:$0xff] }
 0x4bc   :  { %13057 = vpow2.f32 %v976_v48  ;;  %v10243_v48 = vld [vmem:[%s13356_s30 + $0x48] sm:$0xff] }
 0x4c5   :  { %v13056_v49 = vpop.eup %13055 }
 0x4c6   :  { %v13058_v50 = vpop.eup %13057  ;;  %v983_v51 = vsel %vm181_vm0, %v13056_v49, 0.0 }
 0x4c7   :  { %984 = vadd.xlane.f32.xlu1 %v983_v51  ;;  %v980_v52 = vsel %vm181_vm0, %v13058_v50, 0.0 }
 0x4c8   :  { %981 = vadd.xlane.f32.xlu0 %v980_v52 }
 0x554   :  { %v985_v58 = vpop.xlane.xlu1 %984 }
 0x555   :  { %13059 = vrcp.f32 %v985_v58  ;;  %v982_v59 = vpop.xlane.xlu0 %981 }
 0x556   :  { %13061 = vrcp.f32 %v982_v59 }
 0x55f   :  { %v13060_v60 = vpop.eup %13059 }
 0x560   :  { %v13062_v63 = vpop.eup %13061  ;;  %v989_v1 = vmul.f32 %v13060_v60, %v13056_v49  ;;  %v12406_v49 = vpack.c.bf16 %v10243_v48, %v10242_v47 }
 0x561   :  { %v988_v0 = vmul.f32 %v13062_v63, %v13058_v50  ;;  %v10237_v50 = vld [vmem:[%s14554_s17 + $0x8] sm:$0xff] }
 0x562   :  { %11449 = vmatprep.subr.mxu0 %v10237_v50  ;;  %v10259_v63 = vld [vmem:[%s13376_s27 + $0x48] sm:$0xff] }
 0x563   :  { %11399 = vmatprep.mubr.msk.f32.mxu1 %vm181_vm0, %v988_v0  ;;  %v12422_v0 = vpack.c.bf16 %v10259_v63, %v10258_v62 }
 0x564   :  { %11400 = vmatmul.mubr.msk.f32.vlgmr.msra.gmra.mrb[8].mxu1 %vm181_vm0, %v989_v1  ;;  %v10260_v1 = vld [vmem:[%s13376_s27 + $0x50] sm:$0xff] }
 0x565   :  { %12375 = vmatpush3.bf16.msra.mxu1 %v12372_v55  ;;  %11410 = vmatprep.mubr.msk.f32.mxu1 %vm361_vm1, %v13556_v6  ;;  %v10245_v55 = vld [vmem:[%s13356_s30 + $0x58] sm:$0xff] }
 0x566   :  { %12377 = vmatprep.subr.bf16.mxu1 %v12376_v2  ;;  %v12410_v61 = vpack.c.bf16 %v10245_v55, %v10244_v54  ;;  %v10275_v55 = vld [vmem:[%s13356_s30 + $0x60] sm:$0xff] }
 0x569   :  { %12379 = vmatpush3.bf16.msra.mxu1 %v12376_v2  ;;  %v10261_v2 = vld [vmem:[%s13376_s27 + $0x58] sm:$0xff] }
 0x56a   :  { %12389 = vmatprep.subr.bf16.mxu1 %v12388_v5  ;;  %v12426_v3 = vpack.c.bf16 %v10261_v2, %v10260_v1  ;;  %v10278_v1 = vld [vmem:[%s13356_s30 + $0x78] sm:$0xff] }
 0x56c   :  { %11411 = vmatmul.mubr.msk.f32.vlgmr.msra.gmra.mrb[10].mxu1 %vm361_vm1, %v13562_v13 }
 0x56d   :  { %12391 = vmatpush3.bf16.msra.mxu1 %v12388_v5  ;;  %11432 = vmatprep.mubr.msk.f32.mxu1 %vm361_vm1, %v13556_v6  ;;  %v10250_v5 = vld [vmem:[%s13366_s12 + $0x40] sm:$0xff] }
 0x56e   :  { %12393 = vmatprep.subr.bf16.mxu1 %v12392_v9 }
 0x571   :  { %12395 = vmatpush3.bf16.msra.mxu1 %v12392_v9 }
 0x574   :  { %11433 = vmatmul.mubr.msk.f32.vlgmr.msra.gmra.mrb[12].mxu1 %vm361_vm1, %v13562_v13 }
 0x637   :  { %v13651_v10 = vpop.f32.mrb[8].mxu1 }
 0x638   :  { %v13653_v12 = vpop.f32.mrb[9].mxu1 }
 0x63f   :  { %v11412_v17 = vpop.f32.mrb[10].mxu1 }
 0x640   :  { %v1151_v18 = vpop.f32.mrb[11].mxu1  ;;  %v1157_v20 = vadd.f32 %v11412_v17, %v10212_v16  ;;  %v10247_v17 = vld [vmem:[%s14548_s0 + $0x2] ss:$0 sm:$0xff] }
 0x641   :  { %v1152_v19 = vadd.f32 %v10212_v16, %v1151_v18  ;;  %v12414_v16 = vpack.c.bf16 %v10251_v7, %v10250_v5  ;;  %v10252_v18 = vld [vmem:[%s13366_s12 + $0x50] sm:$0xff]  ;;  %v10291_v7 = vld [vmem:[%s13376_s27 + $0x60] sm:$0xff] }
 0x643   :  { %11439 = vmatprep.mubr.msk.f32.mxu0 %vm876_vm2, %v1152_v19  ;;  %v10253_v19 = vld [vmem:[%s13366_s12 + $0x58] sm:$0xff] }
 0x644   :  { %11440 = vmatmul.mubr.msk.f32.vlgmr.msra.gmra.mrb[10].mxu0 %vm876_vm2, %v1157_v20 }
 0x645   :  { %11450 = vmatpush3.msra.mxu0 %v10237_v50 }
 0x646   :  { %11454 = vmatprep.subr.mxu0 %v1071_v4 }
 0x647   :  { %v11434_v22 = vpop.f32.mrb[12].mxu1 }
 0x648   :  { %v1333_v23 = vadd.f32 %v11434_v22, %v10228_v21  ;;  %v1327_v24 = vpop.f32.mrb[13].mxu1 }
 0x649   :  { %v1328_v25 = vadd.f32 %v10228_v21, %v1327_v24  ;;  %v10263_v24 = vld [vmem:[%s14550_s9 + $0x2] ss:$0 sm:$0xff] }
 0x64b   :  { %v12402_v26 = vpack.c.bf16 %v1333_v23, %v1328_v25  ;;  %v12418_v23 = vpack.c.bf16 %v10253_v19, %v10252_v18  ;;  %v10283_v19 = vld [vmem:[%s13366_s12 + $0x60] sm:$0xff] }
 0x64d   :  { %12403 = vmatprep.subr.bf16.mxu1 %v12402_v26 }
 0x64e   :  { %12405 = vmatpush3.bf16.msra.mxu1 %v12402_v26 }
 0x64f   :  { %12407 = vmatprep.subr.bf16.mxu1 %v12406_v49 }
 0x717   :  { %v11441_v27 = vpop.f32.mrb[10].mxu0 }
 0x718   :  { %v1424_v29 = vmul.f32 0.35355338, %v11441_v27  ;;  %v1414_v30 = vpop.f32.mrb[11].mxu0 }
 0x719   :  { %v1423_v32 = vmul.f32 0.35355338, %v1414_v30 }
 0x71a   :  { %v1426_v33 = vadd.f32 %v1424_v29, %v13613_v28 }
 0x71b   :  { %v1425_v34 = vadd.f32 %v1423_v32, %v13616_v31 }
 0x71c   :  { %v1430_v35 = vsel %vm181_vm0, %v1426_v33, -inf }
 0x71d   :  { %1431 = vmax.xlane.f32.xlu1 %v1430_v35  ;;  %v1427_v36 = vsel %vm181_vm0, %v1425_v34, -inf }
 0x71e   :  { %1428 = vmax.xlane.f32.xlu0 %v1427_v36 }
 0x7aa   :  { %v1432_v37 = vpop.xlane.xlu1 %1431 }
 0x7ab   :  { %v1434_v38 = vsub.f32 %v1426_v33, %v1432_v37  ;;  %v1429_v39 = vpop.xlane.xlu0 %1428 }
 0x7ac   :  { %v1433_v40 = vsub.f32 %v1425_v34, %v1429_v39 }
 0x7ad   :  { %v1437_v41 = vmul.f32 1.442695, %v1434_v38 }
 0x7ae   :  { %v1435_v42 = vmul.f32 1.442695, %v1433_v40 }
 0x7af   :  { %13063 = vpow2.f32 %v1437_v41 }
 0x7b0   :  { %13065 = vpow2.f32 %v1435_v42 }
 0x7b9   :  { %v13064_v43 = vpop.eup %13063 }
 0x7ba   :  { %v13066_v44 = vpop.eup %13065  ;;  %v1442_v45 = vsel %vm181_vm0, %v13064_v43, 0.0 }
 0x7bb   :  { %1443 = vadd.xlane.f32.xlu1 %v1442_v45  ;;  %v1439_v46 = vsel %vm181_vm0, %v13066_v44, 0.0 }
 0x7bc   :  { %1440 = vadd.xlane.f32.xlu0 %v1439_v46 }
 0x848   :  { %v1444_v51 = vpop.xlane.xlu1 %1443 }
 0x849   :  { %13067 = vrcp.f32 %v1444_v51  ;;  %v1441_v52 = vpop.xlane.xlu0 %1440 }
 0x84a   :  { %13069 = vrcp.f32 %v1441_v52 }
 0x853   :  { %v13068_v53 = vpop.eup %13067 }
 0x854   :  { %v13070_v58 = vpop.eup %13069  ;;  %v1448_v60 = vmul.f32 %v13068_v53, %v13064_v43 }
 0x855   :  { %v1447_v59 = vmul.f32 %v13070_v58, %v13066_v44  ;;  %v10276_v58 = vld [vmem:[%s13356_s30 + $0x68] sm:$0xff] }
 0x857   :  { %11446 = vmatprep.mubr.msk.f32.mxu1 %vm181_vm0, %v1447_v59  ;;  %v12440_v59 = vpack.c.bf16 %v10276_v58, %v10275_v55 }
 0x858   :  { %11447 = vmatmul.mubr.msk.f32.vlgmr.msra.gmra.mrb[14].mxu1 %vm181_vm0, %v1448_v60  ;;  %v10272_v60 = vld [vmem:[%s14554_s17 + $0x10] sm:$0xff] }
 0x859   :  { %12409 = vmatpush3.bf16.msra.mxu1 %v12406_v49  ;;  %11467 = vmatprep.mubr.msk.f32.mxu1 %vm361_vm1, %v13556_v6 }
 0x85a   :  { %12411 = vmatprep.subr.bf16.mxu1 %v12410_v61 }
 0x85d   :  { %12413 = vmatpush3.bf16.msra.mxu1 %v12410_v61 }
 0x85e   :  { %12423 = vmatprep.subr.bf16.mxu1 %v12422_v0 }
 0x860   :  { %11468 = vmatmul.mubr.msk.f32.vlgmr.msra.gmra.mrb[16].mxu1 %vm361_vm1, %v13562_v13 }
 0x861   :  { %12425 = vmatpush3.bf16.msra.mxu1 %v12422_v0  ;;  %11489 = vmatprep.mubr.msk.f32.mxu1 %vm361_vm1, %v13556_v6  ;;  %v10277_v0 = vld [vmem:[%s13356_s30 + $0x70] sm:$0xff] }
 0x862   :  { %12427 = vmatprep.subr.bf16.mxu1 %v12426_v3  ;;  %v12444_v5 = vpack.c.bf16 %v10278_v1, %v10277_v0 }
 0x865   :  { %12429 = vmatpush3.bf16.msra.mxu1 %v12426_v3 }
 0x868   :  { %11490 = vmatmul.mubr.msk.f32.vlgmr.msra.gmra.mrb[18].mxu1 %vm361_vm1, %v13562_v13 }
 0x92b   :  { %v11448_v8 = vpop.f32.mrb[14].mxu1 }
 0x92c   :  { %v1521_v9 = vpop.f32.mrb[15].mxu1 }
 0x92d   :  { %11451 = vmatprep.mubr.msk.f32.mxu0 %vm876_vm2, %v1521_v9 }
 0x92e   :  { %11452 = vmatmul.mubr.msk.f32.vlgmr.msra.gmra.mrb[12].mxu0 %vm876_vm2, %v11448_v8  ;;  %v10292_v8 = vld [vmem:[%s13376_s27 + $0x68] sm:$0xff] }
 0x92f   :  { %11455 = vmatpush3.msra.mxu0 %v1071_v4  ;;  %11456 = vmatprep.mubr.msk.f32.mxu0 %vm876_vm2, %v13653_v12  ;;  %v12456_v9 = vpack.c.bf16 %v10292_v8, %v10291_v7  ;;  %v2929_v7 = vld [vmem:[%s14555_s29 + $0x10] sm:$0xff]  ;;  %v2930_v8 = vld [vmem:[%s14555_s29 + $0x18] sm:$0xff] }
 0x930   :  { %12415 = vmatprep.subr.bf16.mxu0 %v12414_v16 }
 0x933   :  { %v11469_v20 = vpop.f32.mrb[16].mxu1 }
 0x934   :  { %v1779_v21 = vadd.f32 %v11469_v20, %v10247_v17  ;;  %v1773_v22 = vpop.f32.mrb[17].mxu1  ;;  %v10284_v20 = vld [vmem:[%s13366_s12 + $0x68] sm:$0xff] }
 0x935   :  { %v1774_v27 = vadd.f32 %v10247_v17, %v1773_v22  ;;  %v10294_v17 = vld [vmem:[%s13376_s27 + $0x78] sm:$0xff]  ;;  %v10285_v22 = vld [vmem:[%s13366_s12 + $0x70] sm:$0xff] }
 0x936   :  { %11457 = vmatmul.mubr.msk.f32.vlgmr.msra.gmra.mrb[12].mxu0 %vm876_vm2, %v13651_v10  ;;  %v10255_v10 = vld [vmem:[%s14549_s5 + $0x2] ss:$0 sm:$0xff] }
 0x937   :  { %12417 = vmatpush3.bf16.msra.mxu0 %v12414_v16  ;;  %11478 = vmatprep.mubr.msk.f32.mxu0 %vm361_vm1, %v13556_v6  ;;  %v10293_v16 = vld [vmem:[%s13376_s27 + $0x70] sm:$0xff] }
 0x938   :  { %12419 = vmatprep.subr.bf16.mxu0 %v12418_v23  ;;  %v12460_v18 = vpack.c.bf16 %v10294_v17, %v10293_v16 }
 0x93b   :  { %12421 = vmatpush3.bf16.msra.mxu0 %v12418_v23  ;;  %v11491_v12 = vpop.f32.mrb[18].mxu1  ;;  %v10286_v23 = vld [vmem:[%s13366_s12 + $0x78] sm:$0xff] }
 0x93c   :  { %v1955_v25 = vadd.f32 %v11491_v12, %v10263_v24  ;;  %v1949_v26 = vpop.f32.mrb[19].mxu1 }
 0x93d   :  { %v1950_v29 = vadd.f32 %v10263_v24, %v1949_v26  ;;  %v10280_v26 = vld [vmem:[%s14548_s0 + $0x3] ss:$0 sm:$0xff] }
 0x93e   :  { %11479 = vmatmul.mubr.msk.f32.vlgmr.msra.gmra.mrb[14].mxu0 %vm361_vm1, %v13562_v13 }
 0x93f   :  { %v12436_v30 = vpack.c.bf16 %v1955_v25, %v1950_v29  ;;  %11496 = vmatprep.mubr.msk.f32.mxu0 %vm876_vm2, %v1774_v27  ;;  %v12452_v25 = vpack.c.bf16 %v10286_v23, %v10285_v22 }
 0x941   :  { %12437 = vmatprep.subr.bf16.mxu1 %v12436_v30 }
 0x942   :  { %12439 = vmatpush3.bf16.msra.mxu1 %v12436_v30 }
 0x943   :  { %12441 = vmatprep.subr.bf16.mxu1 %v12440_v59 }
 0xa11   :  { %v11480_v32 = vpop.f32.mrb[14].mxu0 }
 0xa12   :  { %v1867_v33 = vadd.f32 %v11480_v32, %v10255_v10  ;;  %v1861_v34 = vpop.f32.mrb[15].mxu0  ;;  %v10296_v32 = vld [vmem:[%s14550_s9 + $0x3] ss:$0 sm:$0xff] }
 0xa13   :  { %v1862_v35 = vadd.f32 %v10255_v10, %v1861_v34 }
 0xa15   :  { %v12430_v36 = vpack.c.bf16 %v1867_v33, %v1862_v35 }
 0xa17   :  { %12432 = vmatprep.subr.msk.bf16.mxu0 %vm13596_vm3, %v12430_v36 }
 0xa18   :  { %12435 = vmatpush3.bf16.xpose.msk.msra.mxu0 %vm13596_vm3, %v12430_v36 }
 0xa19   :  { %11506 = vmatprep.subr.mxu0 %v10272_v60 }
 0xa1f   :  { %11497 = vmatmul.mubr.msk.f32.vlgmr.msra.gmra.mrb[16].mxu0 %vm876_vm2, %v1779_v21  ;;  %v12448_v21 = vpack.c.bf16 %v10284_v20, %v10283_v19 }
 0xa20   :  { %11507 = vmatpush3.msra.mxu0 %v10272_v60  ;;  %v10305_v60 = vld [vmem:[%s14554_s17 + $0x18] sm:$0xff] }
 0xa21   :  { %12449 = vmatprep.subr.bf16.mxu0 %v12448_v21 }
 0xaf2   :  { %v11498_v37 = vpop.f32.mrb[16].mxu0 }
 0xaf3   :  { %v2046_v38 = vmul.f32 0.35355338, %v11498_v37  ;;  %v2036_v39 = vpop.f32.mrb[17].mxu0 }
 0xaf4   :  { %v2045_v40 = vmul.f32 0.35355338, %v2036_v39 }
 0xaf5   :  { %v2048_v41 = vadd.f32 %v2046_v38, %v13613_v28 }
 0xaf6   :  { %v2047_v42 = vadd.f32 %v2045_v40, %v13616_v31 }
 0xaf7   :  { %v2052_v43 = vsel %vm181_vm0, %v2048_v41, -inf }
 0xaf8   :  { %2053 = vmax.xlane.f32.xlu1 %v2052_v43  ;;  %v2049_v44 = vsel %vm181_vm0, %v2047_v42, -inf }
 0xaf9   :  { %2050 = vmax.xlane.f32.xlu0 %v2049_v44 }
 0xb85   :  { %v2054_v45 = vpop.xlane.xlu1 %2053 }
 0xb86   :  { %v2056_v46 = vsub.f32 %v2048_v41, %v2054_v45  ;;  %v2051_v47 = vpop.xlane.xlu0 %2050 }
 0xb87   :  { %v2055_v48 = vsub.f32 %v2047_v42, %v2051_v47 }
 0xb88   :  { %v2059_v49 = vmul.f32 1.442695, %v2056_v46 }
 0xb89   :  { %v2057_v50 = vmul.f32 1.442695, %v2055_v48 }
 0xb8a   :  { %13071 = vpow2.f32 %v2059_v49 }
 0xb8b   :  { %13073 = vpow2.f32 %v2057_v50 }
 0xb94   :  { %v13072_v51 = vpop.eup %13071 }
 0xb95   :  { %v13074_v52 = vpop.eup %13073  ;;  %v2064_v53 = vsel %vm181_vm0, %v13072_v51, 0.0 }
 0xb96   :  { %2065 = vadd.xlane.f32.xlu1 %v2064_v53  ;;  %v2061_v54 = vsel %vm181_vm0, %v13074_v52, 0.0 }
 0xb97   :  { %2062 = vadd.xlane.f32.xlu0 %v2061_v54 }
 0xc23   :  { %v2066_v61 = vpop.xlane.xlu1 %2065 }
 0xc24   :  { %13075 = vrcp.f32 %v2066_v61  ;;  %v2063_v62 = vpop.xlane.xlu0 %2062 }
 0xc25   :  { %13077 = vrcp.f32 %v2063_v62 }
 0xc2e   :  { %v13076_v63 = vpop.eup %13075 }
 0xc2f   :  { %v13078_v2 = vpop.eup %13077  ;;  %v2070_v4 = vmul.f32 %v13076_v63, %v13072_v51 }
 0xc30   :  { %v2069_v3 = vmul.f32 %v13078_v2, %v13074_v52 }
 0xc32   :  { %11503 = vmatprep.mubr.msk.f32.mxu1 %vm181_vm0, %v2069_v3  ;;  %v2927_v3 = vld [vmem:[%s14555_s29] sm:$0xff] }
 0xc33   :  { %11504 = vmatmul.mubr.msk.f32.vlgmr.msra.gmra.mrb[20].mxu1 %vm181_vm0, %v2070_v4  ;;  %v2928_v4 = vld [vmem:[%s14555_s29 + $0x8] sm:$0xff] }
 0xc34   :  { %12443 = vmatpush3.bf16.msra.mxu1 %v12440_v59  ;;  %11519 = vmatprep.mubr.msk.f32.mxu1 %vm361_vm1, %v13556_v6 }
 0xc35   :  { %12445 = vmatprep.subr.bf16.mxu1 %v12444_v5 }
 0xc38   :  { %12447 = vmatpush3.bf16.msra.mxu1 %v12444_v5  ;;  %v12482_v5 = vpack.c.bf16 %v2928_v4, %v2927_v3  ;;  %v10334_v4 = vld [vmem:[%s14555_s29 + $0x20] sm:$0xff] }
 0xc39   :  { %12457 = vmatprep.subr.bf16.mxu1 %v12456_v9 }
 0xc3b   :  { %11520 = vmatmul.mubr.msk.f32.vlgmr.msra.gmra.mrb[22].mxu1 %vm361_vm1, %v13562_v13 }
 0xc3c   :  { %12459 = vmatpush3.bf16.msra.mxu1 %v12456_v9  ;;  %11541 = vmatprep.mubr.msk.f32.mxu1 %vm361_vm1, %v13556_v6  ;;  %v10189_v9 = vld [vmem:[%s14556_s3] ss:$0 sm:$0xff]  ;;  %s14572_s3 = sld [smem:[#allocation22_spill]] }
 0xc3d   :  { %12461 = vmatprep.subr.bf16.mxu1 %v12460_v18  ;;  %v13767_v19 = vadd.f32 %v10189_v9, %v13633_v57  ;;  %v13774_v20 = vadd.f32 %v13631_v56, %v10189_v9  ;;  %v10308_v57 = vld [vmem:[%s14557_s8] ss:$0 sm:$0xff] }
 0xc3e   :  { %v10314_v56 = vld [vmem:[%s14558_s14] ss:$0 sm:$0xff] }
 0xc40   :  { %12463 = vmatpush3.bf16.msra.mxu1 %v12460_v18  ;;  %v12486_v18 = vpack.c.bf16 %v2930_v8, %v2929_v7  ;;  %v10311_v8 = vld [vmem:[%s14563_s22] ss:$0 sm:$0xff] }
 0xc43   :  { %11542 = vmatmul.mubr.msk.f32.vlgmr.msra.gmra.mrb[24].mxu1 %vm361_vm1, %v13562_v13 }
 0xd06   :  { %v11505_v24 = vpop.f32.mrb[20].mxu1 }
 0xd07   :  { %v2143_v12 = vpop.f32.mrb[21].mxu1 }
 0xd08   :  { %11508 = vmatprep.mubr.msk.f32.mxu0 %vm876_vm2, %v2143_v12 }
 0xd09   :  { %11509 = vmatmul.mubr.msk.f32.vlgmr.msra.gmra.mrb[12].mxu0 %vm876_vm2, %v11505_v24 }
 0xd0a   :  { %12451 = vmatpush3.bf16.msra.mxu0 %v12448_v21  ;;  %11530 = vmatprep.mubr.msk.f32.mxu0 %vm361_vm1, %v13556_v6  ;;  %v10288_v6 = vld [vmem:[%s14549_s5 + $0x3] ss:$0 sm:$0xff] }
 0xd0b   :  { %12453 = vmatprep.subr.bf16.mxu0 %v12452_v25 }
 0xd0e   :  { %v11521_v27 = vpop.f32.mrb[22].mxu1  ;;  %12455 = vmatpush3.bf16.msra.mxu0 %v12452_v25 }
 0xd0f   :  { %v2322_v29 = vadd.f32 %v11521_v27, %v10280_v26  ;;  %v2316_v30 = vpop.f32.mrb[23].mxu1 }
 0xd10   :  { %v2317_v10 = vadd.f32 %v10280_v26, %v2316_v30 }
 0xd11   :  { %11531 = vmatmul.mubr.msk.f32.vlgmr.msra.gmra.mrb[18].mxu0 %vm361_vm1, %v13562_v13 }
 0xd12   :  { %11548 = vmatprep.mubr.msk.f32.mxu0 %vm876_vm2, %v2317_v10 }
 0xd16   :  { %v11543_v33 = vpop.f32.mrb[24].mxu1 }
 0xd17   :  { %v2498_v34 = vadd.f32 %v11543_v33, %v10296_v32  ;;  %v2492_v35 = vpop.f32.mrb[25].mxu1 }
 0xd18   :  { %v2493_v36 = vadd.f32 %v10296_v32, %v2492_v35 }
 0xd1a   :  { %v12470_v37 = vpack.c.bf16 %v2498_v34, %v2493_v36 }
 0xd1c   :  { %12471 = vmatprep.subr.bf16.mxu1 %v12470_v37 }
 0xd1d   :  { %12473 = vmatpush3.bf16.msra.mxu1 %v12470_v37 }
 0xde4   :  { %v11532_v38 = vpop.f32.mrb[18].mxu0 }
 0xde5   :  { %v2410_v39 = vadd.f32 %v11532_v38, %v10288_v6  ;;  %v2404_v40 = vpop.f32.mrb[19].mxu0 }
 0xde6   :  { %v2405_v41 = vadd.f32 %v10288_v6, %v2404_v40 }
 0xde8   :  { %v12464_v42 = vpack.c.bf16 %v2410_v39, %v2405_v41  ;;  %v2835_v41 = vld [vmem:[%s14559_s19] sm:$0xff] }
 0xdea   :  { %12466 = vmatprep.subr.msk.bf16.mxu0 %vm13596_vm3, %v12464_v42 }
 0xdeb   :  { %12469 = vmatpush3.bf16.xpose.msk.msra.mxu0 %vm13596_vm3, %v12464_v42  ;;  %v2836_v42 = vld [vmem:[%s14559_s19 + $0x8] sm:$0xff] }
 0xdec   :  { %11558 = vmatprep.subr.mxu0 %v10305_v60 }
 0xdf2   :  { %11549 = vmatmul.mubr.msk.f32.vlgmr.msra.gmra.mrb[20].mxu0 %vm876_vm2, %v2322_v29 }
 0xdf3   :  { %11559 = vmatpush3.msra.mxu0 %v10305_v60  ;;  %v10310_v60 = vld [vmem:[%s14562_s18] ss:$0 sm:$0xff] }
 0xdf4   :  { %12483 = vmatprep.subr.bf16.mxu0 %v12482_v5 }
 0xec5   :  { %v11550_v13 = vpop.f32.mrb[20].mxu0 }
 0xec6   :  { %v2589_v43 = vmul.f32 0.35355338, %v11550_v13  ;;  %v2579_v44 = vpop.f32.mrb[21].mxu0  ;;  %v12474_v13 = vpack.c.bf16 %v2836_v42, %v2835_v41 }
 0xec7   :  { %v2588_v45 = vmul.f32 0.35355338, %v2579_v44  ;;  %v2838_v44 = vld [vmem:[%s14559_s19 + $0x18] sm:$0xff] }
 0xec8   :  { %v2591_v46 = vadd.f32 %v2589_v43, %v13613_v28  ;;  %12475 = vmatprep.subr.bf16.mxu1 %v12474_v13  ;;  %v2837_v43 = vld [vmem:[%s14559_s19 + $0x10] sm:$0xff] }
 0xec9   :  { %v2590_v47 = vadd.f32 %v2588_v45, %v13616_v31  ;;  %v12478_v45 = vpack.c.bf16 %v2838_v44, %v2837_v43 }
 0xeca   :  { %v2595_v48 = vsel %vm181_vm0, %v2591_v46, -inf }
 0xecb   :  { %2596 = vmax.xlane.f32.xlu1 %v2595_v48  ;;  %v2592_v49 = vsel %vm181_vm0, %v2590_v47, -inf }
 0xecc   :  { %2593 = vmax.xlane.f32.xlu0 %v2592_v49 }
 0xf58   :  { %v2597_v50 = vpop.xlane.xlu1 %2596 }
 0xf59   :  { %v2599_v51 = vsub.f32 %v2591_v46, %v2597_v50  ;;  %v2594_v52 = vpop.xlane.xlu0 %2593  ;;  %v3019_v46 = vld [vmem:[%s14560_s15] sm:$0xff] }
 0xf5a   :  { %v2598_v53 = vsub.f32 %v2590_v47, %v2594_v52  ;;  %v3020_v47 = vld [vmem:[%s14560_s15 + $0x8] sm:$0xff] }
 0xf5b   :  { %v2602_v54 = vmul.f32 1.442695, %v2599_v51  ;;  %v12490_v48 = vpack.c.bf16 %v3020_v47, %v3019_v46 }
 0xf5c   :  { %v2600_v55 = vmul.f32 1.442695, %v2598_v53 }
 0xf5d   :  { %13079 = vpow2.f32 %v2602_v54 }
 0xf5e   :  { %13081 = vpow2.f32 %v2600_v55 }
 0xf67   :  { %v13080_v58 = vpop.eup %13079 }
 0xf68   :  { %v13082_v59 = vpop.eup %13081  ;;  %v2607_v28 = vsel %vm181_vm0, %v13080_v58, 0.0 }
 0xf69   :  { %2608 = vadd.xlane.f32.xlu1 %v2607_v28  ;;  %v2604_v31 = vsel %vm181_vm0, %v13082_v59, 0.0 }
 0xf6a   :  { %2605 = vadd.xlane.f32.xlu0 %v2604_v31 }
 0xff6   :  { %v2609_v61 = vpop.xlane.xlu1 %2608 }
 0xff7   :  { %13083 = vrcp.f32 %v2609_v61  ;;  %v2606_v62 = vpop.xlane.xlu0 %2605 }
 0xff8   :  { %13085 = vrcp.f32 %v2606_v62 }
0x1001   :  { %v13084_v63 = vpop.eup %13083 }
0x1002   :  { %v13086_v0 = vpop.eup %13085  ;;  %v2613_v2 = vmul.f32 %v13084_v63, %v13080_v58  ;;  %v10309_v58 = vld [vmem:[%s14561_s16] ss:$0 sm:$0xff]  ;;  %v3021_v63 = vld [vmem:[%s14560_s15 + $0x10] sm:$0xff] }
0x1003   :  { %v2612_v1 = vmul.f32 %v13086_v0, %v13082_v59  ;;  %v3022_v0 = vld [vmem:[%s14560_s15 + $0x18] sm:$0xff] }
0x1004   :  { %v12494_v3 = vpack.c.bf16 %v3022_v0, %v3021_v63  ;;  %v10342_v0 = vld [vmem:[%s14560_s15 + $0x20] sm:$0xff] }
0x1005   :  { %11555 = vmatprep.mubr.msk.f32.mxu1 %vm181_vm0, %v2612_v1 }
0x1006   :  { %11556 = vmatmul.mubr.msk.f32.vlgmr.msra.gmra.mrb[26].mxu1 %vm181_vm0, %v2613_v2 }
0x1007   :  { %12477 = vmatpush3.bf16.msra.mxu1 %v12474_v13 }
0x1008   :  { %12479 = vmatprep.subr.bf16.mxu1 %v12478_v45 }
0x100b   :  { %12481 = vmatpush3.bf16.msra.mxu1 %v12478_v45 }
0x100c   :  { %12491 = vmatprep.subr.bf16.mxu1 %v12490_v48 }
0x10d9   :  { %v11557_v16 = vpop.f32.mrb[26].mxu1 }
0x10da   :  { %v2686_v17 = vpop.f32.mrb[27].mxu1 }
0x10db   :  { %11560 = vmatprep.mubr.msk.f32.mxu0 %vm876_vm2, %v2686_v17  ;;  %v10337_v17 = vld [vmem:[%s14555_s29 + $0x38] sm:$0xff] }
0x10dc   :  { %11561 = vmatmul.mubr.msk.f32.vlgmr.msra.gmra.mrb[12].mxu0 %vm876_vm2, %v11557_v16  ;;  %v10336_v16 = vld [vmem:[%s14555_s29 + $0x30] sm:$0xff] }
0x10dd   :  { %12485 = vmatpush3.bf16.msra.mxu0 %v12482_v5  ;;  %11582 = vmatprep.mubr.msk.f32.mxu0 %vm361_vm1, %v13767_v19  ;;  %v10335_v5 = vld [vmem:[%s14555_s29 + $0x28] sm:$0xff] }
0x10de   :  { %12487 = vmatprep.subr.bf16.mxu0 %v12486_v18  ;;  %v12516_v7 = vpack.c.bf16 %v10335_v5, %v10334_v4  ;;  %v10344_v5 = vld [vmem:[%s14560_s15 + $0x30] sm:$0xff] }
0x10e1   :  { %12489 = vmatpush3.bf16.msra.mxu0 %v12486_v18 }
0x10e4   :  { %11583 = vmatmul.mubr.msk.f32.vlgmr.msra.gmra.mrb[22].mxu0 %vm361_vm1, %v13774_v20 }
0x11af   :  { %v11562_v21 = vpop.f32.mrb[12].mxu0 }
0x11b0   :  { %v2781_v22 = vadd.f32 %v11562_v21, %v13524_v15  ;;  %v2769_v23 = vpop.f32.mrb[13].mxu0 }
0x11b1   :  { %v2780_v24 = vadd.f32 %v2769_v23, %v13522_v14  ;;  %v10317_v23 = vld [vmem:[%s14564_s23] ss:$0 sm:$0xff] }
0x11b2   :  { %v13781_v12 = vadd.f32 %v10308_v57, %v2781_v22  ;;  %v12520_v22 = vpack.c.bf16 %v10337_v17, %v10336_v16  ;;  %v10331_v17 = vld [vmem:[%s14563_s22 + $0x1] ss:$0 sm:$0xff] }
0x11b3   :  { %v13783_v25 = vadd.f32 %v10308_v57, %v2780_v24 }
0x11b4   :  { %v2796_v26 = vsel %vm361_vm1, %v13781_v12, 0.0 }
0x11b5   :  { %2797 = vadd.xlane.f32.xlu1 %v2796_v26  ;;  %v2793_v27 = vsel %vm361_vm1, %v13783_v25, 0.0 }
0x11b6   :  { %2794 = vadd.xlane.f32.xlu0 %v2793_v27 }
0x11b7   :  { %v11584_v29 = vpop.f32.mrb[22].mxu0 }
0x11b8   :  { %v3016_v30 = vadd.f32 %v11584_v29, %v10314_v56  ;;  %v3010_v10 = vpop.f32.mrb[23].mxu0 }
0x11b9   :  { %v3011_v15 = vadd.f32 %v10314_v56, %v3010_v10  ;;  %v13833_v10 = vld [vmem:[%s14565_s26 + $0x8] sm:$0xff] }
0x11bb   :  { %v12498_v32 = vpack.c.bf16 %v3016_v30, %v3011_v15 }
0x11bd   :  { %12500 = vmatprep.subr.msk.bf16.mxu0 %vm13596_vm3, %v12498_v32 }
0x11be   :  { %12503 = vmatpush3.bf16.xpose.msk.msra.mxu0 %vm13596_vm3, %v12498_v32 }
0x11bf   :  { %12517 = vmatprep.subr.bf16.mxu0 %v12516_v7 }
0x1242   :  { %v2798_v14 = vpop.xlane.xlu1 %2797 }
0x1243   :  { %v2800_v33 = vmul.f32 0.03125, %v2798_v14  ;;  %v2795_v34 = vpop.xlane.xlu0 %2794  ;;  %v13836_v14 = vld [vmem:[%s14565_s26] sm:$0xff] }
0x1244   :  { %v2799_v35 = vmul.f32 0.03125, %v2795_v34 }
0x1245   :  { %v2802_v36 = vsub.f32 %v13781_v12, %v2800_v33 }
0x1246   :  { %v2801_v37 = vsub.f32 %v13783_v25, %v2799_v35 }
0x1247   :  { %v2804_v6 = vmul.f32 %v2802_v36, %v2802_v36 }
0x1248   :  { %v2803_v38 = vmul.f32 %v2801_v37, %v2801_v37 }
0x1249   :  { %v2808_v39 = vsel %vm361_vm1, %v2804_v6, 0.0 }
0x124a   :  { %2809 = vadd.xlane.f32.xlu1 %v2808_v39  ;;  %v2805_v40 = vsel %vm361_vm1, %v2803_v38, 0.0 }
0x124b   :  { %2806 = vadd.xlane.f32.xlu0 %v2805_v40 }
0x12d7   :  { %v2810_v49 = vpop.xlane.xlu1 %2809 }
0x12d8   :  { %v2812_v50 = vmul.f32 0.03125, %v2810_v49  ;;  %v2807_v51 = vpop.xlane.xlu0 %2806 }
0x12d9   :  { %v2811_v52 = vmul.f32 0.03125, %v2807_v51 }
0x12da   :  { %v2814_v53 = vadd.f32 1e-05, %v2812_v50 }
0x12db   :  { %v2813_v54 = vadd.f32 1e-05, %v2811_v52  ;;  %v10326_v52 = vld [vmem:[%s14559_s19 + $0x20] sm:$0xff] }
0x12dc   :  { %13087 = vrsqrt.f32 %v2814_v53  ;;  %v10327_v53 = vld [vmem:[%s14559_s19 + $0x28] sm:$0xff] }
0x12dd   :  { %13089 = vrsqrt.f32 %v2813_v54  ;;  %v12508_v54 = vpack.c.bf16 %v10327_v53, %v10326_v52  ;;  %v10363_v53 = vld [vmem:[%s14559_s19 + $0x50] sm:$0xff] }
0x12e6   :  { %v13088_v55 = vpop.eup %13087 }
0x12e7   :  { %v13090_v59 = vpop.eup %13089  ;;  %v2818_v28 = vmul.f32 %v13088_v55, %v2802_v36 }
0x12e8   :  { %v2817_v31 = vmul.f32 %v13090_v59, %v2801_v37  ;;  %v10339_v37 = vld [vmem:[%s14558_s14 + $0x1] ss:$0 sm:$0xff] }
0x12e9   :  { %v2826_v61 = vmul.f32 %v10309_v58, %v2818_v28  ;;  %v10328_v28 = vld [vmem:[%s14559_s19 + $0x30] sm:$0xff] }
0x12ea   :  { %v2825_v62 = vmul.f32 %v10309_v58, %v2817_v31  ;;  %v10329_v31 = vld [vmem:[%s14559_s19 + $0x38] sm:$0xff] }
0x12eb   :  { %v13810_v2 = vadd.f32 %v10310_v60, %v2826_v61  ;;  %v12512_v63 = vpack.c.bf16 %v10329_v31, %v10328_v28  ;;  %v10377_v31 = vld [vmem:[%s14560_s15 + $0x40] sm:$0xff] }
0x12ec   :  { %v13808_v1 = vadd.f32 %v10310_v60, %v2825_v62 }
0x12ee   :  { %11571 = vmatprep.mubr.msk.f32.mxu1 %vm361_vm1, %v13808_v1 }
0x12ef   :  { %11572 = vmatmul.mubr.msk.f32.vlgmr.msra.gmra.mrb[28].mxu1 %vm361_vm1, %v13810_v2 }
0x12f0   :  { %12493 = vmatpush3.bf16.msra.mxu1 %v12490_v48  ;;  %11593 = vmatprep.mubr.msk.f32.mxu1 %vm361_vm1, %v13767_v19 }
0x12f1   :  { %12495 = vmatprep.subr.bf16.mxu1 %v12494_v3 }
0x12f4   :  { %12497 = vmatpush3.bf16.msra.mxu1 %v12494_v3  ;;  %v10343_v3 = vld [vmem:[%s14560_s15 + $0x28] sm:$0xff] }
0x12f5   :  { %v12524_v4 = vpack.c.bf16 %v10343_v3, %v10342_v0  ;;  %v3299_v3 = vld [vmem:[%s14566_s28] sm:$0xff] }
0x12f7   :  { %11594 = vmatmul.mubr.msk.f32.vlgmr.msra.gmra.mrb[30].mxu1 %vm361_vm1, %v13774_v20 }
0x13c2   :  { %v11573_v9 = vpop.f32.mrb[28].mxu1 }
0x13c3   :  { %v2918_v18 = vpop.f32.mrb[29].mxu1  ;;  %v2924_v57 = vadd.f32 %v11573_v9, %v10311_v8 }
0x13c4   :  { %v2919_v21 = vadd.f32 %v10311_v8, %v2918_v18 }
0x13c6   :  { %11600 = vmatprep.mubr.msk.f32.mxu0 %vm876_vm2, %v2919_v21 }
0x13c7   :  { %11601 = vmatmul.mubr.msk.f32.vlgmr.msra.gmra.mrb[24].mxu0 %vm876_vm2, %v2924_v57 }
0x13c8   :  { %12519 = vmatpush3.bf16.msra.mxu0 %v12516_v7  ;;  %11629 = vmatprep.mubr.msk.f32.mxu0 %vm361_vm1, %v13767_v19  ;;  %v10345_v7 = vld [vmem:[%s14560_s15 + $0x38] sm:$0xff] }
0x13c9   :  { %12521 = vmatprep.subr.bf16.mxu0 %v12520_v22  ;;  %v12528_v8 = vpack.c.bf16 %v10345_v7, %v10344_v5  ;;  %v10370_v5 = vld [vmem:[%s14555_s29 + $0x48] sm:$0xff] }
0x13ca   :  { %v11595_v24 = vpop.f32.mrb[30].mxu1 }
0x13cb   :  { %v3102_v26 = vadd.f32 %v11595_v24, %v10317_v23  ;;  %v3096_v56 = vpop.f32.mrb[31].mxu1 }
0x13cc   :  { %v3097_v27 = vadd.f32 %v10317_v23, %v3096_v56  ;;  %12523 = vmatpush3.bf16.msra.mxu0 %v12520_v22  ;;  %v10347_v23 = vld [vmem:[%s14564_s23 + $0x1] ss:$0 sm:$0xff] }
0x13ce   :  { %v12504_v29 = vpack.c.bf16 %v3102_v26, %v3097_v27 }
0x13cf   :  { %11630 = vmatmul.mubr.msk.f32.vlgmr.msra.gmra.mrb[26].mxu0 %vm361_vm1, %v13774_v20 }
0x13d0   :  { %12505 = vmatprep.subr.bf16.mxu1 %v12504_v29 }
0x13d1   :  { %12507 = vmatpush3.bf16.msra.mxu1 %v12504_v29 }
0x13d2   :  { %12509 = vmatprep.subr.bf16.mxu1 %v12508_v54 }
0x149a   :  { %v11602_v30 = vpop.f32.mrb[24].mxu0 }
0x149b   :  { %v3193_v15 = vmul.f32 0.35355338, %v11602_v30  ;;  %v3183_v32 = vpop.f32.mrb[25].mxu0 }
0x149c   :  { %v3192_v33 = vmul.f32 0.35355338, %v3183_v32 }
0x149d   :  { %v3195_v34 = vadd.f32 %v3193_v15, %v13833_v10 }
0x149e   :  { %v3194_v35 = vadd.f32 %v3192_v33, %v13836_v14 }
0x149f   :  { %v3199_v36 = vsel %vm181_vm0, %v3195_v34, -inf }
0x14a0   :  { %3200 = vmax.xlane.f32.xlu1 %v3199_v36  ;;  %v3196_v6 = vsel %vm181_vm0, %v3194_v35, -inf }
0x14a1   :  { %3197 = vmax.xlane.f32.xlu0 %v3196_v6 }
0x14a2   :  { %v11631_v38 = vpop.f32.mrb[26].mxu0 }
0x14a3   :  { %v3473_v39 = vadd.f32 %v11631_v38, %v10339_v37  ;;  %v3467_v40 = vpop.f32.mrb[27].mxu0 }
0x14a4   :  { %v3468_v41 = vadd.f32 %v10339_v37, %v3467_v40 }
0x14a6   :  { %v12532_v42 = vpack.c.bf16 %v3473_v39, %v3468_v41 }
0x14a8   :  { %12534 = vmatprep.subr.msk.bf16.mxu0 %vm13596_vm3, %v12532_v42 }
0x14a9   :  { %12537 = vmatpush3.bf16.xpose.msk.msra.mxu0 %vm13596_vm3, %v12532_v42 }
0x152d   :  { %v3201_v13 = vpop.xlane.xlu1 %3200 }
0x152e   :  { %v3203_v43 = vsub.f32 %v3195_v34, %v3201_v13  ;;  %v3198_v44 = vpop.xlane.xlu0 %3197 }
0x152f   :  { %v3202_v45 = vsub.f32 %v3194_v35, %v3198_v44 }
0x1530   :  { %v3206_v46 = vmul.f32 1.442695, %v3203_v43 }
0x1531   :  { %v3204_v47 = vmul.f32 1.442695, %v3202_v45 }
0x1532   :  { %13091 = vpow2.f32 %v3206_v46  ;;  %v10361_v46 = vld [vmem:[%s14559_s19 + $0x40] sm:$0xff] }
0x1533   :  { %13093 = vpow2.f32 %v3204_v47  ;;  %v10362_v47 = vld [vmem:[%s14559_s19 + $0x48] sm:$0xff] }
0x153c   :  { %v13092_v48 = vpop.eup %13091 }
0x153d   :  { %v13094_v49 = vpop.eup %13093  ;;  %v3211_v50 = vsel %vm181_vm0, %v13092_v48, 0.0 }
0x153e   :  { %3212 = vadd.xlane.f32.xlu1 %v3211_v50  ;;  %v3208_v51 = vsel %vm181_vm0, %v13094_v49, 0.0 }
0x153f   :  { %3209 = vadd.xlane.f32.xlu0 %v3208_v51 }
0x15cb   :  { %v3213_v55 = vpop.xlane.xlu1 %3212 }
0x15cc   :  { %13095 = vrcp.f32 %v3213_v55  ;;  %v3210_v58 = vpop.xlane.xlu0 %3209 }
0x15cd   :  { %13097 = vrcp.f32 %v3210_v58 }
0x15d6   :  { %v13096_v59 = vpop.eup %13095 }
0x15d7   :  { %v13098_v60 = vpop.eup %13097  ;;  %v3217_v62 = vmul.f32 %v13096_v59, %v13092_v48  ;;  %v12542_v48 = vpack.c.bf16 %v10362_v47, %v10361_v46 }
0x15d8   :  { %v3216_v61 = vmul.f32 %v13098_v60, %v13094_v49  ;;  %v10356_v49 = vld [vmem:[%s14566_s28 + $0x8] sm:$0xff] }
0x15d9   :  { %11657 = vmatprep.subr.mxu0 %v10356_v49  ;;  %v10378_v60 = vld [vmem:[%s14560_s15 + $0x48] sm:$0xff] }
0x15da   :  { %11607 = vmatprep.mubr.msk.f32.mxu1 %vm181_vm0, %v3216_v61  ;;  %v12558_v61 = vpack.c.bf16 %v10378_v60, %v10377_v31 }
0x15db   :  { %11608 = vmatmul.mubr.msk.f32.vlgmr.msra.gmra.mrb[32].mxu1 %vm181_vm0, %v3217_v62  ;;  %v10379_v62 = vld [vmem:[%s14560_s15 + $0x50] sm:$0xff] }
0x15dc   :  { %12511 = vmatpush3.bf16.msra.mxu1 %v12508_v54  ;;  %11618 = vmatprep.mubr.msk.f32.mxu1 %vm361_vm1, %v13808_v1  ;;  %v10364_v54 = vld [vmem:[%s14559_s19 + $0x58] sm:$0xff] }
0x15dd   :  { %12513 = vmatprep.subr.bf16.mxu1 %v12512_v63  ;;  %v12546_v28 = vpack.c.bf16 %v10364_v54, %v10363_v53  ;;  %v10394_v54 = vld [vmem:[%s14559_s19 + $0x60] sm:$0xff] }
0x15e0   :  { %12515 = vmatpush3.bf16.msra.mxu1 %v12512_v63  ;;  %v10380_v63 = vld [vmem:[%s14560_s15 + $0x58] sm:$0xff] }
0x15e1   :  { %12525 = vmatprep.subr.bf16.mxu1 %v12524_v4  ;;  %v12562_v0 = vpack.c.bf16 %v10380_v63, %v10379_v62  ;;  %v10397_v62 = vld [vmem:[%s14559_s19 + $0x78] sm:$0xff] }
0x15e3   :  { %11619 = vmatmul.mubr.msk.f32.vlgmr.msra.gmra.mrb[34].mxu1 %vm361_vm1, %v13810_v2 }
0x15e4   :  { %12527 = vmatpush3.bf16.msra.mxu1 %v12524_v4  ;;  %11640 = vmatprep.mubr.msk.f32.mxu1 %vm361_vm1, %v13767_v19  ;;  %v10369_v4 = vld [vmem:[%s14555_s29 + $0x40] sm:$0xff] }
0x15e5   :  { %12529 = vmatprep.subr.bf16.mxu1 %v12528_v8 }
0x15e8   :  { %12531 = vmatpush3.bf16.msra.mxu1 %v12528_v8 }
0x15eb   :  { %11641 = vmatmul.mubr.msk.f32.vlgmr.msra.gmra.mrb[36].mxu1 %vm361_vm1, %v13774_v20 }
0x16ae   :  { %v13867_v9 = vpop.f32.mrb[32].mxu1 }
0x16af   :  { %v13869_v16 = vpop.f32.mrb[33].mxu1 }
0x16b6   :  { %v11620_v18 = vpop.f32.mrb[34].mxu1 }
0x16b7   :  { %v3379_v21 = vpop.f32.mrb[35].mxu1  ;;  %v3385_v22 = vadd.f32 %v11620_v18, %v10331_v17  ;;  %v10366_v18 = vld [vmem:[%s14563_s22 + $0x2] ss:$0 sm:$0xff] }
0x16b8   :  { %v3380_v57 = vadd.f32 %v10331_v17, %v3379_v21  ;;  %v12550_v17 = vpack.c.bf16 %v10370_v5, %v10369_v4  ;;  %v10371_v21 = vld [vmem:[%s14555_s29 + $0x50] sm:$0xff]  ;;  %v10410_v5 = vld [vmem:[%s14560_s15 + $0x60] sm:$0xff] }
0x16ba   :  { %11647 = vmatprep.mubr.msk.f32.mxu0 %vm876_vm2, %v3380_v57  ;;  %v10372_v57 = vld [vmem:[%s14555_s29 + $0x58] sm:$0xff] }
0x16bb   :  { %11648 = vmatmul.mubr.msk.f32.vlgmr.msra.gmra.mrb[28].mxu0 %vm876_vm2, %v3385_v22 }
0x16bc   :  { %11658 = vmatpush3.msra.mxu0 %v10356_v49 }
0x16bd   :  { %11662 = vmatprep.subr.mxu0 %v3299_v3 }
0x16be   :  { %v11642_v24 = vpop.f32.mrb[36].mxu1 }
0x16bf   :  { %v3561_v26 = vadd.f32 %v11642_v24, %v10347_v23  ;;  %v3555_v56 = vpop.f32.mrb[37].mxu1 }
0x16c0   :  { %v3556_v27 = vadd.f32 %v10347_v23, %v3555_v56  ;;  %v10382_v56 = vld [vmem:[%s14564_s23 + $0x2] ss:$0 sm:$0xff] }
0x16c2   :  { %v12538_v29 = vpack.c.bf16 %v3561_v26, %v3556_v27  ;;  %v12554_v26 = vpack.c.bf16 %v10372_v57, %v10371_v21  ;;  %v10403_v57 = vld [vmem:[%s14555_s29 + $0x68] sm:$0xff] }
0x16c4   :  { %12539 = vmatprep.subr.bf16.mxu1 %v12538_v29 }
0x16c5   :  { %12541 = vmatpush3.bf16.msra.mxu1 %v12538_v29 }
0x16c6   :  { %12543 = vmatprep.subr.bf16.mxu1 %v12542_v48 }
0x178e   :  { %v11649_v30 = vpop.f32.mrb[28].mxu0 }
0x178f   :  { %v3652_v15 = vmul.f32 0.35355338, %v11649_v30  ;;  %v3642_v32 = vpop.f32.mrb[29].mxu0 }
0x1790   :  { %v3651_v33 = vmul.f32 0.35355338, %v3642_v32 }
0x1791   :  { %v3654_v34 = vadd.f32 %v3652_v15, %v13833_v10 }
0x1792   :  { %v3653_v35 = vadd.f32 %v3651_v33, %v13836_v14 }
0x1793   :  { %v3658_v36 = vsel %vm181_vm0, %v3654_v34, -inf }
0x1794   :  { %3659 = vmax.xlane.f32.xlu1 %v3658_v36  ;;  %v3655_v37 = vsel %vm181_vm0, %v3653_v35, -inf }
0x1795   :  { %3656 = vmax.xlane.f32.xlu0 %v3655_v37 }
0x1821   :  { %v3660_v6 = vpop.xlane.xlu1 %3659 }
0x1822   :  { %v3662_v38 = vsub.f32 %v3654_v34, %v3660_v6  ;;  %v3657_v39 = vpop.xlane.xlu0 %3656 }
0x1823   :  { %v3661_v40 = vsub.f32 %v3653_v35, %v3657_v39 }
0x1824   :  { %v3665_v41 = vmul.f32 1.442695, %v3662_v38 }
0x1825   :  { %v3663_v42 = vmul.f32 1.442695, %v3661_v40 }
0x1826   :  { %13099 = vpow2.f32 %v3665_v41 }
0x1827   :  { %13101 = vpow2.f32 %v3663_v42 }
0x1830   :  { %v13100_v13 = vpop.eup %13099 }
0x1831   :  { %v13102_v43 = vpop.eup %13101  ;;  %v3670_v44 = vsel %vm181_vm0, %v13100_v13, 0.0 }
0x1832   :  { %3671 = vadd.xlane.f32.xlu1 %v3670_v44  ;;  %v3667_v45 = vsel %vm181_vm0, %v13102_v43, 0.0 }
0x1833   :  { %3668 = vadd.xlane.f32.xlu0 %v3667_v45 }
0x18bf   :  { %v3672_v50 = vpop.xlane.xlu1 %3671 }
0x18c0   :  { %13103 = vrcp.f32 %v3672_v50  ;;  %v3669_v51 = vpop.xlane.xlu0 %3668 }
0x18c1   :  { %13105 = vrcp.f32 %v3669_v51 }
0x18ca   :  { %v13104_v52 = vpop.eup %13103 }
0x18cb   :  { %v13106_v55 = vpop.eup %13105  ;;  %v3676_v59 = vmul.f32 %v13104_v52, %v13100_v13 }
0x18cc   :  { %v3675_v58 = vmul.f32 %v13106_v55, %v13102_v43  ;;  %v10395_v55 = vld [vmem:[%s14559_s19 + $0x68] sm:$0xff] }
0x18ce   :  { %11654 = vmatprep.mubr.msk.f32.mxu1 %vm181_vm0, %v3675_v58  ;;  %v12576_v58 = vpack.c.bf16 %v10395_v55, %v10394_v54 }
0x18cf   :  { %11655 = vmatmul.mubr.msk.f32.vlgmr.msra.gmra.mrb[38].mxu1 %vm181_vm0, %v3676_v59  ;;  %v10391_v59 = vld [vmem:[%s14566_s28 + $0x10] sm:$0xff] }
0x18d0   :  { %12545 = vmatpush3.bf16.msra.mxu1 %v12542_v48  ;;  %11675 = vmatprep.mubr.msk.f32.mxu1 %vm361_vm1, %v13808_v1 }
0x18d1   :  { %12547 = vmatprep.subr.bf16.mxu1 %v12546_v28 }
0x18d4   :  { %12549 = vmatpush3.bf16.msra.mxu1 %v12546_v28 }
0x18d5   :  { %12559 = vmatprep.subr.bf16.mxu1 %v12558_v61 }
0x18d7   :  { %11676 = vmatmul.mubr.msk.f32.vlgmr.msra.gmra.mrb[40].mxu1 %vm361_vm1, %v13810_v2 }
0x18d8   :  { %12561 = vmatpush3.bf16.msra.mxu1 %v12558_v61  ;;  %11697 = vmatprep.mubr.msk.f32.mxu1 %vm361_vm1, %v13767_v19  ;;  %v10396_v61 = vld [vmem:[%s14559_s19 + $0x70] sm:$0xff] }
0x18d9   :  { %12563 = vmatprep.subr.bf16.mxu1 %v12562_v0  ;;  %v12580_v4 = vpack.c.bf16 %v10397_v62, %v10396_v61 }
0x18dc   :  { %12565 = vmatpush3.bf16.msra.mxu1 %v12562_v0 }
0x18df   :  { %11698 = vmatmul.mubr.msk.f32.vlgmr.msra.gmra.mrb[42].mxu1 %vm361_vm1, %v13774_v20 }
0x19a2   :  { %v11656_v7 = vpop.f32.mrb[38].mxu1 }
0x19a3   :  { %v3749_v8 = vpop.f32.mrb[39].mxu1 }
0x19a4   :  { %11659 = vmatprep.mubr.msk.f32.mxu0 %vm876_vm2, %v3749_v8 }
0x19a5   :  { %11660 = vmatmul.mubr.msk.f32.vlgmr.msra.gmra.mrb[30].mxu0 %vm876_vm2, %v11656_v7  ;;  %v10411_v7 = vld [vmem:[%s14560_s15 + $0x68] sm:$0xff] }
0x19a6   :  { %11663 = vmatpush3.msra.mxu0 %v3299_v3  ;;  %11664 = vmatprep.mubr.msk.f32.mxu0 %vm876_vm2, %v13869_v16  ;;  %v12592_v8 = vpack.c.bf16 %v10411_v7, %v10410_v5  ;;  %v10427_v5 = vld [vmem:[%s14567_s1] ss:$0 sm:$0xff] }
0x19a7   :  { %12551 = vmatprep.subr.bf16.mxu0 %v12550_v17 }
0x19aa   :  { %v11677_v22 = vpop.f32.mrb[40].mxu1 }
0x19ab   :  { %v4007_v23 = vadd.f32 %v11677_v22, %v10366_v18  ;;  %v4001_v24 = vpop.f32.mrb[41].mxu1 }
0x19ac   :  { %v4002_v30 = vadd.f32 %v10366_v18, %v4001_v24  ;;  %v10413_v18 = vld [vmem:[%s14560_s15 + $0x78] sm:$0xff] }
0x19ad   :  { %11665 = vmatmul.mubr.msk.f32.vlgmr.msra.gmra.mrb[30].mxu0 %vm876_vm2, %v13867_v9  ;;  %v10374_v9 = vld [vmem:[%s14558_s14 + $0x2] ss:$0 sm:$0xff]  ;;  %v10405_v24 = vld [vmem:[%s14555_s29 + $0x78] sm:$0xff] }
0x19ae   :  { %12553 = vmatpush3.bf16.msra.mxu0 %v12550_v17  ;;  %11686 = vmatprep.mubr.msk.f32.mxu0 %vm361_vm1, %v13767_v19  ;;  %v10412_v17 = vld [vmem:[%s14560_s15 + $0x70] sm:$0xff] }
0x19af   :  { %12555 = vmatprep.subr.bf16.mxu0 %v12554_v26  ;;  %v12596_v21 = vpack.c.bf16 %v10413_v18, %v10412_v17 }
0x19b2   :  { %12557 = vmatpush3.bf16.msra.mxu0 %v12554_v26  ;;  %v11699_v16 = vpop.f32.mrb[42].mxu1 }
0x19b3   :  { %v4183_v27 = vadd.f32 %v11699_v16, %v10382_v56  ;;  %v4177_v29 = vpop.f32.mrb[43].mxu1  ;;  %v10399_v16 = vld [vmem:[%s14563_s22 + $0x3] ss:$0 sm:$0xff] }
0x19b4   :  { %v4178_v15 = vadd.f32 %v10382_v56, %v4177_v29 }
0x19b5   :  { %11687 = vmatmul.mubr.msk.f32.vlgmr.msra.gmra.mrb[32].mxu0 %vm361_vm1, %v13774_v20 }
0x19b6   :  { %v12572_v32 = vpack.c.bf16 %v4183_v27, %v4178_v15  ;;  %11704 = vmatprep.mubr.msk.f32.mxu0 %vm876_vm2, %v4002_v30 }
0x19b8   :  { %12573 = vmatprep.subr.bf16.mxu1 %v12572_v32 }
0x19b9   :  { %12575 = vmatpush3.bf16.msra.mxu1 %v12572_v32  ;;  %v10415_v32 = vld [vmem:[%s14564_s23 + $0x3] ss:$0 sm:$0xff] }
0x19ba   :  { %12577 = vmatprep.subr.bf16.mxu1 %v12576_v58 }
0x1a88   :  { %v11688_v33 = vpop.f32.mrb[32].mxu0 }
0x1a89   :  { %v4095_v34 = vadd.f32 %v11688_v33, %v10374_v9  ;;  %v4089_v35 = vpop.f32.mrb[33].mxu0 }
0x1a8a   :  { %v4090_v36 = vadd.f32 %v10374_v9, %v4089_v35 }
0x1a8c   :  { %v12566_v37 = vpack.c.bf16 %v4095_v34, %v4090_v36 }
0x1a8e   :  { %12568 = vmatprep.subr.msk.bf16.mxu0 %vm13596_vm3, %v12566_v37 }
0x1a8f   :  { %12571 = vmatpush3.bf16.xpose.msk.msra.mxu0 %vm13596_vm3, %v12566_v37  ;;  %v10407_v37 = vld [vmem:[%s14558_s14 + $0x3] ss:$0 sm:$0xff] }
0x1a90   :  { %11714 = vmatprep.subr.mxu0 %v10391_v59 }
0x1a96   :  { %11705 = vmatmul.mubr.msk.f32.vlgmr.msra.gmra.mrb[34].mxu0 %vm876_vm2, %v4007_v23  ;;  %v10404_v23 = vld [vmem:[%s14555_s29 + $0x70] sm:$0xff] }
0x1a97   :  { %11715 = vmatpush3.msra.mxu0 %v10391_v59  ;;  %v10424_v59 = vld [vmem:[%s14566_s28 + $0x18] sm:$0xff] }
0x1b69   :  { %v11706_v6 = vpop.f32.mrb[34].mxu0 }
0x1b6a   :  { %v4274_v38 = vmul.f32 0.35355338, %v11706_v6  ;;  %v4264_v39 = vpop.f32.mrb[35].mxu0 }
0x1b6b   :  { %v4273_v40 = vmul.f32 0.35355338, %v4264_v39 }
0x1b6c   :  { %v4276_v41 = vadd.f32 %v4274_v38, %v13833_v10 }
0x1b6d   :  { %v4275_v42 = vadd.f32 %v4273_v40, %v13836_v14 }
0x1b6e   :  { %v4280_v13 = vsel %vm181_vm0, %v4276_v41, -inf }
0x1b6f   :  { %4281 = vmax.xlane.f32.xlu1 %v4280_v13  ;;  %v4277_v43 = vsel %vm181_vm0, %v4275_v42, -inf }
0x1b70   :  { %4278 = vmax.xlane.f32.xlu0 %v4277_v43 }
0x1bfc   :  { %v4282_v44 = vpop.xlane.xlu1 %4281 }
0x1bfd   :  { %v4284_v45 = vsub.f32 %v4276_v41, %v4282_v44  ;;  %v4279_v46 = vpop.xlane.xlu0 %4278 }
0x1bfe   :  { %v4283_v47 = vsub.f32 %v4275_v42, %v4279_v46 }
0x1bff   :  { %v4287_v48 = vmul.f32 1.442695, %v4284_v45 }
0x1c00   :  { %v4285_v49 = vmul.f32 1.442695, %v4283_v47 }
0x1c01   :  { %13107 = vpow2.f32 %v4287_v48 }
0x1c02   :  { %13109 = vpow2.f32 %v4285_v49 }
0x1c0b   :  { %v13108_v50 = vpop.eup %13107 }
0x1c0c   :  { %v13110_v51 = vpop.eup %13109  ;;  %v4292_v52 = vsel %vm181_vm0, %v13108_v50, 0.0 }
0x1c0d   :  { %4293 = vadd.xlane.f32.xlu1 %v4292_v52  ;;  %v4289_v53 = vsel %vm181_vm0, %v13110_v51, 0.0 }
0x1c0e   :  { %4290 = vadd.xlane.f32.xlu0 %v4289_v53 }
0x1c9a   :  { %v4294_v28 = vpop.xlane.xlu1 %4293 }
0x1c9b   :  { %13111 = vrcp.f32 %v4294_v28  ;;  %v4291_v31 = vpop.xlane.xlu0 %4290 }
0x1c9c   :  { %13113 = vrcp.f32 %v4291_v31 }
0x1ca5   :  { %v13112_v60 = vpop.eup %13111 }
0x1ca6   :  { %v13114_v63 = vpop.eup %13113  ;;  %v4298_v3 = vmul.f32 %v13112_v60, %v13108_v50 }
0x1ca7   :  { %v4297_v0 = vmul.f32 %v13114_v63, %v13110_v51 }
0x1ca9   :  { %11711 = vmatprep.mubr.msk.f32.mxu1 %vm181_vm0, %v4297_v0 }
0x1caa   :  { %11712 = vmatmul.mubr.msk.f32.vlgmr.msra.gmra.mrb[44].mxu1 %vm181_vm0, %v4298_v3 }
0x1cab   :  { %12579 = vmatpush3.bf16.msra.mxu1 %v12576_v58  ;;  %11727 = vmatprep.mubr.msk.f32.mxu1 %vm361_vm1, %v13808_v1  ;;  %v10402_v1 = vld [vmem:[%s14555_s29 + $0x60] sm:$0xff] }
0x1cac   :  { %12581 = vmatprep.subr.bf16.mxu1 %v12580_v4  ;;  %v12584_v22 = vpack.c.bf16 %v10403_v57, %v10402_v1 }
0x1cae   :  { %12585 = vmatprep.subr.bf16.mxu0 %v12584_v22 }
0x1caf   :  { %12583 = vmatpush3.bf16.msra.mxu1 %v12580_v4 }
0x1cb0   :  { %12593 = vmatprep.subr.bf16.mxu1 %v12592_v8 }
0x1cb2   :  { %11728 = vmatmul.mubr.msk.f32.vlgmr.msra.gmra.mrb[46].mxu1 %vm361_vm1, %v13810_v2  ;;  %v12588_v2 = vpack.c.bf16 %v10405_v24, %v10404_v23 }
0x1cb3   :  { %12595 = vmatpush3.bf16.msra.mxu1 %v12592_v8  ;;  %11749 = vmatprep.mubr.msk.f32.mxu1 %vm361_vm1, %v13767_v19 }
0x1cb4   :  { %12597 = vmatprep.subr.bf16.mxu1 %v12596_v21 }
0x1cb7   :  { %12599 = vmatpush3.bf16.msra.mxu1 %v12596_v21 }
0x1cba   :  { %11750 = vmatmul.mubr.msk.f32.vlgmr.msra.gmra.mrb[48].mxu1 %vm361_vm1, %v13774_v20 }
0x1d7d   :  { %v11713_v26 = vpop.f32.mrb[44].mxu1 }
0x1d7e   :  { %v4371_v56 = vpop.f32.mrb[45].mxu1 }
0x1d7f   :  { %11716 = vmatprep.mubr.msk.f32.mxu0 %vm876_vm2, %v4371_v56 }
0x1d80   :  { %11717 = vmatmul.mubr.msk.f32.vlgmr.msra.gmra.mrb[30].mxu0 %vm876_vm2, %v11713_v26 }
0x1d81   :  { %12587 = vmatpush3.bf16.msra.mxu0 %v12584_v22  ;;  %11738 = vmatprep.mubr.msk.f32.mxu0 %vm361_vm1, %v13767_v19 }
0x1d82   :  { %12589 = vmatprep.subr.bf16.mxu0 %v12588_v2 }
0x1d85   :  { %v11729_v27 = vpop.f32.mrb[46].mxu1  ;;  %12591 = vmatpush3.bf16.msra.mxu0 %v12588_v2 }
0x1d86   :  { %v4550_v29 = vadd.f32 %v11729_v27, %v10399_v16  ;;  %v4544_v30 = vpop.f32.mrb[47].mxu1 }
0x1d87   :  { %v4545_v15 = vadd.f32 %v10399_v16, %v4544_v30  ;;  %v5064_v30 = vld [vmem:[%s14568_s2 + $0x8] sm:$0xff] }
0x1d88   :  { %11739 = vmatmul.mubr.msk.f32.vlgmr.msra.gmra.mrb[36].mxu0 %vm361_vm1, %v13774_v20 }
0x1d89   :  { %11756 = vmatprep.mubr.msk.f32.mxu0 %vm876_vm2, %v4545_v15 }
0x1d8d   :  { %v11751_v9 = vpop.f32.mrb[48].mxu1 }
0x1d8e   :  { %v4726_v33 = vadd.f32 %v11751_v9, %v10415_v32  ;;  %v4720_v34 = vpop.f32.mrb[49].mxu1  ;;  %v5066_v9 = vld [vmem:[%s14568_s2 + $0x18] sm:$0xff] }
0x1d8f   :  { %v4721_v35 = vadd.f32 %v10415_v32, %v4720_v34  ;;  %v5065_v32 = vld [vmem:[%s14568_s2 + $0x10] sm:$0xff]  ;;  %v5165_v34 = vld [vmem:[%s14569_s7] sm:$0xff] }
0x1d91   :  { %v12606_v36 = vpack.c.bf16 %v4726_v33, %v4721_v35  ;;  %v12614_v33 = vpack.c.bf16 %v5066_v9, %v5065_v32  ;;  %v5166_v35 = vld [vmem:[%s14569_s7 + $0x8] sm:$0xff]  ;;  %v10433_v32 = vld [vmem:[%s14573_s25] ss:$0 sm:$0xff] }
0x1d93   :  { %12607 = vmatprep.subr.bf16.mxu1 %v12606_v36 }
0x1d94   :  { %12609 = vmatpush3.bf16.msra.mxu1 %v12606_v36  ;;  %v5167_v36 = vld [vmem:[%s14569_s7 + $0x10] sm:$0xff] }
0x1e5b   :  { %v11740_v6 = vpop.f32.mrb[36].mxu0 }
0x1e5c   :  { %v4638_v38 = vadd.f32 %v11740_v6, %v10407_v37  ;;  %v4632_v39 = vpop.f32.mrb[37].mxu0  ;;  %v5168_v6 = vld [vmem:[%s14569_s7 + $0x18] sm:$0xff] }
0x1e5d   :  { %v4633_v40 = vadd.f32 %v10407_v37, %v4632_v39  ;;  %v12618_v37 = vpack.c.bf16 %v5166_v35, %v5165_v34  ;;  %v5169_v39 = vld [vmem:[%s14569_s7 + $0x20] sm:$0xff] }
0x1e5f   :  { %v12600_v41 = vpack.c.bf16 %v4638_v38, %v4633_v40  ;;  %v12622_v38 = vpack.c.bf16 %v5168_v6, %v5167_v36  ;;  %v5170_v40 = vld [vmem:[%s14569_s7 + $0x28] sm:$0xff] }
0x1e61   :  { %12602 = vmatprep.subr.msk.bf16.mxu0 %vm13596_vm3, %v12600_v41 }
0x1e62   :  { %12605 = vmatpush3.bf16.xpose.msk.msra.mxu0 %vm13596_vm3, %v12600_v41  ;;  %v12626_v41 = vpack.c.bf16 %v5170_v40, %v5169_v39 }
0x1e63   :  { %11766 = vmatprep.subr.mxu0 %v10424_v59 }
0x1e69   :  { %11757 = vmatmul.mubr.msk.f32.vlgmr.msra.gmra.mrb[38].mxu0 %vm876_vm2, %v4550_v29  ;;  %v5063_v29 = vld [vmem:[%s14568_s2] sm:$0xff] }
0x1e6a   :  { %11767 = vmatpush3.msra.mxu0 %v10424_v59  ;;  %v12610_v15 = vpack.c.bf16 %v5064_v30, %v5063_v29 }
0x1e6b   :  { %12619 = vmatprep.subr.bf16.mxu0 %v12618_v37 }
0x1e6c   :  { %12611 = vmatprep.subr.bf16.mxu1 %v12610_v15 }
0x1f3c   :  { %v11758_v42 = vpop.f32.mrb[38].mxu0 }
0x1f3d   :  { %v4817_v13 = vmul.f32 0.35355338, %v11758_v42  ;;  %v4807_v43 = vpop.f32.mrb[39].mxu0 }
0x1f3e   :  { %v4816_v44 = vmul.f32 0.35355338, %v4807_v43 }
0x1f3f   :  { %v4819_v45 = vadd.f32 %v4817_v13, %v13833_v10 }
0x1f40   :  { %v4818_v46 = vadd.f32 %v4816_v44, %v13836_v14 }
0x1f41   :  { %v4823_v47 = vsel %vm181_vm0, %v4819_v45, -inf }
0x1f42   :  { %4824 = vmax.xlane.f32.xlu1 %v4823_v47  ;;  %v4820_v48 = vsel %vm181_vm0, %v4818_v46, -inf }
0x1f43   :  { %4821 = vmax.xlane.f32.xlu0 %v4820_v48  ;;  %v10428_v48 = vld [vmem:[%s14570_s10] ss:$0 sm:$0xff] }
0x1fcf   :  { %v4825_v49 = vpop.xlane.xlu1 %4824 }
0x1fd0   :  { %v4827_v50 = vsub.f32 %v4819_v45, %v4825_v49  ;;  %v4822_v51 = vpop.xlane.xlu0 %4821 }
0x1fd1   :  { %v4826_v52 = vsub.f32 %v4818_v46, %v4822_v51 }
0x1fd2   :  { %v4830_v53 = vmul.f32 1.442695, %v4827_v50 }
0x1fd3   :  { %v4828_v54 = vmul.f32 1.442695, %v4826_v52  ;;  %v10429_v52 = vld [vmem:[%s14571_s11] ss:$0 sm:$0xff] }
0x1fd4   :  { %13115 = vpow2.f32 %v4830_v53 }
0x1fd5   :  { %13117 = vpow2.f32 %v4828_v54 }
0x1fde   :  { %v13116_v55 = vpop.eup %13115 }
0x1fdf   :  { %v13118_v58 = vpop.eup %13117  ;;  %v4835_v10 = vsel %vm181_vm0, %v13116_v55, 0.0 }
0x1fe0   :  { %4836 = vadd.xlane.f32.xlu1 %v4835_v10  ;;  %v4832_v14 = vsel %vm181_vm0, %v13118_v58, 0.0  ;;  %v5171_v10 = vld [vmem:[%s14569_s7 + $0x30] sm:$0xff] }
0x1fe1   :  { %4833 = vadd.xlane.f32.xlu0 %v4832_v14  ;;  %v5172_v14 = vld [vmem:[%s14569_s7 + $0x38] sm:$0xff] }
0x1fe2   :  { %v12630_v59 = vpack.c.bf16 %v5172_v14, %v5171_v10 }
0x206d   :  { %v4837_v28 = vpop.xlane.xlu1 %4836 }
0x206e   :  { %13119 = vrcp.f32 %v4837_v28  ;;  %v4834_v31 = vpop.xlane.xlu0 %4833  ;;  %v5173_v28 = vld [vmem:[%s14569_s7 + $0x40] sm:$0xff] }
0x206f   :  { %13121 = vrcp.f32 %v4834_v31  ;;  %v5174_v31 = vld [vmem:[%s14569_s7 + $0x48] sm:$0xff] }
0x2078   :  { %v13120_v60 = vpop.eup %13119 }
0x2079   :  { %v13122_v61 = vpop.eup %13121  ;;  %v4841_v63 = vmul.f32 %v13120_v60, %v13116_v55  ;;  %v12634_v60 = vpack.c.bf16 %v5174_v31, %v5173_v28  ;;  %v10436_v31 = vld [vmem:[%s13456_s21 + $0x1] ss:$0 sm:$0xff]  ;;  %s14574_s21 = sld [smem:[#allocation29_spill]] }
0x207a   :  { %v4840_v62 = vmul.f32 %v13122_v61, %v13118_v58  ;;  %v5175_v61 = vld [vmem:[%s14569_s7 + $0x50] sm:$0xff] }
0x207c   :  { %11763 = vmatprep.mubr.msk.f32.mxu1 %vm181_vm0, %v4840_v62  ;;  %v5176_v62 = vld [vmem:[%s14569_s7 + $0x58] sm:$0xff] }
0x207d   :  { %11764 = vmatmul.mubr.msk.f32.vlgmr.msra.gmra.mrb[50].mxu1 %vm181_vm0, %v4841_v63  ;;  %v12638_v63 = vpack.c.bf16 %v5176_v62, %v5175_v61 }
0x207e   :  { %12613 = vmatpush3.bf16.msra.mxu1 %v12610_v15 }
0x207f   :  { %12615 = vmatprep.subr.bf16.mxu1 %v12614_v33 }
0x2082   :  { %12617 = vmatpush3.bf16.msra.mxu1 %v12614_v33 }
0x2150   :  { %v11765_v0 = vpop.f32.mrb[50].mxu1 }
0x2151   :  { %v4914_v3 = vpop.f32.mrb[51].mxu1 }
0x2152   :  { %11768 = vmatprep.mubr.msk.f32.mxu0 %vm876_vm2, %v4914_v3  ;;  %v5178_v3 = vld [vmem:[%s14569_s7 + $0x68] sm:$0xff] }
0x2153   :  { %11769 = vmatmul.mubr.msk.f32.vlgmr.msra.gmra.mrb[30].mxu0 %vm876_vm2, %v11765_v0  ;;  %v5177_v0 = vld [vmem:[%s14569_s7 + $0x60] sm:$0xff] }
0x2154   :  { %12621 = vmatpush3.bf16.msra.mxu0 %v12618_v37 }
0x2155   :  { %12623 = vmatprep.subr.bf16.mxu0 %v12622_v38 }
0x2158   :  { %12625 = vmatpush3.bf16.msra.mxu0 %v12622_v38 }
0x2159   :  { %12627 = vmatprep.subr.bf16.mxu0 %v12626_v41 }
0x215c   :  { %12629 = vmatpush3.bf16.msra.mxu0 %v12626_v41 }
0x215d   :  { %12631 = vmatprep.subr.bf16.mxu0 %v12630_v59 }
0x2160   :  { %12633 = vmatpush3.bf16.msra.mxu0 %v12630_v59 }
0x2161   :  { %12635 = vmatprep.subr.bf16.mxu0 %v12634_v60 }
0x2164   :  { %12637 = vmatpush3.bf16.msra.mxu0 %v12634_v60 }
0x2165   :  { %12639 = vmatprep.subr.bf16.mxu0 %v12638_v63 }
0x2168   :  { %12641 = vmatpush3.bf16.msra.mxu0 %v12638_v63  ;;  %v10437_v63 = vld [vmem:[%s13461_s4 + $0x1] ss:$0 sm:$0xff] }
0x2226   :  { %v11770_v4 = vpop.f32.mrb[30].mxu0 }
0x2227   :  { %v5009_v7 = vadd.f32 %v11770_v4, %v13781_v12  ;;  %v4997_v8 = vpop.f32.mrb[31].mxu0  ;;  %v12642_v4 = vpack.c.bf16 %v5178_v3, %v5177_v0 }
0x2228   :  { %v5008_v17 = vadd.f32 %v4997_v8, %v13783_v25 }
0x2229   :  { %v13982_v18 = vadd.f32 %v10427_v5, %v5009_v7  ;;  %12643 = vmatprep.subr.bf16.mxu0 %v12642_v4  ;;  %v5180_v7 = vld [vmem:[%s14569_s7 + $0x78] sm:$0xff] }
0x222a   :  { %v13984_v21 = vadd.f32 %v10427_v5, %v5008_v17  ;;  %12645 = vmatpush3.bf16.msra.mxu0 %v12642_v4  ;;  %v5179_v5 = vld [vmem:[%s14569_s7 + $0x70] sm:$0xff]  ;;  %v10430_v17 = vld [vmem:[%s14572_s3] ss:$0 sm:$0xff] }
0x222b   :  { %v5024_v1 = vsel %vm361_vm1, %v13982_v18, 0.0  ;;  %v12646_v8 = vpack.c.bf16 %v5180_v7, %v5179_v5  ;;  %v10448_v4 = vld [vmem:[%s13366_s12 + $0x90] sm:$0xff]  ;;  %v10449_v5 = vld [vmem:[%s13366_s12 + $0x98] sm:$0xff] }
0x222c   :  { %5025 = vadd.xlane.f32.xlu1 %v5024_v1  ;;  %v5021_v57 = vsel %vm361_vm1, %v13984_v21, 0.0 }
0x222d   :  { %5022 = vadd.xlane.f32.xlu0 %v5021_v57  ;;  %12647 = vmatprep.subr.bf16.mxu0 %v12646_v8 }
0x222e   :  { %12649 = vmatpush3.bf16.msra.mxu0 %v12646_v8 }
0x22b9   :  { %v5026_v22 = vpop.xlane.xlu1 %5025 }
0x22ba   :  { %v5028_v12 = vmul.f32 0.03125, %v5026_v22  ;;  %v5023_v23 = vpop.xlane.xlu0 %5022 }
0x22bb   :  { %v5027_v25 = vmul.f32 0.03125, %v5023_v23 }
0x22bc   :  { %v5030_v24 = vsub.f32 %v13982_v18, %v5028_v12 }
0x22bd   :  { %v5029_v26 = vsub.f32 %v13984_v21, %v5027_v25 }
0x22be   :  { %v5032_v56 = vmul.f32 %v5030_v24, %v5030_v24 }
0x22bf   :  { %v5031_v2 = vmul.f32 %v5029_v26, %v5029_v26 }
0x22c0   :  { %v5036_v16 = vsel %vm361_vm1, %v5032_v56, 0.0 }
0x22c1   :  { %5037 = vadd.xlane.f32.xlu1 %v5036_v16  ;;  %v5033_v27 = vsel %vm361_vm1, %v5031_v2, 0.0 }
0x22c2   :  { %5034 = vadd.xlane.f32.xlu0 %v5033_v27 }
0x234e   :  { %v5038_v42 = vpop.xlane.xlu1 %5037 }
0x234f   :  { %v5040_v13 = vmul.f32 0.03125, %v5038_v42  ;;  %v5035_v43 = vpop.xlane.xlu0 %5034 }
0x2350   :  { %v5039_v44 = vmul.f32 0.03125, %v5035_v43 }
0x2351   :  { %v5042_v45 = vadd.f32 1e-05, %v5040_v13 }
0x2352   :  { %v5041_v46 = vadd.f32 1e-05, %v5039_v44 }
0x2353   :  { %13123 = vrsqrt.f32 %v5042_v45  ;;  %v10438_v45 = vld [vmem:[%s13356_s30 + $0x80] sm:$0xff] }
0x2354   :  { %13125 = vrsqrt.f32 %v5041_v46  ;;  %v10439_v46 = vld [vmem:[%s13356_s30 + $0x88] sm:$0xff] }
0x235d   :  { %v13124_v47 = vpop.eup %13123 }
0x235e   :  { %v13126_v49 = vpop.eup %13125  ;;  %v5046_v50 = vmul.f32 %v13124_v47, %v5030_v24  ;;  %v12650_v47 = vpack.c.bf16 %v10439_v46, %v10438_v45  ;;  %v10487_v46 = vld [vmem:[%s13376_s27 + $0xb0] sm:$0xff] }
0x235f   :  { %v5045_v51 = vmul.f32 %v13126_v49, %v5029_v26  ;;  %v10441_v49 = vld [vmem:[%s13356_s30 + $0x98] sm:$0xff] }
0x2360   :  { %v5054_v53 = vmul.f32 %v10428_v48, %v5046_v50  ;;  %12651 = vmatprep.subr.bf16.mxu1 %v12650_v47 }
0x2361   :  { %v5053_v54 = vmul.f32 %v10428_v48, %v5045_v51  ;;  %v10440_v48 = vld [vmem:[%s13356_s30 + $0x90] sm:$0xff]  ;;  %v10446_v51 = vld [vmem:[%s13366_s12 + $0x80] sm:$0xff] }
0x2362   :  { %v5062_v58 = vadd.f32 %v10429_v52, %v5054_v53  ;;  %v12654_v50 = vpack.c.bf16 %v10441_v49, %v10440_v48 }
0x2363   :  { %v5061_v55 = vadd.f32 %v10429_v52, %v5053_v54  ;;  %v10447_v52 = vld [vmem:[%s13366_s12 + $0x88] sm:$0xff] }
0x2364   :  { %v12658_v53 = vpack.c.bf16 %v10447_v52, %v10446_v51 }
0x2365   :  { %11779 = vmatprep.mubr.msk.f32.mxu1 %vm361_vm1, %v5061_v55 }
0x2366   :  { %11780 = vmatmul.mubr.msk.f32.vlgmr.msra.gmra.mrb[52].mxu1 %vm361_vm1, %v5062_v58 }
0x2367   :  { %12653 = vmatpush3.bf16.msra.mxu1 %v12650_v47  ;;  %v10488_v47 = vld [vmem:[%s13376_s27 + $0xb8] sm:$0xff] }
0x2368   :  { %12655 = vmatprep.subr.bf16.mxu1 %v12654_v50  ;;  %v12704_v48 = vpack.c.bf16 %v10488_v47, %v10487_v46 }
0x236b   :  { %12657 = vmatpush3.bf16.msra.mxu1 %v12654_v50 }
0x236c   :  { %12659 = vmatprep.subr.bf16.mxu1 %v12658_v53 }
0x2439   :  { %v11781_v1 = vpop.f32.mrb[52].mxu1 }
0x243a   :  { %v5152_v57 = vadd.f32 %v11781_v1, %v10430_v17  ;;  %v5146_v22 = vpop.f32.mrb[53].mxu1  ;;  %v10454_v1 = vld [vmem:[%s13376_s27 + $0x80] sm:$0xff] }
0x243b   :  { %v5147_v12 = vadd.f32 %v10430_v17, %v5146_v22  ;;  %v12662_v17 = vpack.c.bf16 %v10449_v5, %v10448_v4 }
0x243c   :  { %v5158_v23 = vmul.f32 0.70710677, %v5152_v57  ;;  %v5156_v27 = vmul.f32 0.5, %v5152_v57  ;;  %v10455_v57 = vld [vmem:[%s13376_s27 + $0x88] sm:$0xff] }
0x243d   :  { %v5157_v25 = vmul.f32 0.70710677, %v5147_v12  ;;  %v5155_v2 = vmul.f32 0.5, %v5147_v12  ;;  %v12666_v22 = vpack.c.bf16 %v10455_v57, %v10454_v1  ;;  %v10456_v12 = vld [vmem:[%s13376_s27 + $0x90] sm:$0xff] }
0x243e   :  { %13127 = verf.f32 %v5158_v23  ;;  %v10457_v23 = vld [vmem:[%s13376_s27 + $0x98] sm:$0xff] }
0x243f   :  { %13129 = verf.f32 %v5157_v25  ;;  %v12670_v25 = vpack.c.bf16 %v10457_v23, %v10456_v12 }
0x2448   :  { %v13128_v24 = vpop.eup %13127 }
0x2449   :  { %v13130_v26 = vpop.eup %13129  ;;  %v5162_v56 = vadd.f32 1.0, %v13128_v24  ;;  %v10443_v24 = vld [vmem:[%s14548_s0 + $0x4] ss:$0 sm:$0xff] }
0x244a   :  { %v5161_v16 = vadd.f32 1.0, %v13130_v26 }
0x244b   :  { %v5164_v30 = vmul.f32 %v5162_v56, %v5156_v27 }
0x244c   :  { %v5163_v29 = vmul.f32 %v5161_v16, %v5155_v2  ;;  %v10451_v16 = vld [vmem:[%s14549_s5 + $0x4] ss:$0 sm:$0xff] }
0x244e   :  { %11814 = vmatprep.mubr.f32.mxu0 %v5163_v29 }
0x244f   :  { %11815 = vmatmul.mubr.f32.vlgmr.msra.gmra.mrb[40].mxu0 %v5164_v30 }
0x2522   :  { %v11816_v15 = vpop.f32.mrb[40].mxu0 }
0x2523   :  { %v5257_v9 = vadd.f32 %v11816_v15, %v13982_v18  ;;  %v5247_v33 = vpop.f32.mrb[41].mxu0  ;;  %v10469_v15 = vld [vmem:[%s13356_s30 + $0xa0] sm:$0xff] }
0x2524   :  { %v5256_v34 = vadd.f32 %v5247_v33, %v13984_v21 }
0x2525   :  { %v14022_v35 = vadd.f32 %v10433_v32, %v5257_v9 }
0x2526   :  { %v14024_v36 = vadd.f32 %v10433_v32, %v5256_v34  ;;  %v10470_v32 = vld [vmem:[%s13356_s30 + $0xa8] sm:$0xff] }
0x2527   :  { %v5274_v37 = vsel %vm361_vm1, %v14022_v35, 0.0  ;;  %v12684_v34 = vpack.c.bf16 %v10470_v32, %v10469_v15  ;;  %v10479_v15 = vld [vmem:[%s13366_s12 + $0xb0] sm:$0xff]  ;;  %v10480_v32 = vld [vmem:[%s13366_s12 + $0xb8] sm:$0xff] }
0x2528   :  { %5275 = vadd.xlane.f32.xlu1 %v5274_v37  ;;  %v5271_v6 = vsel %vm361_vm1, %v14024_v36, 0.0  ;;  %v10459_v37 = vld [vmem:[%s14550_s9 + $0x4] ss:$0 sm:$0xff] }
0x2529   :  { %5272 = vadd.xlane.f32.xlu0 %v5271_v6 }
0x25b5   :  { %v5276_v38 = vpop.xlane.xlu1 %5275 }
0x25b6   :  { %v5278_v39 = vmul.f32 0.03125, %v5276_v38  ;;  %v5273_v18 = vpop.xlane.xlu0 %5272 }
0x25b7   :  { %v5277_v21 = vmul.f32 0.03125, %v5273_v18  ;;  %v10471_v18 = vld [vmem:[%s13356_s30 + $0xb0] sm:$0xff] }
0x25b8   :  { %v5280_v40 = vsub.f32 %v14022_v35, %v5278_v39 }
0x25b9   :  { %v5279_v41 = vsub.f32 %v14024_v36, %v5277_v21  ;;  %v10472_v21 = vld [vmem:[%s13356_s30 + $0xb8] sm:$0xff] }
0x25ba   :  { %v5282_v42 = vmul.f32 %v5280_v40, %v5280_v40 }
0x25bb   :  { %v5281_v13 = vmul.f32 %v5279_v41, %v5279_v41 }
0x25bc   :  { %v5286_v43 = vsel %vm361_vm1, %v5282_v42, 0.0 }
0x25bd   :  { %5287 = vadd.xlane.f32.xlu1 %v5286_v43  ;;  %v5283_v44 = vsel %vm361_vm1, %v5281_v13, 0.0  ;;  %v12688_v13 = vpack.c.bf16 %v10472_v21, %v10471_v18  ;;  %v10485_v43 = vld [vmem:[%s13376_s27 + $0xa0] sm:$0xff] }
0x25be   :  { %5284 = vadd.xlane.f32.xlu0 %v5283_v44  ;;  %v10486_v44 = vld [vmem:[%s13376_s27 + $0xa8] sm:$0xff]  ;;  %v10482_v18 = vld [vmem:[%s14549_s5 + $0x5] ss:$0 sm:$0xff] }
0x25bf   :  { %v12700_v45 = vpack.c.bf16 %v10486_v44, %v10485_v43 }
0x264a   :  { %v5288_v54 = vpop.xlane.xlu1 %5287 }
0x264b   :  { %v5290_v55 = vmul.f32 0.03125, %v5288_v54  ;;  %v5285_v58 = vpop.xlane.xlu0 %5284 }
0x264c   :  { %v5289_v10 = vmul.f32 0.03125, %v5285_v58 }
0x264d   :  { %v5292_v14 = vadd.f32 1e-05, %v5290_v55  ;;  %v14094_v55 = vld [vmem:[%s14553_s13] sm:$0xff] }
0x264e   :  { %v5291_v59 = vadd.f32 1e-05, %v5289_v10 }
0x264f   :  { %13131 = vrsqrt.f32 %v5292_v14 }
0x2650   :  { %13133 = vrsqrt.f32 %v5291_v59  ;;  %v10474_v59 = vld [vmem:[%s14548_s0 + $0x5] ss:$0 sm:$0xff] }
0x2659   :  { %v13132_v28 = vpop.eup %13131 }
0x265a   :  { %v13134_v60 = vpop.eup %13133  ;;  %v5296_v61 = vmul.f32 %v13132_v28, %v5280_v40 }
0x265b   :  { %v5295_v62 = vmul.f32 %v13134_v60, %v5279_v41 }
0x265c   :  { %v5304_v0 = vmul.f32 %v10436_v31, %v5296_v61  ;;  %v10490_v61 = vld [vmem:[%s14550_s9 + $0x5] ss:$0 sm:$0xff] }
0x265d   :  { %v5303_v3 = vmul.f32 %v10436_v31, %v5295_v62 }
0x265e   :  { %v14046_v8 = vadd.f32 %v10437_v63, %v5304_v0 }
0x265f   :  { %v14044_v7 = vadd.f32 %v10437_v63, %v5303_v3 }
0x2661   :  { %11825 = vmatprep.mubr.msk.f32.mxu1 %vm361_vm1, %v14044_v7 }
0x2662   :  { %11826 = vmatmul.mubr.msk.f32.vlgmr.msra.gmra.mrb[54].mxu1 %vm361_vm1, %v14046_v8 }
0x2663   :  { %12661 = vmatpush3.bf16.msra.mxu1 %v12658_v53  ;;  %11836 = vmatprep.mubr.msk.f32.mxu1 %vm361_vm1, %v14044_v7  ;;  %v14090_v53 = vld [vmem:[%s14553_s13 + $0x8] sm:$0xff] }
0x2664   :  { %12663 = vmatprep.subr.bf16.mxu1 %v12662_v17 }
0x2667   :  { %12665 = vmatpush3.bf16.msra.mxu1 %v12662_v17 }
0x2668   :  { %12667 = vmatprep.subr.bf16.mxu1 %v12666_v22 }
0x266a   :  { %11837 = vmatmul.mubr.msk.f32.vlgmr.msra.gmra.mrb[56].mxu1 %vm361_vm1, %v14046_v8 }
0x266b   :  { %12669 = vmatpush3.bf16.msra.mxu1 %v12666_v22  ;;  %11847 = vmatprep.mubr.msk.f32.mxu1 %vm361_vm1, %v14044_v7 }
0x266c   :  { %12671 = vmatprep.subr.bf16.mxu1 %v12670_v25 }
0x266f   :  { %12673 = vmatpush3.bf16.msra.mxu1 %v12670_v25 }
0x2672   :  { %11848 = vmatmul.mubr.msk.f32.vlgmr.msra.gmra.mrb[58].mxu1 %vm361_vm1, %v14046_v8 }
0x2735   :  { %v11827_v26 = vpop.f32.mrb[54].mxu1 }
0x2736   :  { %v5398_v56 = vpop.f32.mrb[55].mxu1  ;;  %v5404_v41 = vadd.f32 %v11827_v26, %v10443_v24 }
0x2737   :  { %v5399_v2 = vadd.f32 %v10443_v24, %v5398_v56  ;;  %v10477_v56 = vld [vmem:[%s13366_s12 + $0xa0] sm:$0xff] }
0x2739   :  { %11854 = vmatprep.mubr.msk.f32.mxu1 %vm876_vm2, %v5399_v2  ;;  %v10478_v2 = vld [vmem:[%s13366_s12 + $0xa8] sm:$0xff] }
0x273d   :  { %v11838_v27 = vpop.f32.mrb[56].mxu1 }
0x273e   :  { %v5492_v29 = vadd.f32 %v11838_v27, %v10451_v16  ;;  %v5486_v30 = vpop.f32.mrb[57].mxu1 }
0x273f   :  { %v5487_v9 = vadd.f32 %v10451_v16, %v5486_v30  ;;  %v12692_v16 = vpack.c.bf16 %v10478_v2, %v10477_v56  ;;  %v10522_v56 = vld [vmem:[%s13376_s27 + $0xd0] sm:$0xff]  ;;  %v10523_v2 = vld [vmem:[%s13376_s27 + $0xd8] sm:$0xff] }
0x2741   :  { %v12674_v33 = vpack.c.bf16 %v5492_v29, %v5487_v9 }
0x2743   :  { %12676 = vmatprep.subr.msk.bf16.mxu1 %vm13596_vm3, %v12674_v33 }
0x2744   :  { %12679 = vmatpush3.bf16.xpose.msk.msra.mxu1 %vm13596_vm3, %v12674_v33 }
0x2745   :  { %v11849_v6 = vpop.f32.mrb[58].mxu1  ;;  %12685 = vmatprep.subr.bf16.mxu1 %v12684_v34 }
0x2746   :  { %v5580_v38 = vadd.f32 %v11849_v6, %v10459_v37  ;;  %v5574_v39 = vpop.f32.mrb[59].mxu1 }
0x2747   :  { %v5575_v40 = vadd.f32 %v10459_v37, %v5574_v39  ;;  %v12696_v37 = vpack.c.bf16 %v10480_v32, %v10479_v15 }
0x2749   :  { %v12680_v42 = vpack.c.bf16 %v5580_v38, %v5575_v40 }
0x274b   :  { %11855 = vmatmul.mubr.msk.f32.vlgmr.msra.gmra.mrb[60].mxu1 %vm876_vm2, %v5404_v41  ;;  %12681 = vmatprep.subr.bf16.mxu0 %v12680_v42 }
0x274c   :  { %12683 = vmatpush3.bf16.msra.mxu0 %v12680_v42  ;;  %12687 = vmatpush3.bf16.msra.mxu1 %v12684_v34 }
0x274d   :  { %11872 = vmatprep.mubr.msk.f32.mxu1 %vm361_vm1, %v14044_v7  ;;  %12689 = vmatprep.subr.bf16.mxu1 %v12688_v13 }
0x274e   :  { %12693 = vmatprep.subr.bf16.mxu0 %v12692_v16 }
0x2750   :  { %12691 = vmatpush3.bf16.msra.mxu1 %v12688_v13 }
0x2751   :  { %12701 = vmatprep.subr.bf16.mxu1 %v12700_v45 }
0x2753   :  { %11873 = vmatmul.mubr.msk.f32.vlgmr.msra.gmra.mrb[62].mxu1 %vm361_vm1, %v14046_v8 }
0x2754   :  { %12703 = vmatpush3.bf16.msra.mxu1 %v12700_v45  ;;  %11894 = vmatprep.mubr.msk.f32.mxu1 %vm361_vm1, %v14044_v7 }
0x2755   :  { %12705 = vmatprep.subr.bf16.mxu1 %v12704_v48 }
0x2758   :  { %12707 = vmatpush3.bf16.msra.mxu1 %v12704_v48 }
0x275b   :  { %11895 = vmatmul.mubr.msk.f32.vlgmr.msra.gmra.mrb[64].mxu1 %vm361_vm1, %v14046_v8 }
0x281e   :  { %v11856_v49 = vpop.f32.mrb[60].mxu1 }
0x281f   :  { %v5671_v50 = vmul.f32 0.35355338, %v11856_v49  ;;  %v5661_v51 = vpop.f32.mrb[61].mxu1 }
0x2820   :  { %v5670_v52 = vmul.f32 0.35355338, %v5661_v51 }
0x2821   :  { %v5673_v54 = vadd.f32 %v14090_v53, %v5671_v50 }
0x2822   :  { %v5672_v58 = vadd.f32 %v14094_v55, %v5670_v52 }
0x2823   :  { %v5677_v10 = vsel %vm181_vm0, %v5673_v54, -inf }
0x2824   :  { %5678 = vmax.xlane.f32.xlu1 %v5677_v10  ;;  %v5674_v14 = vsel %vm181_vm0, %v5672_v58, -inf }
0x2825   :  { %5675 = vmax.xlane.f32.xlu0 %v5674_v14 }
0x2826   :  { %v11874_v28 = vpop.f32.mrb[62].mxu1 }
0x2827   :  { %v5864_v31 = vadd.f32 %v11874_v28, %v10474_v59  ;;  %v5858_v60 = vpop.f32.mrb[63].mxu1 }
0x2828   :  { %v5859_v6 = vadd.f32 %v10474_v59, %v5858_v60 }
0x282e   :  { %v11896_v62 = vpop.f32.mrb[64].mxu1 }
0x282f   :  { %v6040_v63 = vadd.f32 %v11896_v62, %v10490_v61  ;;  %v6034_v0 = vpop.f32.mrb[65].mxu1  ;;  %v10505_v62 = vld [vmem:[%s13356_s30 + $0xc8] sm:$0xff] }
0x2830   :  { %v6035_v3 = vadd.f32 %v10490_v61, %v6034_v0  ;;  %v10504_v61 = vld [vmem:[%s13356_s30 + $0xc0] sm:$0xff]  ;;  %v10499_v0 = vld [vmem:[%s14554_s17 + $0x28] sm:$0xff] }
0x2832   :  { %v12714_v4 = vpack.c.bf16 %v6040_v63, %v6035_v3  ;;  %v12718_v63 = vpack.c.bf16 %v10505_v62, %v10504_v61 }
0x2834   :  { %12715 = vmatprep.subr.bf16.mxu1 %v12714_v4 }
0x2835   :  { %12717 = vmatpush3.bf16.msra.mxu1 %v12714_v4 }
0x2836   :  { %12719 = vmatprep.subr.bf16.mxu1 %v12718_v63 }
0x28b1   :  { %v5679_v5 = vpop.xlane.xlu1 %5678 }
0x28b2   :  { %v5681_v17 = vsub.f32 %v5673_v54, %v5679_v5  ;;  %v5676_v1 = vpop.xlane.xlu0 %5675 }
0x28b3   :  { %v5680_v57 = vsub.f32 %v5672_v58, %v5676_v1  ;;  %v10507_v1 = vld [vmem:[%s13356_s30 + $0xd8] sm:$0xff] }
0x28b4   :  { %v5684_v22 = vmul.f32 1.442695, %v5681_v17  ;;  %v10506_v17 = vld [vmem:[%s13356_s30 + $0xd0] sm:$0xff] }
0x28b5   :  { %v5682_v12 = vmul.f32 1.442695, %v5680_v57 }
0x28b6   :  { %13135 = vpow2.f32 %v5684_v22 }
0x28b7   :  { %13137 = vpow2.f32 %v5682_v12 }
0x28c0   :  { %v13136_v23 = vpop.eup %13135 }
0x28c1   :  { %v13138_v25 = vpop.eup %13137  ;;  %v5689_v24 = vsel %vm181_vm0, %v13136_v23, 0.0 }
0x28c2   :  { %5690 = vadd.xlane.f32.xlu1 %v5689_v24  ;;  %v5686_v26 = vsel %vm181_vm0, %v13138_v25, 0.0  ;;  %v10521_v24 = vld [vmem:[%s13376_s27 + $0xc8] sm:$0xff] }
0x28c3   :  { %5687 = vadd.xlane.f32.xlu0 %v5686_v26 }
0x294f   :  { %v5691_v27 = vpop.xlane.xlu1 %5690 }
0x2950   :  { %13139 = vrcp.f32 %v5691_v27  ;;  %v5688_v29 = vpop.xlane.xlu0 %5687  ;;  %v10468_v27 = vld [vmem:[%s14554_s17 + $0x20] sm:$0xff] }
0x2951   :  { %13141 = vrcp.f32 %v5688_v29  ;;  %v10512_v29 = vld [vmem:[%s13366_s12 + $0xc0] sm:$0xff] }
0x295a   :  { %v13140_v30 = vpop.eup %13139 }
0x295b   :  { %v13142_v9 = vpop.eup %13141  ;;  %v5695_v34 = vmul.f32 %v13140_v30, %v13136_v23  ;;  %v12722_v23 = vpack.c.bf16 %v10507_v1, %v10506_v17  ;;  %v10513_v30 = vld [vmem:[%s13366_s12 + $0xc8] sm:$0xff]  ;;  %v10537_v1 = vld [vmem:[%s13356_s30 + $0xe0] sm:$0xff] }
0x295c   :  { %v5694_v33 = vmul.f32 %v13142_v9, %v13138_v25  ;;  %v10520_v25 = vld [vmem:[%s13376_s27 + $0xc0] sm:$0xff]  ;;  %v12726_v9 = vpack.c.bf16 %v10513_v30, %v10512_v29 }
0x295d   :  { %v12734_v26 = vpack.c.bf16 %v10521_v24, %v10520_v25  ;;  %v10553_v30 = vld [vmem:[%s13376_s27 + $0xe0] sm:$0xff] }
0x295e   :  { %11861 = vmatprep.mubr.msk.f32.mxu0 %vm181_vm0, %v5694_v33  ;;  %v10509_v33 = vld [vmem:[%s14548_s0 + $0x6] ss:$0 sm:$0xff] }
0x295f   :  { %11862 = vmatmul.mubr.msk.f32.vlgmr.msra.gmra.mrb[42].mxu0 %vm181_vm0, %v5695_v34  ;;  %v10514_v34 = vld [vmem:[%s13366_s12 + $0xd0] sm:$0xff] }
0x2960   :  { %12695 = vmatpush3.bf16.msra.mxu0 %v12692_v16  ;;  %11883 = vmatprep.mubr.msk.f32.mxu0 %vm361_vm1, %v14044_v7  ;;  %v12738_v16 = vpack.c.bf16 %v10523_v2, %v10522_v56  ;;  %v10540_v56 = vld [vmem:[%s13356_s30 + $0xf8] sm:$0xff] }
0x2961   :  { %12697 = vmatprep.subr.bf16.mxu0 %v12696_v37 }
0x2964   :  { %12699 = vmatpush3.bf16.msra.mxu0 %v12696_v37  ;;  %v10515_v37 = vld [vmem:[%s13366_s12 + $0xd8] sm:$0xff] }
0x2967   :  { %11884 = vmatmul.mubr.msk.f32.vlgmr.msra.gmra.mrb[44].mxu0 %vm361_vm1, %v14046_v8 }
0x2968   :  { %11901 = vmatprep.mubr.msk.f32.mxu0 %vm876_vm2, %v5859_v6 }
0x2a32   :  { %v14114_v38 = vpop.f32.mrb[42].mxu0 }
0x2a33   :  { %v14116_v39 = vpop.f32.mrb[43].mxu0 }
0x2a3a   :  { %v11885_v21 = vpop.f32.mrb[44].mxu0 }
0x2a3b   :  { %v5952_v40 = vadd.f32 %v11885_v21, %v10482_v18  ;;  %v5946_v41 = vpop.f32.mrb[45].mxu0 }
0x2a3c   :  { %v5947_v42 = vadd.f32 %v10482_v18, %v5946_v41  ;;  %v10525_v41 = vld [vmem:[%s14550_s9 + $0x6] ss:$0 sm:$0xff] }
0x2a3e   :  { %v12708_v13 = vpack.c.bf16 %v5952_v40, %v5947_v42  ;;  %v12730_v40 = vpack.c.bf16 %v10515_v37, %v10514_v34  ;;  %v10545_v37 = vld [vmem:[%s13366_s12 + $0xe0] sm:$0xff] }
0x2a40   :  { %12710 = vmatprep.subr.msk.bf16.mxu0 %vm13596_vm3, %v12708_v13 }
0x2a41   :  { %12713 = vmatpush3.bf16.xpose.msk.msra.mxu0 %vm13596_vm3, %v12708_v13 }
0x2a42   :  { %11911 = vmatprep.subr.mxu0 %v10499_v0 }
0x2a48   :  { %11902 = vmatmul.mubr.msk.f32.vlgmr.msra.gmra.mrb[46].mxu0 %vm876_vm2, %v5864_v31 }
0x2a49   :  { %11912 = vmatpush3.msra.mxu0 %v10499_v0 }
0x2a4a   :  { %11916 = vmatprep.subr.mxu0 %v10468_v27 }
0x2b1b   :  { %v11903_v43 = vpop.f32.mrb[46].mxu0 }
0x2b1c   :  { %v6131_v44 = vmul.f32 0.35355338, %v11903_v43  ;;  %v6121_v45 = vpop.f32.mrb[47].mxu0 }
0x2b1d   :  { %v6130_v46 = vmul.f32 0.35355338, %v6121_v45 }
0x2b1e   :  { %v6133_v47 = vadd.f32 %v14090_v53, %v6131_v44 }
0x2b1f   :  { %v6132_v48 = vadd.f32 %v14094_v55, %v6130_v46 }
0x2b20   :  { %v6137_v49 = vsel %vm181_vm0, %v6133_v47, -inf }
0x2b21   :  { %6138 = vmax.xlane.f32.xlu1 %v6137_v49  ;;  %v6134_v50 = vsel %vm181_vm0, %v6132_v48, -inf }
0x2b22   :  { %6135 = vmax.xlane.f32.xlu0 %v6134_v50 }
0x2bae   :  { %v6139_v51 = vpop.xlane.xlu1 %6138 }
0x2baf   :  { %v6141_v52 = vsub.f32 %v6133_v47, %v6139_v51  ;;  %v6136_v54 = vpop.xlane.xlu0 %6135 }
0x2bb0   :  { %v6140_v58 = vsub.f32 %v6132_v48, %v6136_v54 }
0x2bb1   :  { %v6144_v10 = vmul.f32 1.442695, %v6141_v52 }
0x2bb2   :  { %v6142_v14 = vmul.f32 1.442695, %v6140_v58 }
0x2bb3   :  { %13143 = vpow2.f32 %v6144_v10 }
0x2bb4   :  { %13145 = vpow2.f32 %v6142_v14 }
0x2bbd   :  { %v13144_v59 = vpop.eup %13143 }
0x2bbe   :  { %v13146_v28 = vpop.eup %13145  ;;  %v6149_v31 = vsel %vm181_vm0, %v13144_v59, 0.0 }
0x2bbf   :  { %6150 = vadd.xlane.f32.xlu1 %v6149_v31  ;;  %v6146_v60 = vsel %vm181_vm0, %v13146_v28, 0.0 }
0x2bc0   :  { %6147 = vadd.xlane.f32.xlu0 %v6146_v60 }
0x2c4c   :  { %v6151_v3 = vpop.xlane.xlu1 %6150 }
0x2c4d   :  { %13147 = vrcp.f32 %v6151_v3  ;;  %v6148_v4 = vpop.xlane.xlu0 %6147 }
0x2c4e   :  { %13149 = vrcp.f32 %v6148_v4 }
0x2c57   :  { %v13148_v5 = vpop.eup %13147 }
0x2c58   :  { %v13150_v57 = vpop.eup %13149  ;;  %v6155_v12 = vmul.f32 %v13148_v5, %v13144_v59 }
0x2c59   :  { %v6154_v22 = vmul.f32 %v13150_v57, %v13146_v28  ;;  %v10538_v57 = vld [vmem:[%s13356_s30 + $0xe8] sm:$0xff] }
0x2c5b   :  { %11908 = vmatprep.mubr.msk.f32.mxu1 %vm181_vm0, %v6154_v22  ;;  %v12752_v22 = vpack.c.bf16 %v10538_v57, %v10537_v1 }
0x2c5c   :  { %11909 = vmatmul.mubr.msk.f32.vlgmr.msra.gmra.mrb[66].mxu1 %vm181_vm0, %v6155_v12  ;;  %v10534_v12 = vld [vmem:[%s14554_s17 + $0x30] sm:$0xff] }
0x2c5d   :  { %12721 = vmatpush3.bf16.msra.mxu1 %v12718_v63  ;;  %11929 = vmatprep.mubr.msk.f32.mxu1 %vm361_vm1, %v14044_v7 }
0x2c5e   :  { %12723 = vmatprep.subr.bf16.mxu1 %v12722_v23 }
0x2c61   :  { %12725 = vmatpush3.bf16.msra.mxu1 %v12722_v23 }
0x2c62   :  { %12735 = vmatprep.subr.bf16.mxu1 %v12734_v26 }
0x2c64   :  { %11930 = vmatmul.mubr.msk.f32.vlgmr.msra.gmra.mrb[68].mxu1 %vm361_vm1, %v14046_v8 }
0x2c65   :  { %12737 = vmatpush3.bf16.msra.mxu1 %v12734_v26  ;;  %11951 = vmatprep.mubr.msk.f32.mxu1 %vm361_vm1, %v14044_v7  ;;  %v10539_v26 = vld [vmem:[%s13356_s30 + $0xf0] sm:$0xff] }
0x2c66   :  { %12739 = vmatprep.subr.bf16.mxu1 %v12738_v16  ;;  %v12756_v29 = vpack.c.bf16 %v10540_v56, %v10539_v26 }
0x2c69   :  { %12741 = vmatpush3.bf16.msra.mxu1 %v12738_v16 }
0x2c6c   :  { %11952 = vmatmul.mubr.msk.f32.vlgmr.msra.gmra.mrb[70].mxu1 %vm361_vm1, %v14046_v8 }
0x2d2f   :  { %v11910_v15 = vpop.f32.mrb[66].mxu1 }
0x2d30   :  { %v6228_v32 = vpop.f32.mrb[67].mxu1 }
0x2d31   :  { %11913 = vmatprep.mubr.msk.f32.mxu0 %vm876_vm2, %v6228_v32 }
0x2d32   :  { %11914 = vmatmul.mubr.msk.f32.vlgmr.msra.gmra.mrb[48].mxu0 %vm876_vm2, %v11910_v15  ;;  %v10554_v15 = vld [vmem:[%s13376_s27 + $0xe8] sm:$0xff] }
0x2d33   :  { %11917 = vmatpush3.msra.mxu0 %v10468_v27  ;;  %11918 = vmatprep.mubr.msk.f32.mxu0 %vm876_vm2, %v14116_v39  ;;  %v12768_v32 = vpack.c.bf16 %v10554_v15, %v10553_v30  ;;  %v10586_v30 = vld [vmem:[%s14555_s29 + $0x90] sm:$0xff]  ;;  %v10587_v15 = vld [vmem:[%s14555_s29 + $0x98] sm:$0xff] }
0x2d34   :  { %12727 = vmatprep.subr.bf16.mxu0 %v12726_v9 }
0x2d37   :  { %v11931_v6 = vpop.f32.mrb[68].mxu1 }
0x2d38   :  { %v6486_v18 = vadd.f32 %v11931_v6, %v10509_v33  ;;  %v6480_v21 = vpop.f32.mrb[69].mxu1  ;;  %v10546_v6 = vld [vmem:[%s13366_s12 + $0xe8] sm:$0xff] }
0x2d39   :  { %v6481_v43 = vadd.f32 %v10509_v33, %v6480_v21  ;;  %v10556_v33 = vld [vmem:[%s13376_s27 + $0xf8] sm:$0xff]  ;;  %v10547_v21 = vld [vmem:[%s13366_s12 + $0xf0] sm:$0xff] }
0x2d3a   :  { %11919 = vmatmul.mubr.msk.f32.vlgmr.msra.gmra.mrb[48].mxu0 %vm876_vm2, %v14114_v38  ;;  %v10517_v38 = vld [vmem:[%s14549_s5 + $0x6] ss:$0 sm:$0xff] }
0x2d3b   :  { %12729 = vmatpush3.bf16.msra.mxu0 %v12726_v9  ;;  %11940 = vmatprep.mubr.msk.f32.mxu0 %vm361_vm1, %v14044_v7  ;;  %v10555_v9 = vld [vmem:[%s13376_s27 + $0xf0] sm:$0xff] }
0x2d3c   :  { %12731 = vmatprep.subr.bf16.mxu0 %v12730_v40  ;;  %v12772_v34 = vpack.c.bf16 %v10556_v33, %v10555_v9  ;;  %v12798_v33 = vpack.c.bf16 %v10587_v15, %v10586_v30  ;;  %v10581_v30 = vld [vmem:[%s14563_s22 + $0x4] ss:$0 sm:$0xff] }
0x2d3f   :  { %12733 = vmatpush3.bf16.msra.mxu0 %v12730_v40  ;;  %v11953_v39 = vpop.f32.mrb[70].mxu1  ;;  %v10548_v40 = vld [vmem:[%s13366_s12 + $0xf8] sm:$0xff] }
0x2d40   :  { %v6662_v42 = vadd.f32 %v11953_v39, %v10525_v41  ;;  %v6656_v13 = vpop.f32.mrb[71].mxu1 }
0x2d41   :  { %v6657_v44 = vadd.f32 %v10525_v41, %v6656_v13  ;;  %v10542_v13 = vld [vmem:[%s14548_s0 + $0x7] ss:$0 sm:$0xff] }
0x2d42   :  { %11941 = vmatmul.mubr.msk.f32.vlgmr.msra.gmra.mrb[50].mxu0 %vm361_vm1, %v14046_v8 }
0x2d43   :  { %v12748_v45 = vpack.c.bf16 %v6662_v42, %v6657_v44  ;;  %11958 = vmatprep.mubr.msk.f32.mxu0 %vm876_vm2, %v6481_v43  ;;  %v12764_v42 = vpack.c.bf16 %v10548_v40, %v10547_v21 }
0x2d45   :  { %12749 = vmatprep.subr.bf16.mxu1 %v12748_v45 }
0x2d46   :  { %12751 = vmatpush3.bf16.msra.mxu1 %v12748_v45 }
0x2d47   :  { %12753 = vmatprep.subr.bf16.mxu1 %v12752_v22 }
0x2e15   :  { %v11942_v46 = vpop.f32.mrb[50].mxu0 }
0x2e16   :  { %v6574_v47 = vadd.f32 %v11942_v46, %v10517_v38  ;;  %v6568_v48 = vpop.f32.mrb[51].mxu0  ;;  %v10558_v46 = vld [vmem:[%s14550_s9 + $0x7] ss:$0 sm:$0xff] }
0x2e17   :  { %v6569_v49 = vadd.f32 %v10517_v38, %v6568_v48 }
0x2e19   :  { %v12742_v50 = vpack.c.bf16 %v6574_v47, %v6569_v49 }
0x2e1b   :  { %12744 = vmatprep.subr.msk.bf16.mxu0 %vm13596_vm3, %v12742_v50 }
0x2e1c   :  { %12747 = vmatpush3.bf16.xpose.msk.msra.mxu0 %vm13596_vm3, %v12742_v50 }
0x2e1d   :  { %11968 = vmatprep.subr.mxu0 %v10534_v12 }
0x2e23   :  { %11959 = vmatmul.mubr.msk.f32.vlgmr.msra.gmra.mrb[52].mxu0 %vm876_vm2, %v6486_v18  ;;  %v12760_v18 = vpack.c.bf16 %v10546_v6, %v10545_v37  ;;  %v10571_v37 = vld [vmem:[%s14557_s8 + $0x1] ss:$0 sm:$0xff] }
0x2e24   :  { %11969 = vmatpush3.msra.mxu0 %v10534_v12  ;;  %v10567_v12 = vld [vmem:[%s14554_s17 + $0x38] sm:$0xff] }
0x2e25   :  { %12761 = vmatprep.subr.bf16.mxu0 %v12760_v18 }
0x2ef6   :  { %v11960_v51 = vpop.f32.mrb[52].mxu0 }
0x2ef7   :  { %v6753_v52 = vmul.f32 0.35355338, %v11960_v51  ;;  %v6743_v54 = vpop.f32.mrb[53].mxu0 }
0x2ef8   :  { %v6752_v58 = vmul.f32 0.35355338, %v6743_v54 }
0x2ef9   :  { %v6755_v10 = vadd.f32 %v14090_v53, %v6753_v52 }
0x2efa   :  { %v6754_v14 = vadd.f32 %v14094_v55, %v6752_v58 }
0x2efb   :  { %v6759_v59 = vsel %vm181_vm0, %v6755_v10, -inf }
0x2efc   :  { %6760 = vmax.xlane.f32.xlu1 %v6759_v59  ;;  %v6756_v28 = vsel %vm181_vm0, %v6754_v14, -inf }
0x2efd   :  { %6757 = vmax.xlane.f32.xlu0 %v6756_v28 }
0x2f89   :  { %v6761_v31 = vpop.xlane.xlu1 %6760 }
0x2f8a   :  { %v6763_v60 = vsub.f32 %v6755_v10, %v6761_v31  ;;  %v6758_v61 = vpop.xlane.xlu0 %6757 }
0x2f8b   :  { %v6762_v62 = vsub.f32 %v6754_v14, %v6758_v61 }
0x2f8c   :  { %v6766_v63 = vmul.f32 1.442695, %v6763_v60 }
0x2f8d   :  { %v6764_v0 = vmul.f32 1.442695, %v6762_v62 }
0x2f8e   :  { %13151 = vpow2.f32 %v6766_v63 }
0x2f8f   :  { %13153 = vpow2.f32 %v6764_v0 }
0x2f98   :  { %v13152_v3 = vpop.eup %13151 }
0x2f99   :  { %v13154_v4 = vpop.eup %13153  ;;  %v6771_v5 = vsel %vm181_vm0, %v13152_v3, 0.0 }
0x2f9a   :  { %6772 = vadd.xlane.f32.xlu1 %v6771_v5  ;;  %v6768_v17 = vsel %vm181_vm0, %v13154_v4, 0.0 }
0x2f9b   :  { %6769 = vadd.xlane.f32.xlu0 %v6768_v17 }
0x3027   :  { %v6773_v23 = vpop.xlane.xlu1 %6772 }
0x3028   :  { %13155 = vrcp.f32 %v6773_v23  ;;  %v6770_v25 = vpop.xlane.xlu0 %6769 }
0x3029   :  { %13157 = vrcp.f32 %v6770_v25 }
0x3032   :  { %v13156_v24 = vpop.eup %13155 }
0x3033   :  { %v13158_v2 = vpop.eup %13157  ;;  %v6777_v27 = vmul.f32 %v13156_v24, %v13152_v3 }
0x3034   :  { %v6776_v16 = vmul.f32 %v13158_v2, %v13154_v4 }
0x3036   :  { %11965 = vmatprep.mubr.msk.f32.mxu1 %vm181_vm0, %v6776_v16  ;;  %v10584_v16 = vld [vmem:[%s14555_s29 + $0x80] sm:$0xff] }
0x3037   :  { %11966 = vmatmul.mubr.msk.f32.vlgmr.msra.gmra.mrb[72].mxu1 %vm181_vm0, %v6777_v27  ;;  %v10585_v27 = vld [vmem:[%s14555_s29 + $0x88] sm:$0xff] }
0x3038   :  { %12755 = vmatpush3.bf16.msra.mxu1 %v12752_v22  ;;  %11981 = vmatprep.mubr.msk.f32.mxu1 %vm361_vm1, %v14044_v7 }
0x3039   :  { %12757 = vmatprep.subr.bf16.mxu1 %v12756_v29 }
0x303c   :  { %12759 = vmatpush3.bf16.msra.mxu1 %v12756_v29  ;;  %v12794_v29 = vpack.c.bf16 %v10585_v27, %v10584_v16  ;;  %v10615_v16 = vld [vmem:[%s14555_s29 + $0xa0] sm:$0xff]  ;;  %v10616_v27 = vld [vmem:[%s14555_s29 + $0xa8] sm:$0xff] }
0x303d   :  { %12769 = vmatprep.subr.bf16.mxu1 %v12768_v32 }
0x303f   :  { %11982 = vmatmul.mubr.msk.f32.vlgmr.msra.gmra.mrb[74].mxu1 %vm361_vm1, %v14046_v8 }
0x3040   :  { %12771 = vmatpush3.bf16.msra.mxu1 %v12768_v32  ;;  %12003 = vmatprep.mubr.msk.f32.mxu1 %vm361_vm1, %v14044_v7 }
0x3041   :  { %12773 = vmatprep.subr.bf16.mxu1 %v12772_v34 }
0x3044   :  { %12775 = vmatpush3.bf16.msra.mxu1 %v12772_v34 }
0x3047   :  { %12004 = vmatmul.mubr.msk.f32.vlgmr.msra.gmra.mrb[76].mxu1 %vm361_vm1, %v14046_v8 }
0x310a   :  { %v11967_v41 = vpop.f32.mrb[72].mxu1 }
0x310b   :  { %v6850_v39 = vpop.f32.mrb[73].mxu1 }
0x310c   :  { %11970 = vmatprep.mubr.msk.f32.mxu0 %vm876_vm2, %v6850_v39 }
0x310d   :  { %11971 = vmatmul.mubr.msk.f32.vlgmr.msra.gmra.mrb[48].mxu0 %vm876_vm2, %v11967_v41 }
0x310e   :  { %12763 = vmatpush3.bf16.msra.mxu0 %v12760_v18  ;;  %11992 = vmatprep.mubr.msk.f32.mxu0 %vm361_vm1, %v14044_v7  ;;  %v10550_v7 = vld [vmem:[%s14549_s5 + $0x7] ss:$0 sm:$0xff] }
0x310f   :  { %12765 = vmatprep.subr.bf16.mxu0 %v12764_v42 }
0x3112   :  { %v11983_v43 = vpop.f32.mrb[74].mxu1  ;;  %12767 = vmatpush3.bf16.msra.mxu0 %v12764_v42  ;;  %v10589_v42 = vld [vmem:[%s14558_s14 + $0x4] ss:$0 sm:$0xff] }
0x3113   :  { %v7029_v44 = vadd.f32 %v11983_v43, %v10542_v13  ;;  %v7023_v45 = vpop.f32.mrb[75].mxu1 }
0x3114   :  { %v7024_v38 = vadd.f32 %v10542_v13, %v7023_v45 }
0x3115   :  { %11993 = vmatmul.mubr.msk.f32.vlgmr.msra.gmra.mrb[54].mxu0 %vm361_vm1, %v14046_v8 }
0x3116   :  { %12010 = vmatprep.mubr.msk.f32.mxu0 %vm876_vm2, %v7024_v38 }
0x311a   :  { %v12005_v47 = vpop.f32.mrb[76].mxu1 }
0x311b   :  { %v7205_v48 = vadd.f32 %v12005_v47, %v10558_v46  ;;  %v7199_v49 = vpop.f32.mrb[77].mxu1 }
0x311c   :  { %v7200_v50 = vadd.f32 %v10558_v46, %v7199_v49 }
0x311e   :  { %v12782_v51 = vpack.c.bf16 %v7205_v48, %v7200_v50 }
0x3120   :  { %12783 = vmatprep.subr.bf16.mxu1 %v12782_v51 }
0x3121   :  { %12785 = vmatpush3.bf16.msra.mxu1 %v12782_v51 }
0x31e8   :  { %v11994_v52 = vpop.f32.mrb[54].mxu0 }
0x31e9   :  { %v7117_v54 = vadd.f32 %v11994_v52, %v10550_v7  ;;  %v7111_v58 = vpop.f32.mrb[55].mxu0 }
0x31ea   :  { %v7112_v10 = vadd.f32 %v10550_v7, %v7111_v58  ;;  %v10576_v58 = vld [vmem:[%s14559_s19 + $0x80] sm:$0xff] }
0x31ec   :  { %v12776_v14 = vpack.c.bf16 %v7117_v54, %v7112_v10  ;;  %v10577_v10 = vld [vmem:[%s14559_s19 + $0x88] sm:$0xff] }
0x31ee   :  { %12778 = vmatprep.subr.msk.bf16.mxu0 %vm13596_vm3, %v12776_v14 }
0x31ef   :  { %12781 = vmatpush3.bf16.xpose.msk.msra.mxu0 %vm13596_vm3, %v12776_v14  ;;  %v12786_v14 = vpack.c.bf16 %v10577_v10, %v10576_v58 }
0x31f0   :  { %12020 = vmatprep.subr.mxu0 %v10567_v12 }
0x31f1   :  { %12787 = vmatprep.subr.bf16.mxu1 %v12786_v14 }
0x31f6   :  { %12011 = vmatmul.mubr.msk.f32.vlgmr.msra.gmra.mrb[56].mxu0 %vm876_vm2, %v7029_v44 }
0x31f7   :  { %12021 = vmatpush3.msra.mxu0 %v10567_v12 }
0x31f8   :  { %12795 = vmatprep.subr.bf16.mxu0 %v12794_v29 }
0x32c9   :  { %v12012_v8 = vpop.f32.mrb[56].mxu0 }
0x32ca   :  { %v7296_v59 = vmul.f32 0.35355338, %v12012_v8  ;;  %v7286_v28 = vpop.f32.mrb[57].mxu0  ;;  %v10578_v8 = vld [vmem:[%s14559_s19 + $0x90] sm:$0xff] }
0x32cb   :  { %v7295_v31 = vmul.f32 0.35355338, %v7286_v28 }
0x32cc   :  { %v7298_v60 = vadd.f32 %v14090_v53, %v7296_v59  ;;  %v10579_v59 = vld [vmem:[%s14559_s19 + $0x98] sm:$0xff] }
0x32cd   :  { %v7297_v61 = vadd.f32 %v14094_v55, %v7295_v31  ;;  %v12790_v28 = vpack.c.bf16 %v10579_v59, %v10578_v8  ;;  %v10592_v31 = vld [vmem:[%s14560_s15 + $0x80] sm:$0xff] }
0x32ce   :  { %v7302_v62 = vsel %vm181_vm0, %v7298_v60, -inf }
0x32cf   :  { %7303 = vmax.xlane.f32.xlu1 %v7302_v62  ;;  %v7299_v63 = vsel %vm181_vm0, %v7297_v61, -inf }
0x32d0   :  { %7300 = vmax.xlane.f32.xlu0 %v7299_v63 }
0x335c   :  { %v7304_v0 = vpop.xlane.xlu1 %7303 }
0x335d   :  { %v7306_v3 = vsub.f32 %v7298_v60, %v7304_v0  ;;  %v7301_v4 = vpop.xlane.xlu0 %7300  ;;  %v10593_v60 = vld [vmem:[%s14560_s15 + $0x88] sm:$0xff] }
0x335e   :  { %v7305_v5 = vsub.f32 %v7297_v61, %v7301_v4  ;;  %v12802_v61 = vpack.c.bf16 %v10593_v60, %v10592_v31 }
0x335f   :  { %v7309_v17 = vmul.f32 1.442695, %v7306_v3 }
0x3360   :  { %v7307_v1 = vmul.f32 1.442695, %v7305_v5 }
0x3361   :  { %13159 = vpow2.f32 %v7309_v17 }
0x3362   :  { %13161 = vpow2.f32 %v7307_v1  ;;  %v10574_v1 = vld [vmem:[%s14561_s16 + $0x1] ss:$0 sm:$0xff] }
0x336b   :  { %v13160_v57 = vpop.eup %13159 }
0x336c   :  { %v13162_v22 = vpop.eup %13161  ;;  %v7314_v53 = vsel %vm181_vm0, %v13160_v57, 0.0 }
0x336d   :  { %7315 = vadd.xlane.f32.xlu1 %v7314_v53  ;;  %v7311_v55 = vsel %vm181_vm0, %v13162_v22, 0.0 }
0x336e   :  { %7312 = vadd.xlane.f32.xlu0 %v7311_v55  ;;  %v10575_v55 = vld [vmem:[%s14562_s18 + $0x1] ss:$0 sm:$0xff] }
0x33fa   :  { %v7316_v23 = vpop.xlane.xlu1 %7315 }
0x33fb   :  { %13163 = vrcp.f32 %v7316_v23  ;;  %v7313_v25 = vpop.xlane.xlu0 %7312 }
0x33fc   :  { %13165 = vrcp.f32 %v7313_v25  ;;  %v10594_v25 = vld [vmem:[%s14560_s15 + $0x90] sm:$0xff] }
0x3405   :  { %v13164_v24 = vpop.eup %13163 }
0x3406   :  { %v13166_v26 = vpop.eup %13165  ;;  %v7320_v2 = vmul.f32 %v13164_v24, %v13160_v57  ;;  %v10595_v24 = vld [vmem:[%s14560_s15 + $0x98] sm:$0xff] }
0x3407   :  { %v7319_v56 = vmul.f32 %v13166_v26, %v13162_v22 }
0x3409   :  { %12017 = vmatprep.mubr.msk.f32.mxu1 %vm181_vm0, %v7319_v56 }
0x340a   :  { %12018 = vmatmul.mubr.msk.f32.vlgmr.msra.gmra.mrb[78].mxu1 %vm181_vm0, %v7320_v2  ;;  %v12806_v2 = vpack.c.bf16 %v10595_v24, %v10594_v25  ;;  %v10623_v24 = vld [vmem:[%s14560_s15 + $0xa0] sm:$0xff] }
0x340b   :  { %12789 = vmatpush3.bf16.msra.mxu1 %v12786_v14 }
0x340c   :  { %12791 = vmatprep.subr.bf16.mxu1 %v12790_v28 }
0x340f   :  { %12793 = vmatpush3.bf16.msra.mxu1 %v12790_v28 }
0x3410   :  { %12803 = vmatprep.subr.bf16.mxu1 %v12802_v61 }
0x34dd   :  { %v12019_v32 = vpop.f32.mrb[78].mxu1 }
0x34de   :  { %v7393_v9 = vpop.f32.mrb[79].mxu1 }
0x34df   :  { %12022 = vmatprep.mubr.msk.f32.mxu0 %vm876_vm2, %v7393_v9  ;;  %v10618_v9 = vld [vmem:[%s14555_s29 + $0xb8] sm:$0xff] }
0x34e0   :  { %12023 = vmatmul.mubr.msk.f32.vlgmr.msra.gmra.mrb[48].mxu0 %vm876_vm2, %v12019_v32  ;;  %v10617_v32 = vld [vmem:[%s14555_s29 + $0xb0] sm:$0xff] }
0x34e1   :  { %12797 = vmatpush3.bf16.msra.mxu0 %v12794_v29  ;;  %12044 = vmatprep.mubr.msk.f32.mxu0 %vm361_vm1, %v13767_v19  ;;  %v12828_v29 = vpack.c.bf16 %v10616_v27, %v10615_v16  ;;  %v10625_v27 = vld [vmem:[%s14560_s15 + $0xb0] sm:$0xff] }
0x34e2   :  { %12799 = vmatprep.subr.bf16.mxu0 %v12798_v33 }
0x34e5   :  { %12801 = vmatpush3.bf16.msra.mxu0 %v12798_v33 }
0x34e8   :  { %12045 = vmatmul.mubr.msk.f32.vlgmr.msra.gmra.mrb[58].mxu0 %vm361_vm1, %v13774_v20 }
0x35b3   :  { %v12024_v34 = vpop.f32.mrb[48].mxu0 }
0x35b4   :  { %v7488_v6 = vadd.f32 %v12024_v34, %v14022_v35  ;;  %v7476_v18 = vpop.f32.mrb[49].mxu0 }
0x35b5   :  { %v7487_v21 = vadd.f32 %v7476_v18, %v14024_v36  ;;  %v10597_v18 = vld [vmem:[%s14564_s23 + $0x4] ss:$0 sm:$0xff] }
0x35b6   :  { %v14239_v40 = vadd.f32 %v10571_v37, %v7488_v6  ;;  %v12832_v6 = vpack.c.bf16 %v10618_v9, %v10617_v32  ;;  %v10612_v9 = vld [vmem:[%s14563_s22 + $0x5] ss:$0 sm:$0xff] }
0x35b7   :  { %v14241_v41 = vadd.f32 %v10571_v37, %v7487_v21 }
0x35b8   :  { %v7506_v39 = vsel %vm361_vm1, %v14239_v40, 0.0 }
0x35b9   :  { %7507 = vadd.xlane.f32.xlu1 %v7506_v39  ;;  %v7503_v13 = vsel %vm361_vm1, %v14241_v41, 0.0 }
0x35ba   :  { %7504 = vadd.xlane.f32.xlu0 %v7503_v13 }
0x35bb   :  { %v12046_v43 = vpop.f32.mrb[58].mxu0 }
0x35bc   :  { %v7724_v44 = vadd.f32 %v12046_v43, %v10589_v42  ;;  %v7718_v45 = vpop.f32.mrb[59].mxu0 }
0x35bd   :  { %v7719_v35 = vadd.f32 %v10589_v42, %v7718_v45 }
0x35bf   :  { %v12810_v38 = vpack.c.bf16 %v7724_v44, %v7719_v35 }
0x35c1   :  { %12812 = vmatprep.subr.msk.bf16.mxu0 %vm13596_vm3, %v12810_v38 }
0x35c2   :  { %12815 = vmatpush3.bf16.xpose.msk.msra.mxu0 %vm13596_vm3, %v12810_v38 }
0x35c3   :  { %12829 = vmatprep.subr.bf16.mxu0 %v12828_v29 }
0x3646   :  { %v7508_v36 = vpop.xlane.xlu1 %7507 }
0x3647   :  { %v7510_v46 = vmul.f32 0.03125, %v7508_v36  ;;  %v7505_v47 = vpop.xlane.xlu0 %7504  ;;  %v14291_v36 = vld [vmem:[%s14565_s26 + $0x8] sm:$0xff] }
0x3648   :  { %v7509_v48 = vmul.f32 0.03125, %v7505_v47  ;;  %v14295_v47 = vld [vmem:[%s14565_s26] sm:$0xff] }
0x3649   :  { %v7512_v49 = vsub.f32 %v14239_v40, %v7510_v46 }
0x364a   :  { %v7511_v50 = vsub.f32 %v14241_v41, %v7509_v48 }
0x364b   :  { %v7514_v51 = vmul.f32 %v7512_v49, %v7512_v49 }
0x364c   :  { %v7513_v7 = vmul.f32 %v7511_v50, %v7511_v50 }
0x364d   :  { %v7518_v52 = vsel %vm361_vm1, %v7514_v51, 0.0 }
0x364e   :  { %7519 = vadd.xlane.f32.xlu1 %v7518_v52  ;;  %v7515_v54 = vsel %vm361_vm1, %v7513_v7, 0.0 }
0x364f   :  { %7516 = vadd.xlane.f32.xlu0 %v7515_v54 }
0x36db   :  { %v7520_v62 = vpop.xlane.xlu1 %7519 }
0x36dc   :  { %v7522_v63 = vmul.f32 0.03125, %v7520_v62  ;;  %v7517_v0 = vpop.xlane.xlu0 %7516 }
0x36dd   :  { %v7521_v3 = vmul.f32 0.03125, %v7517_v0 }
0x36de   :  { %v7524_v4 = vadd.f32 1e-05, %v7522_v63 }
0x36df   :  { %v7523_v5 = vadd.f32 1e-05, %v7521_v3  ;;  %v10607_v3 = vld [vmem:[%s14559_s19 + $0xa0] sm:$0xff] }
0x36e0   :  { %13167 = vrsqrt.f32 %v7524_v4  ;;  %v10608_v4 = vld [vmem:[%s14559_s19 + $0xa8] sm:$0xff] }
0x36e1   :  { %13169 = vrsqrt.f32 %v7523_v5  ;;  %v12820_v5 = vpack.c.bf16 %v10608_v4, %v10607_v3  ;;  %v10644_v4 = vld [vmem:[%s14559_s19 + $0xd0] sm:$0xff] }
0x36ea   :  { %v13168_v17 = vpop.eup %13167 }
0x36eb   :  { %v13170_v57 = vpop.eup %13169  ;;  %v7528_v22 = vmul.f32 %v13168_v17, %v7512_v49 }
0x36ec   :  { %v7527_v53 = vmul.f32 %v13170_v57, %v7511_v50  ;;  %v10620_v50 = vld [vmem:[%s14558_s14 + $0x5] ss:$0 sm:$0xff] }
0x36ed   :  { %v7536_v12 = vmul.f32 %v10574_v1, %v7528_v22  ;;  %v10609_v22 = vld [vmem:[%s14559_s19 + $0xb0] sm:$0xff] }
0x36ee   :  { %v7535_v23 = vmul.f32 %v10574_v1, %v7527_v53  ;;  %v10610_v53 = vld [vmem:[%s14559_s19 + $0xb8] sm:$0xff] }
0x36ef   :  { %v14268_v56 = vadd.f32 %v10575_v55, %v7536_v12  ;;  %v12824_v25 = vpack.c.bf16 %v10610_v53, %v10609_v22  ;;  %v10658_v53 = vld [vmem:[%s14560_s15 + $0xc0] sm:$0xff] }
0x36f0   :  { %v14266_v26 = vadd.f32 %v10575_v55, %v7535_v23 }
0x36f2   :  { %12033 = vmatprep.mubr.msk.f32.mxu1 %vm361_vm1, %v14266_v26 }
0x36f3   :  { %12034 = vmatmul.mubr.msk.f32.vlgmr.msra.gmra.mrb[80].mxu1 %vm361_vm1, %v14268_v56 }
0x36f4   :  { %12805 = vmatpush3.bf16.msra.mxu1 %v12802_v61  ;;  %12055 = vmatprep.mubr.msk.f32.mxu1 %vm361_vm1, %v13767_v19 }
0x36f5   :  { %12807 = vmatprep.subr.bf16.mxu1 %v12806_v2 }
0x36f8   :  { %12809 = vmatpush3.bf16.msra.mxu1 %v12806_v2  ;;  %v10624_v2 = vld [vmem:[%s14560_s15 + $0xa8] sm:$0xff] }
0x36f9   :  { %v12836_v16 = vpack.c.bf16 %v10624_v2, %v10623_v24  ;;  %v10606_v2 = vld [vmem:[%s14566_s28 + $0x20] sm:$0xff] }
0x36fb   :  { %12056 = vmatmul.mubr.msk.f32.vlgmr.msra.gmra.mrb[82].mxu1 %vm361_vm1, %v13774_v20 }
0x37c6   :  { %v12035_v15 = vpop.f32.mrb[80].mxu1 }
0x37c7   :  { %v7630_v33 = vpop.f32.mrb[81].mxu1  ;;  %v7636_v37 = vadd.f32 %v12035_v15, %v10581_v30 }
0x37c8   :  { %v7631_v34 = vadd.f32 %v10581_v30, %v7630_v33 }
0x37ca   :  { %12062 = vmatprep.mubr.msk.f32.mxu0 %vm876_vm2, %v7631_v34 }
0x37cb   :  { %12063 = vmatmul.mubr.msk.f32.vlgmr.msra.gmra.mrb[60].mxu0 %vm876_vm2, %v7636_v37 }
0x37cc   :  { %12831 = vmatpush3.bf16.msra.mxu0 %v12828_v29  ;;  %12091 = vmatprep.mubr.msk.f32.mxu0 %vm361_vm1, %v13767_v19  ;;  %v10626_v29 = vld [vmem:[%s14560_s15 + $0xb8] sm:$0xff] }
0x37cd   :  { %12833 = vmatprep.subr.bf16.mxu0 %v12832_v6  ;;  %v12840_v30 = vpack.c.bf16 %v10626_v29, %v10625_v27  ;;  %v10651_v27 = vld [vmem:[%s14555_s29 + $0xc8] sm:$0xff] }
0x37ce   :  { %v12057_v21 = vpop.f32.mrb[82].mxu1 }
0x37cf   :  { %v7812_v39 = vadd.f32 %v12057_v21, %v10597_v18  ;;  %v7806_v42 = vpop.f32.mrb[83].mxu1 }
0x37d0   :  { %v7807_v13 = vadd.f32 %v10597_v18, %v7806_v42  ;;  %12835 = vmatpush3.bf16.msra.mxu0 %v12832_v6  ;;  %v10628_v18 = vld [vmem:[%s14564_s23 + $0x5] ss:$0 sm:$0xff] }
0x37d2   :  { %v12816_v43 = vpack.c.bf16 %v7812_v39, %v7807_v13 }
0x37d3   :  { %12092 = vmatmul.mubr.msk.f32.vlgmr.msra.gmra.mrb[62].mxu0 %vm361_vm1, %v13774_v20 }
0x37d4   :  { %12817 = vmatprep.subr.bf16.mxu1 %v12816_v43 }
0x37d5   :  { %12819 = vmatpush3.bf16.msra.mxu1 %v12816_v43 }
0x37d6   :  { %12821 = vmatprep.subr.bf16.mxu1 %v12820_v5 }
0x389e   :  { %v12064_v44 = vpop.f32.mrb[60].mxu0 }
0x389f   :  { %v7903_v45 = vmul.f32 0.35355338, %v12064_v44  ;;  %v7893_v35 = vpop.f32.mrb[61].mxu0 }
0x38a0   :  { %v7902_v38 = vmul.f32 0.35355338, %v7893_v35 }
0x38a1   :  { %v7905_v46 = vadd.f32 %v14291_v36, %v7903_v45 }
0x38a2   :  { %v7904_v48 = vadd.f32 %v14295_v47, %v7902_v38 }
0x38a3   :  { %v7909_v49 = vsel %vm181_vm0, %v7905_v46, -inf }
0x38a4   :  { %7910 = vmax.xlane.f32.xlu1 %v7909_v49  ;;  %v7906_v51 = vsel %vm181_vm0, %v7904_v48, -inf }
0x38a5   :  { %7907 = vmax.xlane.f32.xlu0 %v7906_v51 }
0x38a6   :  { %v12093_v7 = vpop.f32.mrb[62].mxu0 }
0x38a7   :  { %v8184_v52 = vadd.f32 %v12093_v7, %v10620_v50  ;;  %v8178_v54 = vpop.f32.mrb[63].mxu0 }
0x38a8   :  { %v8179_v58 = vadd.f32 %v10620_v50, %v8178_v54 }
0x38aa   :  { %v12844_v10 = vpack.c.bf16 %v8184_v52, %v8179_v58 }
0x38ac   :  { %12846 = vmatprep.subr.msk.bf16.mxu0 %vm13596_vm3, %v12844_v10 }
0x38ad   :  { %12849 = vmatpush3.bf16.xpose.msk.msra.mxu0 %vm13596_vm3, %v12844_v10 }
0x3931   :  { %v7911_v14 = vpop.xlane.xlu1 %7910 }
0x3932   :  { %v7913_v8 = vsub.f32 %v7905_v46, %v7911_v14  ;;  %v7908_v59 = vpop.xlane.xlu0 %7907 }
0x3933   :  { %v7912_v28 = vsub.f32 %v7904_v48, %v7908_v59 }
0x3934   :  { %v7916_v31 = vmul.f32 1.442695, %v7913_v8 }
0x3935   :  { %v7914_v60 = vmul.f32 1.442695, %v7912_v28 }
0x3936   :  { %13171 = vpow2.f32 %v7916_v31  ;;  %v10642_v31 = vld [vmem:[%s14559_s19 + $0xc0] sm:$0xff] }
0x3937   :  { %13173 = vpow2.f32 %v7914_v60  ;;  %v10643_v60 = vld [vmem:[%s14559_s19 + $0xc8] sm:$0xff] }
0x3940   :  { %v13172_v61 = vpop.eup %13171 }
0x3941   :  { %v13174_v62 = vpop.eup %13173  ;;  %v7921_v63 = vsel %vm181_vm0, %v13172_v61, 0.0 }
0x3942   :  { %7922 = vadd.xlane.f32.xlu1 %v7921_v63  ;;  %v7918_v0 = vsel %vm181_vm0, %v13174_v62, 0.0 }
0x3943   :  { %7919 = vadd.xlane.f32.xlu0 %v7918_v0 }
0x39cf   :  { %v7923_v17 = vpop.xlane.xlu1 %7922 }
0x39d0   :  { %13175 = vrcp.f32 %v7923_v17  ;;  %v7920_v1 = vpop.xlane.xlu0 %7919 }
0x39d1   :  { %13177 = vrcp.f32 %v7920_v1 }
0x39da   :  { %v13176_v57 = vpop.eup %13175 }
0x39db   :  { %v13178_v55 = vpop.eup %13177  ;;  %v7927_v23 = vmul.f32 %v13176_v57, %v13172_v61  ;;  %v12854_v61 = vpack.c.bf16 %v10643_v60, %v10642_v31 }
0x39dc   :  { %v7926_v12 = vmul.f32 %v13178_v55, %v13174_v62  ;;  %v10637_v62 = vld [vmem:[%s14566_s28 + $0x28] sm:$0xff] }
0x39dd   :  { %12119 = vmatprep.subr.mxu0 %v10637_v62  ;;  %v10659_v55 = vld [vmem:[%s14560_s15 + $0xc8] sm:$0xff] }
0x39de   :  { %12069 = vmatprep.mubr.msk.f32.mxu1 %vm181_vm0, %v7926_v12  ;;  %v12870_v12 = vpack.c.bf16 %v10659_v55, %v10658_v53 }
0x39df   :  { %12070 = vmatmul.mubr.msk.f32.vlgmr.msra.gmra.mrb[84].mxu1 %vm181_vm0, %v7927_v23  ;;  %v10660_v23 = vld [vmem:[%s14560_s15 + $0xd0] sm:$0xff] }
0x39e0   :  { %12823 = vmatpush3.bf16.msra.mxu1 %v12820_v5  ;;  %12080 = vmatprep.mubr.msk.f32.mxu1 %vm361_vm1, %v14266_v26  ;;  %v10645_v5 = vld [vmem:[%s14559_s19 + $0xd8] sm:$0xff] }
0x39e1   :  { %12825 = vmatprep.subr.bf16.mxu1 %v12824_v25  ;;  %v12858_v22 = vpack.c.bf16 %v10645_v5, %v10644_v4  ;;  %v10675_v5 = vld [vmem:[%s14559_s19 + $0xe0] sm:$0xff] }
0x39e4   :  { %12827 = vmatpush3.bf16.msra.mxu1 %v12824_v25  ;;  %v10661_v25 = vld [vmem:[%s14560_s15 + $0xd8] sm:$0xff] }
0x39e5   :  { %12837 = vmatprep.subr.bf16.mxu1 %v12836_v16  ;;  %v12874_v24 = vpack.c.bf16 %v10661_v25, %v10660_v23  ;;  %v10678_v23 = vld [vmem:[%s14559_s19 + $0xf8] sm:$0xff] }
0x39e7   :  { %12081 = vmatmul.mubr.msk.f32.vlgmr.msra.gmra.mrb[86].mxu1 %vm361_vm1, %v14268_v56 }
0x39e8   :  { %12839 = vmatpush3.bf16.msra.mxu1 %v12836_v16  ;;  %12102 = vmatprep.mubr.msk.f32.mxu1 %vm361_vm1, %v13767_v19  ;;  %v10650_v16 = vld [vmem:[%s14555_s29 + $0xc0] sm:$0xff] }
0x39e9   :  { %12841 = vmatprep.subr.bf16.mxu1 %v12840_v30 }
0x39ec   :  { %12843 = vmatpush3.bf16.msra.mxu1 %v12840_v30 }
0x39ef   :  { %12103 = vmatmul.mubr.msk.f32.vlgmr.msra.gmra.mrb[88].mxu1 %vm361_vm1, %v13774_v20 }
0x3ab2   :  { %v14325_v15 = vpop.f32.mrb[84].mxu1 }
0x3ab3   :  { %v14327_v32 = vpop.f32.mrb[85].mxu1 }
0x3aba   :  { %v12082_v33 = vpop.f32.mrb[86].mxu1 }
0x3abb   :  { %v8090_v34 = vpop.f32.mrb[87].mxu1  ;;  %v8096_v6 = vadd.f32 %v12082_v33, %v10612_v9  ;;  %v10647_v33 = vld [vmem:[%s14563_s22 + $0x6] ss:$0 sm:$0xff] }
0x3abc   :  { %v8091_v37 = vadd.f32 %v10612_v9, %v8090_v34  ;;  %v12862_v9 = vpack.c.bf16 %v10651_v27, %v10650_v16  ;;  %v10652_v34 = vld [vmem:[%s14555_s29 + $0xd0] sm:$0xff]  ;;  %v10691_v27 = vld [vmem:[%s14560_s15 + $0xe0] sm:$0xff] }
0x3abe   :  { %12109 = vmatprep.mubr.msk.f32.mxu0 %vm876_vm2, %v8091_v37  ;;  %v10653_v37 = vld [vmem:[%s14555_s29 + $0xd8] sm:$0xff] }
0x3abf   :  { %12110 = vmatmul.mubr.msk.f32.vlgmr.msra.gmra.mrb[64].mxu0 %vm876_vm2, %v8096_v6 }
0x3ac0   :  { %12120 = vmatpush3.msra.mxu0 %v10637_v62 }
0x3ac1   :  { %12124 = vmatprep.subr.mxu0 %v10606_v2 }
0x3ac2   :  { %v12104_v21 = vpop.f32.mrb[88].mxu1 }
0x3ac3   :  { %v8272_v39 = vadd.f32 %v12104_v21, %v10628_v18  ;;  %v8266_v42 = vpop.f32.mrb[89].mxu1 }
0x3ac4   :  { %v8267_v13 = vadd.f32 %v10628_v18, %v8266_v42  ;;  %v10663_v42 = vld [vmem:[%s14564_s23 + $0x6] ss:$0 sm:$0xff] }
0x3ac6   :  { %v12850_v43 = vpack.c.bf16 %v8272_v39, %v8267_v13  ;;  %v12866_v39 = vpack.c.bf16 %v10653_v37, %v10652_v34  ;;  %v10684_v37 = vld [vmem:[%s14555_s29 + $0xe8] sm:$0xff] }
0x3ac8   :  { %12851 = vmatprep.subr.bf16.mxu1 %v12850_v43 }
0x3ac9   :  { %12853 = vmatpush3.bf16.msra.mxu1 %v12850_v43 }
0x3aca   :  { %12855 = vmatprep.subr.bf16.mxu1 %v12854_v61 }
0x3b92   :  { %v12111_v44 = vpop.f32.mrb[64].mxu0 }
0x3b93   :  { %v8363_v45 = vmul.f32 0.35355338, %v12111_v44  ;;  %v8353_v35 = vpop.f32.mrb[65].mxu0 }
0x3b94   :  { %v8362_v38 = vmul.f32 0.35355338, %v8353_v35 }
0x3b95   :  { %v8365_v46 = vadd.f32 %v14291_v36, %v8363_v45 }
0x3b96   :  { %v8364_v48 = vadd.f32 %v14295_v47, %v8362_v38 }
0x3b97   :  { %v8369_v49 = vsel %vm181_vm0, %v8365_v46, -inf }
0x3b98   :  { %8370 = vmax.xlane.f32.xlu1 %v8369_v49  ;;  %v8366_v50 = vsel %vm181_vm0, %v8364_v48, -inf }
0x3b99   :  { %8367 = vmax.xlane.f32.xlu0 %v8366_v50 }
0x3c25   :  { %v8371_v51 = vpop.xlane.xlu1 %8370 }
0x3c26   :  { %v8373_v7 = vsub.f32 %v8365_v46, %v8371_v51  ;;  %v8368_v52 = vpop.xlane.xlu0 %8367 }
0x3c27   :  { %v8372_v54 = vsub.f32 %v8364_v48, %v8368_v52 }
0x3c28   :  { %v8376_v58 = vmul.f32 1.442695, %v8373_v7 }
0x3c29   :  { %v8374_v10 = vmul.f32 1.442695, %v8372_v54 }
0x3c2a   :  { %13179 = vpow2.f32 %v8376_v58 }
0x3c2b   :  { %13181 = vpow2.f32 %v8374_v10 }
0x3c34   :  { %v13180_v14 = vpop.eup %13179 }
0x3c35   :  { %v13182_v8 = vpop.eup %13181  ;;  %v8381_v59 = vsel %vm181_vm0, %v13180_v14, 0.0 }
0x3c36   :  { %8382 = vadd.xlane.f32.xlu1 %v8381_v59  ;;  %v8378_v28 = vsel %vm181_vm0, %v13182_v8, 0.0 }
0x3c37   :  { %8379 = vadd.xlane.f32.xlu0 %v8378_v28 }
0x3cc3   :  { %v8383_v63 = vpop.xlane.xlu1 %8382 }
0x3cc4   :  { %13183 = vrcp.f32 %v8383_v63  ;;  %v8380_v0 = vpop.xlane.xlu0 %8379 }
0x3cc5   :  { %13185 = vrcp.f32 %v8380_v0 }
0x3cce   :  { %v13184_v3 = vpop.eup %13183 }
0x3ccf   :  { %v13186_v17 = vpop.eup %13185  ;;  %v8387_v57 = vmul.f32 %v13184_v3, %v13180_v14 }
0x3cd0   :  { %v8386_v1 = vmul.f32 %v13186_v17, %v13182_v8  ;;  %v10676_v17 = vld [vmem:[%s14559_s19 + $0xe8] sm:$0xff] }
0x3cd2   :  { %12116 = vmatprep.mubr.msk.f32.mxu1 %vm181_vm0, %v8386_v1  ;;  %v12888_v1 = vpack.c.bf16 %v10676_v17, %v10675_v5  ;;  %v10705_v5 = vld [vmem:[%s14566_s28 + $0x38] sm:$0xff] }
0x3cd3   :  { %12117 = vmatmul.mubr.msk.f32.vlgmr.msra.gmra.mrb[90].mxu1 %vm181_vm0, %v8387_v57  ;;  %v10672_v57 = vld [vmem:[%s14566_s28 + $0x30] sm:$0xff] }
0x3cd4   :  { %12857 = vmatpush3.bf16.msra.mxu1 %v12854_v61  ;;  %12137 = vmatprep.mubr.msk.f32.mxu1 %vm361_vm1, %v14266_v26 }
0x3cd5   :  { %12859 = vmatprep.subr.bf16.mxu1 %v12858_v22 }
0x3cd8   :  { %12861 = vmatpush3.bf16.msra.mxu1 %v12858_v22 }
0x3cd9   :  { %12871 = vmatprep.subr.bf16.mxu1 %v12870_v12 }
0x3cdb   :  { %12138 = vmatmul.mubr.msk.f32.vlgmr.msra.gmra.mrb[92].mxu1 %vm361_vm1, %v14268_v56 }
0x3cdc   :  { %12873 = vmatpush3.bf16.msra.mxu1 %v12870_v12  ;;  %12159 = vmatprep.mubr.msk.f32.mxu1 %vm361_vm1, %v13767_v19  ;;  %v10677_v12 = vld [vmem:[%s14559_s19 + $0xf0] sm:$0xff] }
0x3cdd   :  { %12875 = vmatprep.subr.bf16.mxu1 %v12874_v24  ;;  %v12892_v16 = vpack.c.bf16 %v10678_v23, %v10677_v12 }
0x3ce0   :  { %12877 = vmatpush3.bf16.msra.mxu1 %v12874_v24 }
0x3ce3   :  { %12160 = vmatmul.mubr.msk.f32.vlgmr.msra.gmra.mrb[94].mxu1 %vm361_vm1, %v13774_v20 }
0x3da6   :  { %v12118_v29 = vpop.f32.mrb[90].mxu1 }
0x3da7   :  { %v8460_v30 = vpop.f32.mrb[91].mxu1 }
0x3da8   :  { %12121 = vmatprep.mubr.msk.f32.mxu0 %vm876_vm2, %v8460_v30 }
0x3da9   :  { %12122 = vmatmul.mubr.msk.f32.vlgmr.msra.gmra.mrb[66].mxu0 %vm876_vm2, %v12118_v29  ;;  %v10692_v29 = vld [vmem:[%s14560_s15 + $0xe8] sm:$0xff] }
0x3daa   :  { %12125 = vmatpush3.msra.mxu0 %v10606_v2  ;;  %12126 = vmatprep.mubr.msk.f32.mxu0 %vm876_vm2, %v14327_v32  ;;  %v12904_v30 = vpack.c.bf16 %v10692_v29, %v10691_v27 }
0x3dab   :  { %12863 = vmatprep.subr.bf16.mxu0 %v12862_v9 }
0x3dae   :  { %v12139_v6 = vpop.f32.mrb[92].mxu1 }
0x3daf   :  { %v8718_v18 = vadd.f32 %v12139_v6, %v10647_v33  ;;  %v8712_v21 = vpop.f32.mrb[93].mxu1 }
0x3db0   :  { %v8713_v44 = vadd.f32 %v10647_v33, %v8712_v21  ;;  %v10694_v33 = vld [vmem:[%s14560_s15 + $0xf8] sm:$0xff] }
0x3db1   :  { %12127 = vmatmul.mubr.msk.f32.vlgmr.msra.gmra.mrb[66].mxu0 %vm876_vm2, %v14325_v15  ;;  %v10655_v15 = vld [vmem:[%s14558_s14 + $0x6] ss:$0 sm:$0xff]  ;;  %v10686_v21 = vld [vmem:[%s14555_s29 + $0xf8] sm:$0xff] }
0x3db2   :  { %12865 = vmatpush3.bf16.msra.mxu0 %v12862_v9  ;;  %12148 = vmatprep.mubr.msk.f32.mxu0 %vm361_vm1, %v13767_v19  ;;  %v10693_v9 = vld [vmem:[%s14560_s15 + $0xf0] sm:$0xff] }
0x3db3   :  { %12867 = vmatprep.subr.bf16.mxu0 %v12866_v39  ;;  %v12908_v34 = vpack.c.bf16 %v10694_v33, %v10693_v9 }
0x3db6   :  { %12869 = vmatpush3.bf16.msra.mxu0 %v12866_v39  ;;  %v12161_v32 = vpop.f32.mrb[94].mxu1 }
0x3db7   :  { %v8894_v13 = vadd.f32 %v12161_v32, %v10663_v42  ;;  %v8888_v43 = vpop.f32.mrb[95].mxu1  ;;  %v10680_v32 = vld [vmem:[%s14563_s22 + $0x7] ss:$0 sm:$0xff] }
0x3db8   :  { %v8889_v45 = vadd.f32 %v10663_v42, %v8888_v43 }
0x3db9   :  { %12149 = vmatmul.mubr.msk.f32.vlgmr.msra.gmra.mrb[68].mxu0 %vm361_vm1, %v13774_v20 }
0x3dba   :  { %v12884_v35 = vpack.c.bf16 %v8894_v13, %v8889_v45  ;;  %12166 = vmatprep.mubr.msk.f32.mxu0 %vm876_vm2, %v8713_v44 }
0x3dbc   :  { %12885 = vmatprep.subr.bf16.mxu1 %v12884_v35 }
0x3dbd   :  { %12887 = vmatpush3.bf16.msra.mxu1 %v12884_v35  ;;  %v10696_v35 = vld [vmem:[%s14564_s23 + $0x7] ss:$0 sm:$0xff] }
0x3dbe   :  { %12889 = vmatprep.subr.bf16.mxu1 %v12888_v1 }
0x3e8c   :  { %v12150_v38 = vpop.f32.mrb[68].mxu0 }
0x3e8d   :  { %v8806_v46 = vadd.f32 %v12150_v38, %v10655_v15  ;;  %v8800_v48 = vpop.f32.mrb[69].mxu0 }
0x3e8e   :  { %v8801_v49 = vadd.f32 %v10655_v15, %v8800_v48 }
0x3e90   :  { %v12878_v50 = vpack.c.bf16 %v8806_v46, %v8801_v49 }
0x3e92   :  { %12880 = vmatprep.subr.msk.bf16.mxu0 %vm13596_vm3, %v12878_v50 }
0x3e93   :  { %12883 = vmatpush3.bf16.xpose.msk.msra.mxu0 %vm13596_vm3, %v12878_v50 }
0x3e94   :  { %12176 = vmatprep.subr.mxu0 %v10672_v57 }
0x3e9a   :  { %12167 = vmatmul.mubr.msk.f32.vlgmr.msra.gmra.mrb[70].mxu0 %vm876_vm2, %v8718_v18  ;;  %v10685_v18 = vld [vmem:[%s14555_s29 + $0xf0] sm:$0xff] }
0x3e9b   :  { %12177 = vmatpush3.msra.mxu0 %v10672_v57 }
0x3f6d   :  { %v12168_v51 = vpop.f32.mrb[70].mxu0 }
0x3f6e   :  { %v8985_v7 = vmul.f32 0.35355338, %v12168_v51  ;;  %v8975_v52 = vpop.f32.mrb[71].mxu0 }
0x3f6f   :  { %v8984_v54 = vmul.f32 0.35355338, %v8975_v52 }
0x3f70   :  { %v8987_v58 = vadd.f32 %v14291_v36, %v8985_v7 }
0x3f71   :  { %v8986_v10 = vadd.f32 %v14295_v47, %v8984_v54 }
0x3f72   :  { %v8991_v14 = vsel %vm181_vm0, %v8987_v58, -inf }
0x3f73   :  { %8992 = vmax.xlane.f32.xlu1 %v8991_v14  ;;  %v8988_v8 = vsel %vm181_vm0, %v8986_v10, -inf }
0x3f74   :  { %8989 = vmax.xlane.f32.xlu0 %v8988_v8 }
0x4000   :  { %v8993_v59 = vpop.xlane.xlu1 %8992 }
0x4001   :  { %v8995_v28 = vsub.f32 %v8987_v58, %v8993_v59  ;;  %v8990_v31 = vpop.xlane.xlu0 %8989 }
0x4002   :  { %v8994_v60 = vsub.f32 %v8986_v10, %v8990_v31 }
0x4003   :  { %v8998_v61 = vmul.f32 1.442695, %v8995_v28 }
0x4004   :  { %v8996_v62 = vmul.f32 1.442695, %v8994_v60 }
0x4005   :  { %13187 = vpow2.f32 %v8998_v61 }
0x4006   :  { %13189 = vpow2.f32 %v8996_v62 }
0x400f   :  { %v13188_v63 = vpop.eup %13187 }
0x4010   :  { %v13190_v0 = vpop.eup %13189  ;;  %v9003_v3 = vsel %vm181_vm0, %v13188_v63, 0.0 }
0x4011   :  { %9004 = vadd.xlane.f32.xlu1 %v9003_v3  ;;  %v9000_v4 = vsel %vm181_vm0, %v13190_v0, 0.0 }
0x4012   :  { %9001 = vadd.xlane.f32.xlu0 %v9000_v4 }
0x409e   :  { %v9005_v22 = vpop.xlane.xlu1 %9004 }
0x409f   :  { %13191 = vrcp.f32 %v9005_v22  ;;  %v9002_v53 = vpop.xlane.xlu0 %9001 }
0x40a0   :  { %13193 = vrcp.f32 %v9002_v53 }
0x40a9   :  { %v13192_v55 = vpop.eup %13191 }
0x40aa   :  { %v13194_v25 = vpop.eup %13193  ;;  %v9009_v2 = vmul.f32 %v13192_v55, %v13188_v63 }
0x40ab   :  { %v9008_v24 = vmul.f32 %v13194_v25, %v13190_v0 }
0x40ad   :  { %12173 = vmatprep.mubr.msk.f32.mxu1 %vm181_vm0, %v9008_v24  ;;  %v10709_v24 = vld [vmem:[%s14567_s1 + $0x1] ss:$0 sm:$0xff] }
0x40ae   :  { %12174 = vmatmul.mubr.msk.f32.vlgmr.msra.gmra.mrb[96].mxu1 %vm181_vm0, %v9009_v2 }
0x40af   :  { %12891 = vmatpush3.bf16.msra.mxu1 %v12888_v1  ;;  %12189 = vmatprep.mubr.msk.f32.mxu1 %vm361_vm1, %v14266_v26  ;;  %v10683_v26 = vld [vmem:[%s14555_s29 + $0xe0] sm:$0xff] }
0x40b0   :  { %12893 = vmatprep.subr.bf16.mxu1 %v12892_v16  ;;  %v12896_v6 = vpack.c.bf16 %v10684_v37, %v10683_v26 }
0x40b2   :  { %12897 = vmatprep.subr.bf16.mxu0 %v12896_v6 }
0x40b3   :  { %12895 = vmatpush3.bf16.msra.mxu1 %v12892_v16 }
0x40b4   :  { %12905 = vmatprep.subr.bf16.mxu1 %v12904_v30 }
0x40b6   :  { %12190 = vmatmul.mubr.msk.f32.vlgmr.msra.gmra.mrb[98].mxu1 %vm361_vm1, %v14268_v56  ;;  %v12900_v56 = vpack.c.bf16 %v10686_v21, %v10685_v18 }
0x40b7   :  { %12907 = vmatpush3.bf16.msra.mxu1 %v12904_v30  ;;  %12211 = vmatprep.mubr.msk.f32.mxu1 %vm361_vm1, %v13767_v19 }
0x40b8   :  { %12909 = vmatprep.subr.bf16.mxu1 %v12908_v34 }
0x40bb   :  { %12911 = vmatpush3.bf16.msra.mxu1 %v12908_v34 }
0x40be   :  { %12212 = vmatmul.mubr.msk.f32.vlgmr.msra.gmra.mrb[100].mxu1 %vm361_vm1, %v13774_v20 }
0x4181   :  { %v12175_v39 = vpop.f32.mrb[96].mxu1 }
0x4182   :  { %v9082_v42 = vpop.f32.mrb[97].mxu1 }
0x4183   :  { %12178 = vmatprep.mubr.msk.f32.mxu0 %vm876_vm2, %v9082_v42 }
0x4184   :  { %12179 = vmatmul.mubr.msk.f32.vlgmr.msra.gmra.mrb[66].mxu0 %vm876_vm2, %v12175_v39 }
0x4185   :  { %12899 = vmatpush3.bf16.msra.mxu0 %v12896_v6  ;;  %12200 = vmatprep.mubr.msk.f32.mxu0 %vm361_vm1, %v13767_v19  ;;  %v10688_v19 = vld [vmem:[%s14558_s14 + $0x7] ss:$0 sm:$0xff] }
0x4186   :  { %12901 = vmatprep.subr.bf16.mxu0 %v12900_v56 }
0x4189   :  { %v12191_v13 = vpop.f32.mrb[98].mxu1  ;;  %12903 = vmatpush3.bf16.msra.mxu0 %v12900_v56  ;;  %v10714_v56 = vld [vmem:[%s14568_s2 + $0x20] sm:$0xff] }
0x418a   :  { %v9261_v43 = vadd.f32 %v12191_v13, %v10680_v32  ;;  %v9255_v44 = vpop.f32.mrb[99].mxu1 }
0x418b   :  { %v9256_v45 = vadd.f32 %v10680_v32, %v9255_v44  ;;  %v10715_v32 = vld [vmem:[%s14568_s2 + $0x28] sm:$0xff]  ;;  %v10717_v44 = vld [vmem:[%s14568_s2 + $0x38] sm:$0xff] }
0x418c   :  { %12201 = vmatmul.mubr.msk.f32.vlgmr.msra.gmra.mrb[72].mxu0 %vm361_vm1, %v13774_v20  ;;  %v12922_v13 = vpack.c.bf16 %v10715_v32, %v10714_v56  ;;  %v10739_v56 = vld [vmem:[%s14573_s25 + $0x1] ss:$0 sm:$0xff]  ;;  %s13285_s25 = smov [#allocation2]  }
0x418d   :  { %12218 = vmatprep.mubr.msk.f32.mxu0 %vm876_vm2, %v9256_v45  ;;  %s10129_s30 = sshll.u32 %s13285_s25, 4  ;;  %s10130_s30 = int_to_ptr.vmem [resolvable:$true] %s10129_s30 }
0x418e   :  { %p13224_p1 = scmp.lt.s32.totalorder %s10130_s30, %s10130_s30 }
0x4191   :  { %v12213_v15 = vpop.f32.mrb[100].mxu1 }
0x4192   :  { %v9437_v38 = vadd.f32 %v12213_v15, %v10696_v35  ;;  %v9431_v46 = vpop.f32.mrb[101].mxu1  ;;  %v10723_v15 = vld [vmem:[%s14569_s7 + $0x88] sm:$0xff] }
0x4193   :  { %v9432_v48 = vadd.f32 %v10696_v35, %v9431_v46  ;;  %v10722_v35 = vld [vmem:[%s14569_s7 + $0x80] sm:$0xff] }
0x4194   :  { %v12930_v46 = vpack.c.bf16 %v10723_v15, %v10722_v35 }
0x4195   :  { %v12918_v49 = vpack.c.bf16 %v9437_v38, %v9432_v48  ;;  %v10724_v38 = vld [vmem:[%s14569_s7 + $0x90] sm:$0xff]  ;;  %v10725_v48 = vld [vmem:[%s14569_s7 + $0x98] sm:$0xff] }
0x4197   :  { %12919 = vmatprep.subr.bf16.mxu1 %v12918_v49 }
0x4198   :  { %12921 = vmatpush3.bf16.msra.mxu1 %v12918_v49  ;;  %v12934_v49 = vpack.c.bf16 %v10725_v48, %v10724_v38 }
0x4199   :  { %12923 = vmatprep.subr.bf16.mxu1 %v12922_v13 }
0x425f   :  { %v12202_v50 = vpop.f32.mrb[72].mxu0 }
0x4260   :  { %v9349_v51 = vadd.f32 %v12202_v50, %v10688_v19  ;;  %v9343_v7 = vpop.f32.mrb[73].mxu0  ;;  %v10727_v50 = vld [vmem:[%s14569_s7 + $0xa8] sm:$0xff] }
0x4261   :  { %v9344_v52 = vadd.f32 %v10688_v19, %v9343_v7  ;;  %v10726_v19 = vld [vmem:[%s14569_s7 + $0xa0] sm:$0xff] }
0x4263   :  { %v12912_v54 = vpack.c.bf16 %v9349_v51, %v9344_v52  ;;  %v12938_v51 = vpack.c.bf16 %v10727_v50, %v10726_v19 }
0x4265   :  { %12914 = vmatprep.subr.msk.bf16.mxu0 %vm13596_vm3, %v12912_v54 }
0x4266   :  { %12917 = vmatpush3.bf16.xpose.msk.msra.mxu0 %vm13596_vm3, %v12912_v54 }
0x4267   :  { %12228 = vmatprep.subr.mxu0 %v10705_v5 }
0x426d   :  { %12219 = vmatmul.mubr.msk.f32.vlgmr.msra.gmra.mrb[74].mxu0 %vm876_vm2, %v9261_v43  ;;  %v10716_v43 = vld [vmem:[%s14568_s2 + $0x30] sm:$0xff] }
0x426e   :  { %12229 = vmatpush3.msra.mxu0 %v10705_v5  ;;  %v12926_v45 = vpack.c.bf16 %v10717_v44, %v10716_v43 }
0x426f   :  { %12931 = vmatprep.subr.bf16.mxu0 %v12930_v46 }
0x4340   :  { %v12220_v20 = vpop.f32.mrb[74].mxu0 }
0x4341   :  { %v9528_v58 = vmul.f32 0.35355338, %v12220_v20  ;;  %v9518_v10 = vpop.f32.mrb[75].mxu0 }
0x4342   :  { %v9527_v14 = vmul.f32 0.35355338, %v9518_v10 }
0x4343   :  { %v9530_v8 = vadd.f32 %v14291_v36, %v9528_v58 }
0x4344   :  { %v9529_v59 = vadd.f32 %v14295_v47, %v9527_v14 }
0x4345   :  { %v9534_v28 = vsel %vm181_vm0, %v9530_v8, -inf }
0x4346   :  { %9535 = vmax.xlane.f32.xlu1 %v9534_v28  ;;  %v9531_v31 = vsel %vm181_vm0, %v9529_v59, -inf }
0x4347   :  { %9532 = vmax.xlane.f32.xlu0 %v9531_v31 }
0x43d3   :  { %v9536_v60 = vpop.xlane.xlu1 %9535 }
0x43d4   :  { %v9538_v11 = vsub.f32 %v9530_v8, %v9536_v60  ;;  %v9533_v61 = vpop.xlane.xlu0 %9532  ;;  %v10712_v8 = vld [vmem:[%s14570_s10 + $0x1] ss:$0 sm:$0xff] }
0x43d5   :  { %v9537_v62 = vsub.f32 %v9529_v59, %v9533_v61  ;;  %v10713_v60 = vld [vmem:[%s14571_s11 + $0x1] ss:$0 sm:$0xff] }
0x43d6   :  { %v9541_v63 = vmul.f32 1.442695, %v9538_v11 }
0x43d7   :  { %v9539_v0 = vmul.f32 1.442695, %v9537_v62 }
0x43d8   :  { %13195 = vpow2.f32 %v9541_v63 }
0x43d9   :  { %13197 = vpow2.f32 %v9539_v0  ;;  %v10728_v0 = vld [vmem:[%s14569_s7 + $0xb0] sm:$0xff] }
0x43e2   :  { %v13196_v3 = vpop.eup %13195 }
0x43e3   :  { %v13198_v4 = vpop.eup %13197  ;;  %v9546_v36 = vsel %vm181_vm0, %v13196_v3, 0.0 }
0x43e4   :  { %9547 = vadd.xlane.f32.xlu1 %v9546_v36  ;;  %v9543_v47 = vsel %vm181_vm0, %v13198_v4, 0.0  ;;  %v10730_v36 = vld [vmem:[%s14569_s7 + $0xc0] sm:$0xff] }
0x43e5   :  { %9544 = vadd.xlane.f32.xlu0 %v9543_v47  ;;  %v10731_v47 = vld [vmem:[%s14569_s7 + $0xc8] sm:$0xff] }
0x43e6   :  { %v12946_v5 = vpack.c.bf16 %v10731_v47, %v10730_v36 }
0x4471   :  { %v9548_v17 = vpop.xlane.xlu1 %9547 }
0x4472   :  { %13199 = vrcp.f32 %v9548_v17  ;;  %v9545_v1 = vpop.xlane.xlu0 %9544  ;;  %v10732_v17 = vld [vmem:[%s14569_s7 + $0xd0] sm:$0xff] }
0x4473   :  { %13201 = vrcp.f32 %v9545_v1  ;;  %v10733_v1 = vld [vmem:[%s14569_s7 + $0xd8] sm:$0xff] }
0x447c   :  { %v13200_v57 = vpop.eup %13199 }
0x447d   :  { %v13202_v22 = vpop.eup %13201  ;;  %v9552_v55 = vmul.f32 %v13200_v57, %v13196_v3  ;;  %v10729_v3 = vld [vmem:[%s14569_s7 + $0xb8] sm:$0xff]  ;;  %v12950_v57 = vpack.c.bf16 %v10733_v1, %v10732_v17  ;;  %v10742_v1 = vld [vmem:[%s13501_s6] ss:$0 sm:$0xff] }
0x447e   :  { %v9551_v53 = vmul.f32 %v13202_v22, %v13198_v4  ;;  %v12942_v4 = vpack.c.bf16 %v10729_v3, %v10728_v0  ;;  %v10734_v22 = vld [vmem:[%s14569_s7 + $0xe0] sm:$0xff] }
0x4480   :  { %12225 = vmatprep.mubr.msk.f32.mxu1 %vm181_vm0, %v9551_v53  ;;  %v10735_v53 = vld [vmem:[%s14569_s7 + $0xe8] sm:$0xff] }
0x4481   :  { %12226 = vmatmul.mubr.msk.f32.vlgmr.msra.gmra.mrb[102].mxu1 %vm181_vm0, %v9552_v55  ;;  %v12954_v55 = vpack.c.bf16 %v10735_v53, %v10734_v22 }
0x4482   :  { %12925 = vmatpush3.bf16.msra.mxu1 %v12922_v13 }
0x4483   :  { %12927 = vmatprep.subr.bf16.mxu1 %v12926_v45 }
0x4486   :  { %12929 = vmatpush3.bf16.msra.mxu1 %v12926_v45 }
0x4554   :  { %v12227_v12 = vpop.f32.mrb[102].mxu1 }
0x4555   :  { %v9625_v23 = vpop.f32.mrb[103].mxu1 }
0x4556   :  { %12230 = vmatprep.mubr.msk.f32.mxu0 %vm876_vm2, %v9625_v23  ;;  %v10737_v23 = vld [vmem:[%s14569_s7 + $0xf8] sm:$0xff] }
0x4557   :  { %12231 = vmatmul.mubr.msk.f32.vlgmr.msra.gmra.mrb[66].mxu0 %vm876_vm2, %v12227_v12  ;;  %v10736_v12 = vld [vmem:[%s14569_s7 + $0xf0] sm:$0xff] }
0x4558   :  { %12933 = vmatpush3.bf16.msra.mxu0 %v12930_v46 }
0x4559   :  { %12935 = vmatprep.subr.bf16.mxu0 %v12934_v49 }
0x455c   :  { %12937 = vmatpush3.bf16.msra.mxu0 %v12934_v49 }
0x455d   :  { %12939 = vmatprep.subr.bf16.mxu0 %v12938_v51 }
0x4560   :  { %12941 = vmatpush3.bf16.msra.mxu0 %v12938_v51 }
0x4561   :  { %12943 = vmatprep.subr.bf16.mxu0 %v12942_v4 }
0x4564   :  { %12945 = vmatpush3.bf16.msra.mxu0 %v12942_v4  ;;  %v10741_v4 = vld [vmem:[%s13491_s24] ss:$0 sm:$0xff]  ;;  %s13219_s24 = scalar_lea.vmem %s10130_s30, 256 }
0x4565   :  { %12947 = vmatprep.subr.bf16.mxu0 %v12946_v5  ;;  %p13220_p0 = scmp.ne.s32.totalorder %s10130_s30, %s13219_s24  ;;  %p13225_p2 = scmp.lt.s32.totalorder %s13219_s24, %s13219_s24 }
0x4567   :  { %p13226_p3 = por %p13225_p2, %p13224_p1 }
0x4568   :  { %12949 = vmatpush3.bf16.msra.mxu0 %v12946_v5 }
0x4569   :  { %12951 = vmatprep.subr.bf16.mxu0 %v12950_v57  ;;  %p13227_p4 = pnand %p13226_p3, %p13220_p0 }
0x456c   :  { %12953 = vmatpush3.bf16.msra.mxu0 %v12950_v57 }
0x456d   :  { %12955 = vmatprep.subr.bf16.mxu0 %v12954_v55 }
0x4570   :  { %12957 = vmatpush3.bf16.msra.mxu0 %v12954_v55 }
0x462a   :  { %v12232_v25 = vpop.f32.mrb[66].mxu0 }
0x462b   :  { %v9720_v2 = vadd.f32 %v12232_v25, %v14239_v40  ;;  %v9708_v16 = vpop.f32.mrb[67].mxu0  ;;  %v12958_v25 = vpack.c.bf16 %v10737_v23, %v10736_v12 }
0x462c   :  { %v9719_v27 = vadd.f32 %v9708_v16, %v14241_v41 }
0x462d   :  { %v14440_v29 = vadd.f32 %v10709_v24, %v9720_v2  ;;  %12959 = vmatprep.subr.bf16.mxu0 %v12958_v25 }
0x462e   :  { %v14442_v30 = vadd.f32 %v10709_v24, %v9719_v27  ;;  %12961 = vmatpush3.bf16.msra.mxu0 %v12958_v25  ;;  %v10719_v24 = vld [vmem:[%s14572_s3 + $0x1] ss:$0 sm:$0xff] }
0x462f   :  { %v9738_v9 = vsel %vm361_vm1, %v14440_v29, 0.0 }
0x4630   :  { %9739 = vadd.xlane.f32.xlu1 %v9738_v9  ;;  %v9735_v33 = vsel %vm361_vm1, %v14442_v30, 0.0 }
0x4631   :  { %9736 = vadd.xlane.f32.xlu0 %v9735_v33 }
0x46bd   :  { %v9740_v34 = vpop.xlane.xlu1 %9739 }
0x46be   :  { %v9742_v40 = vmul.f32 0.03125, %v9740_v34  ;;  %v9737_v26 = vpop.xlane.xlu0 %9736 }
0x46bf   :  { %v9741_v41 = vmul.f32 0.03125, %v9737_v26 }
0x46c0   :  { %v9744_v37 = vsub.f32 %v14440_v29, %v9742_v40 }
0x46c1   :  { %v9743_v6 = vsub.f32 %v14442_v30, %v9741_v41 }
0x46c2   :  { %v9746_v18 = vmul.f32 %v9744_v37, %v9744_v37 }
0x46c3   :  { %v9745_v21 = vmul.f32 %v9743_v6, %v9743_v6 }
0x46c4   :  { %v9750_v39 = vsel %vm361_vm1, %v9746_v18, 0.0 }
0x46c5   :  { %9751 = vadd.xlane.f32.xlu1 %v9750_v39  ;;  %v9747_v42 = vsel %vm361_vm1, %v9745_v21, 0.0 }
0x46c6   :  { %9748 = vadd.xlane.f32.xlu0 %v9747_v42 }
0x4752   :  { %v9752_v7 = vpop.xlane.xlu1 %9751 }
0x4753   :  { %v9754_v52 = vmul.f32 0.03125, %v9752_v7  ;;  %v9749_v54 = vpop.xlane.xlu0 %9748 }
0x4754   :  { %v9753_v20 = vmul.f32 0.03125, %v9749_v54  ;;  %v10030_v54 = vld [vmem:[%s13496_s20 + $0x8] sm:$0xff] }
0x4755   :  { %v9756_v58 = vadd.f32 1e-05, %v9754_v52  ;;  %v10029_v52 = vld [vmem:[%s13496_s20] sm:$0xff] }
0x4756   :  { %v9755_v10 = vadd.f32 1e-05, %v9753_v20  ;;  %v12962_v20 = vpack.c.bf16 %v10030_v54, %v10029_v52 }
0x4757   :  { %13203 = vrsqrt.f32 %v9756_v58  ;;  %v10031_v58 = vld [vmem:[%s13496_s20 + $0x10] sm:$0xff] }
0x4758   :  { %13205 = vrsqrt.f32 %v9755_v10  ;;  %12963 = vmatprep.subr.bf16.mxu1 %v12962_v20  ;;  %v10032_v10 = vld [vmem:[%s13496_s20 + $0x18] sm:$0xff] }
0x4761   :  { %v13204_v14 = vpop.eup %13203 }
0x4762   :  { %v13206_v59 = vpop.eup %13205  ;;  %v9760_v28 = vmul.f32 %v13204_v14, %v9744_v37  ;;  %v12966_v14 = vpack.c.bf16 %v10032_v10, %v10031_v58 }
0x4763   :  { %v9759_v31 = vmul.f32 %v13206_v59, %v9743_v6 }
0x4764   :  { %v9768_v11 = vmul.f32 %v10712_v8, %v9760_v28 }
0x4765   :  { %v9767_v61 = vmul.f32 %v10712_v8, %v9759_v31 }
0x4766   :  { %v9776_v63 = vadd.f32 %v10713_v60, %v9768_v11 }
0x4767   :  { %v9775_v62 = vadd.f32 %v10713_v60, %v9767_v61 }
0x4769   :  { %12241 = vmatprep.mubr.msk.f32.mxu1 %vm361_vm1, %v9775_v62  ;;  %v10740_v62 = vld [vmem:[%s14574_s21] ss:$0 sm:$0xff] }
0x476a   :  { %12242 = vmatmul.mubr.msk.f32.vlgmr.msra.gmra.mrb[104].mxu1 %vm361_vm1, %v9776_v63 }
0x476b   :  { %12965 = vmatpush3.bf16.msra.mxu1 %v12962_v20 }
0x476c   :  { %12967 = vmatprep.subr.bf16.mxu1 %v12966_v14 }
0x476f   :  { %12969 = vmatpush3.bf16.msra.mxu1 %v12966_v14 }
0x483d   :  { %v12243_v2 = vpop.f32.mrb[104].mxu1 }
0x483e   :  { %v9868_v16 = vadd.f32 %v12243_v2, %v10719_v24  ;;  %v9862_v27 = vpop.f32.mrb[105].mxu1 }
0x483f   :  { %v9863_v9 = vadd.f32 %v10719_v24, %v9862_v27 }
0x4840   :  { %v9874_v33 = vmul.f32 0.70710677, %v9868_v16  ;;  %v9872_v18 = vmul.f32 0.5, %v9868_v16 }
0x4841   :  { %v9873_v34 = vmul.f32 0.70710677, %v9863_v9  ;;  %v9871_v37 = vmul.f32 0.5, %v9863_v9 }
0x4842   :  { %13207 = verf.f32 %v9874_v33 }
0x4843   :  { %13209 = verf.f32 %v9873_v34 }
0x484c   :  { %v13208_v40 = vpop.eup %13207 }
0x484d   :  { %v13210_v26 = vpop.eup %13209  ;;  %v9878_v41 = vadd.f32 1.0, %v13208_v40 }
0x484e   :  { %v9877_v6 = vadd.f32 1.0, %v13210_v26 }
0x484f   :  { %v9880_v39 = vmul.f32 %v9878_v41, %v9872_v18 }
0x4850   :  { %v9879_v21 = vmul.f32 %v9877_v6, %v9871_v37 }
0x4852   :  { %12276 = vmatprep.mubr.f32.mxu0 %v9879_v21 }
0x4853   :  { %12277 = vmatmul.mubr.f32.vlgmr.msra.gmra.mrb[76].mxu0 %v9880_v39 }
0x4926   :  { %v12278_v42 = vpop.f32.mrb[76].mxu0 }
0x4927   :  { %v9974_v32 = vadd.f32 %v12278_v42, %v14440_v29  ;;  %v9964_v13 = vpop.f32.mrb[77].mxu0 }
0x4928   :  { %v9973_v43 = vadd.f32 %v9964_v13, %v14442_v30 }
0x4929   :  { %v9984_v44 = vadd.f32 %v10739_v56, %v9974_v32 }
0x492a   :  { %v9983_v45 = vadd.f32 %v10739_v56, %v9973_v43 }
0x492b   :  { %v9990_v35 = vsel %vm361_vm1, %v9984_v44, 0.0 }
0x492c   :  { %9991 = vadd.xlane.f32.xlu1 %v9990_v35  ;;  %v9987_v15 = vsel %vm361_vm1, %v9983_v45, 0.0 }
0x492d   :  { %9988 = vadd.xlane.f32.xlu0 %v9987_v15 }
0x49b9   :  { %v9992_v38 = vpop.xlane.xlu1 %9991 }
0x49ba   :  { %v9994_v46 = vmul.f32 0.03125, %v9992_v38  ;;  %v9989_v48 = vpop.xlane.xlu0 %9988 }
0x49bb   :  { %v9993_v49 = vmul.f32 0.03125, %v9989_v48 }
0x49bc   :  { %v9996_v29 = vsub.f32 %v9984_v44, %v9994_v46 }
0x49bd   :  { %v9995_v19 = vsub.f32 %v9983_v45, %v9993_v49 }
0x49be   :  { %v9998_v50 = vmul.f32 %v9996_v29, %v9996_v29 }
0x49bf   :  { %v9997_v30 = vmul.f32 %v9995_v19, %v9995_v19 }
0x49c0   :  { %v10002_v51 = vsel %vm361_vm1, %v9998_v50, 0.0 }
0x49c1   :  { %10003 = vadd.xlane.f32.xlu1 %v10002_v51  ;;  %v9999_v7 = vsel %vm361_vm1, %v9997_v30, 0.0 }
0x49c2   :  { %10000 = vadd.xlane.f32.xlu0 %v9999_v7 }
0x4a4e   :  { %v10004_v8 = vpop.xlane.xlu1 %10003 }
0x4a4f   :  { %v10006_v59 = vmul.f32 0.03125, %v10004_v8  ;;  %v10001_v28 = vpop.xlane.xlu0 %10000 }
0x4a50   :  { %v10005_v31 = vmul.f32 0.03125, %v10001_v28 }
0x4a51   :  { %v10008_v60 = vadd.f32 1e-05, %v10006_v59 }
0x4a52   :  { %v10007_v11 = vadd.f32 1e-05, %v10005_v31 }
0x4a53   :  { %13211 = vrsqrt.f32 %v10008_v60 }
0x4a54   :  { %13213 = vrsqrt.f32 %v10007_v11 }
0x4a5d   :  { %v13212_v61 = vpop.eup %13211 }
0x4a5e   :  { %v13214_v63 = vpop.eup %13213  ;;  %v10012_v0 = vmul.f32 %v13212_v61, %v9996_v29 }
0x4a5f   :  { %v10011_v3 = vmul.f32 %v13214_v63, %v9995_v19 }
0x4a60   :  { %v10020_v36 = vmul.f32 %v10740_v62, %v10012_v0 }
0x4a61   :  { %v10019_v47 = vmul.f32 %v10740_v62, %v10011_v3 }
0x4a62   :  { %v10028_v17 = vadd.f32 %v10741_v4, %v10020_v36 }
0x4a63   :  { %v10027_v5 = vadd.f32 %v10741_v4, %v10019_v47 }
0x4a65   :  { %12287 = vmatprep.mubr.msk.f32.mxu1 %vm361_vm1, %v10027_v5 }
0x4a66   :  { %12288 = vmatmul.mubr.msk.f32.vlgmr.msra.gmra.mrb[106].mxu1 %vm361_vm1, %v10028_v17 }
0x4b39   :  { %v12289_v57 = vpop.f32.mrb[106].mxu1 }
0x4b3a   :  { %v10118_v22 = vadd.f32 %v12289_v57, %v10742_v1  ;;  %v10112_v53 = vpop.f32.mrb[107].mxu1 }
0x4b3b   :  { %v10113_v55 = vadd.f32 %v10742_v1, %v10112_v53 }
0x4b3c   :  { %10123 = vst.msk [vmem:[#allocation2 + $0x8] sm:$0xff] %vm10121_vm4, %v10118_v22 }
0x4b3d   :  { %10122 = vst.msk [vmem:[#allocation2] sm:$0xff] %vm10121_vm4, %v10113_v55 }
0x4b3e   :  { %13230 = shalt.err (!%p13227_p4)
}
0x4b3f   :  { %s14575_s12 = sld [smem:[#allocation30_spill]] }
0x4b45   :  { %s13231_s6 = scalar_lea.hbm %s14575_s12, 256 }
0x4b46   :  { %p13232_p5 = scmp.ne.s32.totalorder %s14575_s12, %s13231_s6  ;;  %p13235_p6 = scmp.lt.u32.totalorder %s13231_s6, %s14575_s12 }
0x4b48   :  { %p13237_p7 = pnand %p13235_p6, %p13232_p5 }
0x4b4a   :  { %13240 = shalt.err (!%p13237_p7)
}
0x4b4b   :  { %s13286_s20 = smov 128   ;;  %s13287_s27 = smov 8  }
0x4b4c   :  { %10135 = dma.vmem_to_hbm [thread:$0]  %s10130_s30, 256, %s14575_s12, [#allocation3], %s13286_s20, %s13286_s20, %s13287_s27  }
0x4b4d   :  { %13241 = dma.done.wait [#allocation3], 256  }
0x4b4e   :  { %13242 = vsyncadd [#allocation3], 4294967040 }
0x4b4f   :  { %10139 = vsyncpa [#allocation3], 1 }

</bundles_post_ra>
